<compile_context>
chip_gen: v5e
topology: v5e:2x2
jax: 0.10.0
libtpu: 0.0.40
codegen_flags: <defaults>
</compile_context>

<pallas_src>
import functools

import jax
import jax.numpy as jnp
import numpy as np
from jax.experimental import pallas as pl
from jax.experimental.pallas import tpu as pltpu


# ----------------------------------------------------------------------------
# Fused whole-network kernel.
# refs = [x, (wih, whh, bih, bhh) * num_layers, w_out, b_out, out, seq_scratch]
# ----------------------------------------------------------------------------
def _net_kernel(num_layers, B, T, H, O, *refs):
    x_ref = refs[0]
    layer_refs = refs[1:1 + 4 * num_layers]
    w_out_ref = refs[1 + 4 * num_layers]
    b_out_ref = refs[2 + 4 * num_layers]
    out_ref = refs[3 + 4 * num_layers]
    seq_ref = refs[4 + 4 * num_layers]          # VMEM scratch (B, T, H)

    for l in range(num_layers):
        wih_ref, whh_ref, bih_ref, bhh_ref = layer_refs[4 * l:4 * l + 4]
        layer_in = x_ref[...] if l == 0 else seq_ref[...]      # (B, T, D_l)
        d_in = layer_in.shape[-1]

        wih = wih_ref[...]                                     # (D_l, 3H)
        whh = whh_ref[...]                                     # (H, 3H)
        bih = bih_ref[...]                                     # (1, 3H)
        # Hoist the recurrent-bias broadcast out of the time loop.
        bhh_b = jnp.broadcast_to(bhh_ref[...], (B, 3 * H))     # (B, 3H)

        # Input projection for ALL timesteps at once (one wide MXU matmul).
        gi = jnp.dot(layer_in.reshape(B * T, d_in), wih,
                     preferred_element_type=jnp.float32) + bih  # (B*T, 3H)
        gi = gi.reshape(B, T, 3 * H)

        h = jnp.zeros((B, H), jnp.float32)
        for t in range(T):  # static unroll: only the recurrent dot is per-step
            gh = jnp.dot(h, whh, preferred_element_type=jnp.float32) + bhh_b
            gi_t = gi[:, t, :]                                 # (B, 3H) static
            r = jax.nn.sigmoid(gi_t[:, :H] + gh[:, :H])
            z = jax.nn.sigmoid(gi_t[:, H:2 * H] + gh[:, H:2 * H])
            n = jnp.tanh(gi_t[:, 2 * H:] + r * gh[:, 2 * H:])
            h = (1.0 - z) * n + z * h
            seq_ref[:, pl.ds(t, 1), :] = h[:, None, :]          # static store

    # Output head: ONE matmul over all B*T rows, then sigmoid.
    feats = seq_ref[...].reshape(B * T, H)
    y = jnp.dot(feats, w_out_ref[...],
                preferred_element_type=jnp.float32) + b_out_ref[...]
    out_ref[...] = jax.nn.sigmoid(y).reshape(B, T, O).astype(out_ref.dtype)


def net_forward_pallas(params, x_btd):
    # x_btd: (B, T, input_size) -- PyTorch batch_first convention, kept as-is.
    B, T, _ = x_btd.shape
    num_layers = len(params["layers"])
    H = params["layers"][0]["whh"].shape[0]
    O = params["w_out"].shape[1]

    inputs = [x_btd]
    for lp in params["layers"]:
        inputs += [lp["wih"], lp["whh"], lp["bih"], lp["bhh"]]
    inputs += [params["w_out"], params["b_out"]]

    kernel = functools.partial(_net_kernel, num_layers, B, T, H, O)
    vmem = pltpu.MemorySpace.VMEM
    return pl.pallas_call(
        kernel,
        out_shape=jax.ShapeDtypeStruct((B, T, O), jnp.float32),
        in_specs=[pl.BlockSpec(memory_space=vmem)] * len(inputs),
        out_specs=pl.BlockSpec(memory_space=vmem),
        scratch_shapes=[pltpu.VMEM((B, T, H), jnp.float32)],
        # TODO(synk): for large H set pltpu.CompilerParams(vmem_limit_bytes=...)
        # and add a "parallel" batch-tile grid axis to use both v7x TensorCores.
    )(*inputs)


net_forward = jax.jit(net_forward_pallas)


# ----------------------------------------------------------------------------
# Params: fused-gate layout (gate order r, z, n along the 3H axis).
# ----------------------------------------------------------------------------
def init_params(key, input_size, hidden_size, output_size, num_layers):
    k = 1.0 / np.sqrt(hidden_size)
    params = {"layers": []}
    for layer in range(num_layers):
        d_in = input_size if layer == 0 else hidden_size
        key, k1, k2, k3, k4 = jax.random.split(key, 5)
        params["layers"].append(
            dict(
                wih=jax.random.uniform(k1, (d_in, 3 * hidden_size), jnp.float32, -k, k),
                whh=jax.random.uniform(k2, (hidden_size, 3 * hidden_size), jnp.float32, -k, k),
                bih=jax.random.uniform(k3, (1, 3 * hidden_size), jnp.float32, -k, k),
                bhh=jax.random.uniform(k4, (1, 3 * hidden_size), jnp.float32, -k, k),
            )
        )
    key, k5, k6 = jax.random.split(key, 3)
    params["w_out"] = jax.random.uniform(k5, (hidden_size, output_size), jnp.float32, -k, k)
    params["b_out"] = jax.random.uniform(k6, (1, output_size), jnp.float32, -k, k)
    return params


# ----------------------------------------------------------------------------
# Pure-JAX reference (correctness check), same fused-gate weight layout.
# ----------------------------------------------------------------------------
def net_forward_ref(params, x_btd):
    seq = x_btd  # (B, T, D)
    for lp in params["layers"]:
        wih, whh, bih, bhh = lp["wih"], lp["whh"], lp["bih"], lp["bhh"]
        B = seq.shape[0]
        H = whh.shape[0]

        def step(h_prev, x_t):
            gi = x_t @ wih + bih           # (B, 3H)
            gh = h_prev @ whh + bhh        # (B, 3H)
            r = jax.nn.sigmoid(gi[:, :H] + gh[:, :H])
            z = jax.nn.sigmoid(gi[:, H:2 * H] + gh[:, H:2 * H])
            n = jnp.tanh(gi[:, 2 * H:] + r * gh[:, 2 * H:])
            h_new = (1.0 - z) * n + z * h_prev
            return h_new, h_new

        h0 = jnp.zeros((B, H), jnp.float32)
        _, ys = jax.lax.scan(step, h0, jnp.transpose(seq, (1, 0, 2)))  # (T,B,H)
        seq = jnp.transpose(ys, (1, 0, 2))
    y = seq @ params["w_out"] + params["b_out"]
    return jax.nn.sigmoid(y)


if __name__ == "__main__":
    B, T = 4, 8
    input_size, hidden_size, output_size, num_layers = 16, 32, 8, 2

    key = jax.random.PRNGKey(0)
    pkey, xkey = jax.random.split(key)
    params = init_params(pkey, input_size, hidden_size, output_size, num_layers)
    x = jax.random.normal(xkey, (B, T, input_size), jnp.float32)

    out = net_forward(params, x)
    jax.block_until_ready(out)

    ref = net_forward_ref(params, x)
    np.testing.assert_allclose(np.asarray(out), np.asarray(ref), atol=1e-5, rtol=1e-5)
    assert out.shape == (B, T, output_size)
    print("KERNEL_OK")
</pallas_src>

<mosaic_0001>
module attributes {stable_mosaic.version = 11 : i64} {
  func.func @_net_kernel(%arg0: memref<4x8x16xf32, #tpu.memory_space<vmem>>, %arg1: memref<16x96xf32, #tpu.memory_space<vmem>>, %arg2: memref<32x96xf32, #tpu.memory_space<vmem>>, %arg3: memref<1x96xf32, #tpu.memory_space<vmem>>, %arg4: memref<1x96xf32, #tpu.memory_space<vmem>>, %arg5: memref<32x96xf32, #tpu.memory_space<vmem>>, %arg6: memref<32x96xf32, #tpu.memory_space<vmem>>, %arg7: memref<1x96xf32, #tpu.memory_space<vmem>>, %arg8: memref<1x96xf32, #tpu.memory_space<vmem>>, %arg9: memref<32x8xf32, #tpu.memory_space<vmem>>, %arg10: memref<1x8xf32, #tpu.memory_space<vmem>>, %arg11: memref<4x8x8xf32, #tpu.memory_space<vmem>>, %arg12: memref<4x8x32xf32, #tpu.memory_space<vmem>>) attributes {dimension_semantics = [], scalar_prefetch = 0 : i64, scratch_operands = 1 : i64, tpu.core_type = #tpu.core_type<tc>} {
    %c0 = arith.constant 0 : index
    %c0_0 = arith.constant 0 : index
    %c0_1 = arith.constant 0 : index
    %0 = vector.load %arg0[%c0, %c0_0, %c0_1] : memref<4x8x16xf32, #tpu.memory_space<vmem>>, vector<4x8x16xf32>
    %c0_2 = arith.constant 0 : index
    %c0_3 = arith.constant 0 : index
    %1 = vector.load %arg1[%c0_2, %c0_3] : memref<16x96xf32, #tpu.memory_space<vmem>>, vector<16x96xf32>
    %c0_4 = arith.constant 0 : index
    %c0_5 = arith.constant 0 : index
    %2 = vector.load %arg2[%c0_4, %c0_5] : memref<32x96xf32, #tpu.memory_space<vmem>>, vector<32x96xf32>
    %c0_6 = arith.constant 0 : index
    %c0_7 = arith.constant 0 : index
    %3 = vector.load %arg3[%c0_6, %c0_7] : memref<1x96xf32, #tpu.memory_space<vmem>>, vector<1x96xf32>
    %c0_8 = arith.constant 0 : index
    %c0_9 = arith.constant 0 : index
    %4 = vector.load %arg4[%c0_8, %c0_9] : memref<1x96xf32, #tpu.memory_space<vmem>>, vector<1x96xf32>
    %5 = vector.shape_cast %4 : vector<1x96xf32> to vector<1x96xf32>
    %6 = vector.broadcast %5 : vector<1x96xf32> to vector<4x96xf32>
    %7 = vector.shape_cast %0 : vector<4x8x16xf32> to vector<32x16xf32>
    %cst = arith.constant dense<0.000000e+00> : vector<32x96xf32>
    %8 = tpu.matmul %7, %1, %cst {dimension_numbers = #tpu.dot_dimension_numbers<[1], [0], [0], [1], [0, 0, 1, 1], [], []>} : vector<32x16xf32>, vector<16x96xf32>, vector<32x96xf32> -> vector<32x96xf32>
    %9 = vector.broadcast %3 : vector<1x96xf32> to vector<32x96xf32>
    %10 = arith.addf %8, %9 : vector<32x96xf32>
    %11 = vector.shape_cast %10 : vector<32x96xf32> to vector<4x8x96xf32>
    %cst_10 = arith.constant 0.000000e+00 : f32
    %12 = vector.broadcast %cst_10 : f32 to vector<4x32xf32>
    %cst_11 = arith.constant dense<0.000000e+00> : vector<4x96xf32>
    %13 = tpu.matmul %12, %2, %cst_11 {dimension_numbers = #tpu.dot_dimension_numbers<[1], [0], [0], [1], [0, 0, 1, 1], [], []>} : vector<4x32xf32>, vector<32x96xf32>, vector<4x96xf32> -> vector<4x96xf32>
    %14 = arith.addf %13, %6 : vector<4x96xf32>
    %15 = vector.extract_strided_slice %11 {offsets = [0, 0, 0], sizes = [4, 1, 96], strides = [1, 1, 1]} : vector<4x8x96xf32> to vector<4x1x96xf32>
    %16 = vector.shape_cast %15 : vector<4x1x96xf32> to vector<4x96xf32>
    %17 = vector.extract_strided_slice %16 {offsets = [0, 0], sizes = [4, 32], strides = [1, 1]} : vector<4x96xf32> to vector<4x32xf32>
    %18 = vector.extract_strided_slice %14 {offsets = [0, 0], sizes = [4, 32], strides = [1, 1]} : vector<4x96xf32> to vector<4x32xf32>
    %19 = arith.addf %17, %18 : vector<4x32xf32>
    %20 = arith.negf %19 : vector<4x32xf32>
    %21 = math.exp %20 : vector<4x32xf32>
    %cst_12 = arith.constant 1.000000e+00 : f32
    %22 = vector.broadcast %cst_12 : f32 to vector<4x32xf32>
    %23 = arith.addf %22, %21 : vector<4x32xf32>
    %24 = arith.divf %22, %23 : vector<4x32xf32>
    %25 = vector.extract_strided_slice %16 {offsets = [0, 32], sizes = [4, 32], strides = [1, 1]} : vector<4x96xf32> to vector<4x32xf32>
    %26 = vector.extract_strided_slice %14 {offsets = [0, 32], sizes = [4, 32], strides = [1, 1]} : vector<4x96xf32> to vector<4x32xf32>
    %27 = arith.addf %25, %26 : vector<4x32xf32>
    %28 = arith.negf %27 : vector<4x32xf32>
    %29 = math.exp %28 : vector<4x32xf32>
    %cst_13 = arith.constant 1.000000e+00 : f32
    %30 = vector.broadcast %cst_13 : f32 to vector<4x32xf32>
    %31 = arith.addf %30, %29 : vector<4x32xf32>
    %32 = arith.divf %30, %31 : vector<4x32xf32>
    %33 = vector.extract_strided_slice %16 {offsets = [0, 64], sizes = [4, 32], strides = [1, 1]} : vector<4x96xf32> to vector<4x32xf32>
    %34 = vector.extract_strided_slice %14 {offsets = [0, 64], sizes = [4, 32], strides = [1, 1]} : vector<4x96xf32> to vector<4x32xf32>
    %35 = arith.mulf %24, %34 : vector<4x32xf32>
    %36 = arith.addf %33, %35 : vector<4x32xf32>
    %37 = math.tanh %36 : vector<4x32xf32>
    %cst_14 = arith.constant 1.000000e+00 : f32
    %38 = vector.broadcast %cst_14 : f32 to vector<4x32xf32>
    %39 = arith.subf %38, %32 : vector<4x32xf32>
    %40 = arith.mulf %39, %37 : vector<4x32xf32>
    %41 = arith.mulf %32, %12 : vector<4x32xf32>
    %42 = arith.addf %40, %41 : vector<4x32xf32>
    %43 = vector.shape_cast %42 : vector<4x32xf32> to vector<4x1x32xf32>
    %c0_15 = arith.constant 0 : index
    %c0_16 = arith.constant 0 : index
    %c0_17 = arith.constant 0 : index
    %44 = vector.load %arg12[%c0_15, %c0_16, %c0_17] : memref<4x8x32xf32, #tpu.memory_space<vmem>>, vector<4x1x32xf32>
    tpu.vector_store %arg12[%c0_15, %c0_16, %c0_17], %43 {strides = array<i32>} : memref<4x8x32xf32, #tpu.memory_space<vmem>>, vector<4x1x32xf32>,
    %cst_18 = arith.constant dense<0.000000e+00> : vector<4x96xf32>
    %45 = tpu.matmul %42, %2, %cst_18 {dimension_numbers = #tpu.dot_dimension_numbers<[1], [0], [0], [1], [0, 0, 1, 1], [], []>} : vector<4x32xf32>, vector<32x96xf32>, vector<4x96xf32> -> vector<4x96xf32>
    %46 = arith.addf %45, %6 : vector<4x96xf32>
    %47 = vector.extract_strided_slice %11 {offsets = [0, 1, 0], sizes = [4, 1, 96], strides = [1, 1, 1]} : vector<4x8x96xf32> to vector<4x1x96xf32>
    %48 = vector.shape_cast %47 : vector<4x1x96xf32> to vector<4x96xf32>
    %49 = vector.extract_strided_slice %48 {offsets = [0, 0], sizes = [4, 32], strides = [1, 1]} : vector<4x96xf32> to vector<4x32xf32>
    %50 = vector.extract_strided_slice %46 {offsets = [0, 0], sizes = [4, 32], strides = [1, 1]} : vector<4x96xf32> to vector<4x32xf32>
    %51 = arith.addf %49, %50 : vector<4x32xf32>
    %52 = arith.negf %51 : vector<4x32xf32>
    %53 = math.exp %52 : vector<4x32xf32>
    %cst_19 = arith.constant 1.000000e+00 : f32
    %54 = vector.broadcast %cst_19 : f32 to vector<4x32xf32>
    %55 = arith.addf %54, %53 : vector<4x32xf32>
    %56 = arith.divf %54, %55 : vector<4x32xf32>
    %57 = vector.extract_strided_slice %48 {offsets = [0, 32], sizes = [4, 32], strides = [1, 1]} : vector<4x96xf32> to vector<4x32xf32>
    %58 = vector.extract_strided_slice %46 {offsets = [0, 32], sizes = [4, 32], strides = [1, 1]} : vector<4x96xf32> to vector<4x32xf32>
    %59 = arith.addf %57, %58 : vector<4x32xf32>
    %60 = arith.negf %59 : vector<4x32xf32>
    %61 = math.exp %60 : vector<4x32xf32>
    %cst_20 = arith.constant 1.000000e+00 : f32
    %62 = vector.broadcast %cst_20 : f32 to vector<4x32xf32>
    %63 = arith.addf %62, %61 : vector<4x32xf32>
    %64 = arith.divf %62, %63 : vector<4x32xf32>
    %65 = vector.extract_strided_slice %48 {offsets = [0, 64], sizes = [4, 32], strides = [1, 1]} : vector<4x96xf32> to vector<4x32xf32>
    %66 = vector.extract_strided_slice %46 {offsets = [0, 64], sizes = [4, 32], strides = [1, 1]} : vector<4x96xf32> to vector<4x32xf32>
    %67 = arith.mulf %56, %66 : vector<4x32xf32>
    %68 = arith.addf %65, %67 : vector<4x32xf32>
    %69 = math.tanh %68 : vector<4x32xf32>
    %cst_21 = arith.constant 1.000000e+00 : f32
    %70 = vector.broadcast %cst_21 : f32 to vector<4x32xf32>
    %71 = arith.subf %70, %64 : vector<4x32xf32>
    %72 = arith.mulf %71, %69 : vector<4x32xf32>
    %73 = arith.mulf %64, %42 : vector<4x32xf32>
    %74 = arith.addf %72, %73 : vector<4x32xf32>
    %75 = vector.shape_cast %74 : vector<4x32xf32> to vector<4x1x32xf32>
    %c0_22 = arith.constant 0 : index
    %c1 = arith.constant 1 : index
    %c0_23 = arith.constant 0 : index
    %76 = vector.load %arg12[%c0_22, %c1, %c0_23] : memref<4x8x32xf32, #tpu.memory_space<vmem>>, vector<4x1x32xf32>
    tpu.vector_store %arg12[%c0_22, %c1, %c0_23], %75 {strides = array<i32>} : memref<4x8x32xf32, #tpu.memory_space<vmem>>, vector<4x1x32xf32>,
    %cst_24 = arith.constant dense<0.000000e+00> : vector<4x96xf32>
    %77 = tpu.matmul %74, %2, %cst_24 {dimension_numbers = #tpu.dot_dimension_numbers<[1], [0], [0], [1], [0, 0, 1, 1], [], []>} : vector<4x32xf32>, vector<32x96xf32>, vector<4x96xf32> -> vector<4x96xf32>
    %78 = arith.addf %77, %6 : vector<4x96xf32>
    %79 = vector.extract_strided_slice %11 {offsets = [0, 2, 0], sizes = [4, 1, 96], strides = [1, 1, 1]} : vector<4x8x96xf32> to vector<4x1x96xf32>
    %80 = vector.shape_cast %79 : vector<4x1x96xf32> to vector<4x96xf32>
    %81 = vector.extract_strided_slice %80 {offsets = [0, 0], sizes = [4, 32], strides = [1, 1]} : vector<4x96xf32> to vector<4x32xf32>
    %82 = vector.extract_strided_slice %78 {offsets = [0, 0], sizes = [4, 32], strides = [1, 1]} : vector<4x96xf32> to vector<4x32xf32>
    %83 = arith.addf %81, %82 : vector<4x32xf32>
    %84 = arith.negf %83 : vector<4x32xf32>
    %85 = math.exp %84 : vector<4x32xf32>
    %cst_25 = arith.constant 1.000000e+00 : f32
    %86 = vector.broadcast %cst_25 : f32 to vector<4x32xf32>
    %87 = arith.addf %86, %85 : vector<4x32xf32>
    %88 = arith.divf %86, %87 : vector<4x32xf32>
    %89 = vector.extract_strided_slice %80 {offsets = [0, 32], sizes = [4, 32], strides = [1, 1]} : vector<4x96xf32> to vector<4x32xf32>
    %90 = vector.extract_strided_slice %78 {offsets = [0, 32], sizes = [4, 32], strides = [1, 1]} : vector<4x96xf32> to vector<4x32xf32>
    %91 = arith.addf %89, %90 : vector<4x32xf32>
    %92 = arith.negf %91 : vector<4x32xf32>
    %93 = math.exp %92 : vector<4x32xf32>
    %cst_26 = arith.constant 1.000000e+00 : f32
    %94 = vector.broadcast %cst_26 : f32 to vector<4x32xf32>
    %95 = arith.addf %94, %93 : vector<4x32xf32>
    %96 = arith.divf %94, %95 : vector<4x32xf32>
    %97 = vector.extract_strided_slice %80 {offsets = [0, 64], sizes = [4, 32], strides = [1, 1]} : vector<4x96xf32> to vector<4x32xf32>
    %98 = vector.extract_strided_slice %78 {offsets = [0, 64], sizes = [4, 32], strides = [1, 1]} : vector<4x96xf32> to vector<4x32xf32>
    %99 = arith.mulf %88, %98 : vector<4x32xf32>
    %100 = arith.addf %97, %99 : vector<4x32xf32>
    %101 = math.tanh %100 : vector<4x32xf32>
    %cst_27 = arith.constant 1.000000e+00 : f32
    %102 = vector.broadcast %cst_27 : f32 to vector<4x32xf32>
    %103 = arith.subf %102, %96 : vector<4x32xf32>
    %104 = arith.mulf %103, %101 : vector<4x32xf32>
    %105 = arith.mulf %96, %74 : vector<4x32xf32>
    %106 = arith.addf %104, %105 : vector<4x32xf32>
    %107 = vector.shape_cast %106 : vector<4x32xf32> to vector<4x1x32xf32>
    %c0_28 = arith.constant 0 : index
    %c2 = arith.constant 2 : index
    %c0_29 = arith.constant 0 : index
    %108 = vector.load %arg12[%c0_28, %c2, %c0_29] : memref<4x8x32xf32, #tpu.memory_space<vmem>>, vector<4x1x32xf32>
    tpu.vector_store %arg12[%c0_28, %c2, %c0_29], %107 {strides = array<i32>} : memref<4x8x32xf32, #tpu.memory_space<vmem>>, vector<4x1x32xf32>,
    %cst_30 = arith.constant dense<0.000000e+00> : vector<4x96xf32>
    %109 = tpu.matmul %106, %2, %cst_30 {dimension_numbers = #tpu.dot_dimension_numbers<[1], [0], [0], [1], [0, 0, 1, 1], [], []>} : vector<4x32xf32>, vector<32x96xf32>, vector<4x96xf32> -> vector<4x96xf32>
    %110 = arith.addf %109, %6 : vector<4x96xf32>
    %111 = vector.extract_strided_slice %11 {offsets = [0, 3, 0], sizes = [4, 1, 96], strides = [1, 1, 1]} : vector<4x8x96xf32> to vector<4x1x96xf32>
    %112 = vector.shape_cast %111 : vector<4x1x96xf32> to vector<4x96xf32>
    %113 = vector.extract_strided_slice %112 {offsets = [0, 0], sizes = [4, 32], strides = [1, 1]} : vector<4x96xf32> to vector<4x32xf32>
    %114 = vector.extract_strided_slice %110 {offsets = [0, 0], sizes = [4, 32], strides = [1, 1]} : vector<4x96xf32> to vector<4x32xf32>
    %115 = arith.addf %113, %114 : vector<4x32xf32>
    %116 = arith.negf %115 : vector<4x32xf32>
    %117 = math.exp %116 : vector<4x32xf32>
    %cst_31 = arith.constant 1.000000e+00 : f32
    %118 = vector.broadcast %cst_31 : f32 to vector<4x32xf32>
    %119 = arith.addf %118, %117 : vector<4x32xf32>
    %120 = arith.divf %118, %119 : vector<4x32xf32>
    %121 = vector.extract_strided_slice %112 {offsets = [0, 32], sizes = [4, 32], strides = [1, 1]} : vector<4x96xf32> to vector<4x32xf32>
    %122 = vector.extract_strided_slice %110 {offsets = [0, 32], sizes = [4, 32], strides = [1, 1]} : vector<4x96xf32> to vector<4x32xf32>
    %123 = arith.addf %121, %122 : vector<4x32xf32>
    %124 = arith.negf %123 : vector<4x32xf32>
    %125 = math.exp %124 : vector<4x32xf32>
    %cst_32 = arith.constant 1.000000e+00 : f32
    %126 = vector.broadcast %cst_32 : f32 to vector<4x32xf32>
    %127 = arith.addf %126, %125 : vector<4x32xf32>
    %128 = arith.divf %126, %127 : vector<4x32xf32>
    %129 = vector.extract_strided_slice %112 {offsets = [0, 64], sizes = [4, 32], strides = [1, 1]} : vector<4x96xf32> to vector<4x32xf32>
    %130 = vector.extract_strided_slice %110 {offsets = [0, 64], sizes = [4, 32], strides = [1, 1]} : vector<4x96xf32> to vector<4x32xf32>
    %131 = arith.mulf %120, %130 : vector<4x32xf32>
    %132 = arith.addf %129, %131 : vector<4x32xf32>
    %133 = math.tanh %132 : vector<4x32xf32>
    %cst_33 = arith.constant 1.000000e+00 : f32
    %134 = vector.broadcast %cst_33 : f32 to vector<4x32xf32>
    %135 = arith.subf %134, %128 : vector<4x32xf32>
    %136 = arith.mulf %135, %133 : vector<4x32xf32>
    %137 = arith.mulf %128, %106 : vector<4x32xf32>
    %138 = arith.addf %136, %137 : vector<4x32xf32>
    %139 = vector.shape_cast %138 : vector<4x32xf32> to vector<4x1x32xf32>
    %c0_34 = arith.constant 0 : index
    %c3 = arith.constant 3 : index
    %c0_35 = arith.constant 0 : index
    %140 = vector.load %arg12[%c0_34, %c3, %c0_35] : memref<4x8x32xf32, #tpu.memory_space<vmem>>, vector<4x1x32xf32>
    tpu.vector_store %arg12[%c0_34, %c3, %c0_35], %139 {strides = array<i32>} : memref<4x8x32xf32, #tpu.memory_space<vmem>>, vector<4x1x32xf32>,
    %cst_36 = arith.constant dense<0.000000e+00> : vector<4x96xf32>
    %141 = tpu.matmul %138, %2, %cst_36 {dimension_numbers = #tpu.dot_dimension_numbers<[1], [0], [0], [1], [0, 0, 1, 1], [], []>} : vector<4x32xf32>, vector<32x96xf32>, vector<4x96xf32> -> vector<4x96xf32>
    %142 = arith.addf %141, %6 : vector<4x96xf32>
    %143 = vector.extract_strided_slice %11 {offsets = [0, 4, 0], sizes = [4, 1, 96], strides = [1, 1, 1]} : vector<4x8x96xf32> to vector<4x1x96xf32>
    %144 = vector.shape_cast %143 : vector<4x1x96xf32> to vector<4x96xf32>
    %145 = vector.extract_strided_slice %144 {offsets = [0, 0], sizes = [4, 32], strides = [1, 1]} : vector<4x96xf32> to vector<4x32xf32>
    %146 = vector.extract_strided_slice %142 {offsets = [0, 0], sizes = [4, 32], strides = [1, 1]} : vector<4x96xf32> to vector<4x32xf32>
    %147 = arith.addf %145, %146 : vector<4x32xf32>
    %148 = arith.negf %147 : vector<4x32xf32>
    %149 = math.exp %148 : vector<4x32xf32>
    %cst_37 = arith.constant 1.000000e+00 : f32
    %150 = vector.broadcast %cst_37 : f32 to vector<4x32xf32>
    %151 = arith.addf %150, %149 : vector<4x32xf32>
    %152 = arith.divf %150, %151 : vector<4x32xf32>
    %153 = vector.extract_strided_slice %144 {offsets = [0, 32], sizes = [4, 32], strides = [1, 1]} : vector<4x96xf32> to vector<4x32xf32>
    %154 = vector.extract_strided_slice %142 {offsets = [0, 32], sizes = [4, 32], strides = [1, 1]} : vector<4x96xf32> to vector<4x32xf32>
    %155 = arith.addf %153, %154 : vector<4x32xf32>
    %156 = arith.negf %155 : vector<4x32xf32>
    %157 = math.exp %156 : vector<4x32xf32>
    %cst_38 = arith.constant 1.000000e+00 : f32
    %158 = vector.broadcast %cst_38 : f32 to vector<4x32xf32>
    %159 = arith.addf %158, %157 : vector<4x32xf32>
    %160 = arith.divf %158, %159 : vector<4x32xf32>
    %161 = vector.extract_strided_slice %144 {offsets = [0, 64], sizes = [4, 32], strides = [1, 1]} : vector<4x96xf32> to vector<4x32xf32>
    %162 = vector.extract_strided_slice %142 {offsets = [0, 64], sizes = [4, 32], strides = [1, 1]} : vector<4x96xf32> to vector<4x32xf32>
    %163 = arith.mulf %152, %162 : vector<4x32xf32>
    %164 = arith.addf %161, %163 : vector<4x32xf32>
    %165 = math.tanh %164 : vector<4x32xf32>
    %cst_39 = arith.constant 1.000000e+00 : f32
    %166 = vector.broadcast %cst_39 : f32 to vector<4x32xf32>
    %167 = arith.subf %166, %160 : vector<4x32xf32>
    %168 = arith.mulf %167, %165 : vector<4x32xf32>
    %169 = arith.mulf %160, %138 : vector<4x32xf32>
    %170 = arith.addf %168, %169 : vector<4x32xf32>
    %171 = vector.shape_cast %170 : vector<4x32xf32> to vector<4x1x32xf32>
    %c0_40 = arith.constant 0 : index
    %c4 = arith.constant 4 : index
    %c0_41 = arith.constant 0 : index
    %172 = vector.load %arg12[%c0_40, %c4, %c0_41] : memref<4x8x32xf32, #tpu.memory_space<vmem>>, vector<4x1x32xf32>
    tpu.vector_store %arg12[%c0_40, %c4, %c0_41], %171 {strides = array<i32>} : memref<4x8x32xf32, #tpu.memory_space<vmem>>, vector<4x1x32xf32>,
    %cst_42 = arith.constant dense<0.000000e+00> : vector<4x96xf32>
    %173 = tpu.matmul %170, %2, %cst_42 {dimension_numbers = #tpu.dot_dimension_numbers<[1], [0], [0], [1], [0, 0, 1, 1], [], []>} : vector<4x32xf32>, vector<32x96xf32>, vector<4x96xf32> -> vector<4x96xf32>
    %174 = arith.addf %173, %6 : vector<4x96xf32>
    %175 = vector.extract_strided_slice %11 {offsets = [0, 5, 0], sizes = [4, 1, 96], strides = [1, 1, 1]} : vector<4x8x96xf32> to vector<4x1x96xf32>
    %176 = vector.shape_cast %175 : vector<4x1x96xf32> to vector<4x96xf32>
    %177 = vector.extract_strided_slice %176 {offsets = [0, 0], sizes = [4, 32], strides = [1, 1]} : vector<4x96xf32> to vector<4x32xf32>
    %178 = vector.extract_strided_slice %174 {offsets = [0, 0], sizes = [4, 32], strides = [1, 1]} : vector<4x96xf32> to vector<4x32xf32>
    %179 = arith.addf %177, %178 : vector<4x32xf32>
    %180 = arith.negf %179 : vector<4x32xf32>
    %181 = math.exp %180 : vector<4x32xf32>
    %cst_43 = arith.constant 1.000000e+00 : f32
    %182 = vector.broadcast %cst_43 : f32 to vector<4x32xf32>
    %183 = arith.addf %182, %181 : vector<4x32xf32>
    %184 = arith.divf %182, %183 : vector<4x32xf32>
    %185 = vector.extract_strided_slice %176 {offsets = [0, 32], sizes = [4, 32], strides = [1, 1]} : vector<4x96xf32> to vector<4x32xf32>
    %186 = vector.extract_strided_slice %174 {offsets = [0, 32], sizes = [4, 32], strides = [1, 1]} : vector<4x96xf32> to vector<4x32xf32>
    %187 = arith.addf %185, %186 : vector<4x32xf32>
    %188 = arith.negf %187 : vector<4x32xf32>
    %189 = math.exp %188 : vector<4x32xf32>
    %cst_44 = arith.constant 1.000000e+00 : f32
    %190 = vector.broadcast %cst_44 : f32 to vector<4x32xf32>
    %191 = arith.addf %190, %189 : vector<4x32xf32>
    %192 = arith.divf %190, %191 : vector<4x32xf32>
    %193 = vector.extract_strided_slice %176 {offsets = [0, 64], sizes = [4, 32], strides = [1, 1]} : vector<4x96xf32> to vector<4x32xf32>
    %194 = vector.extract_strided_slice %174 {offsets = [0, 64], sizes = [4, 32], strides = [1, 1]} : vector<4x96xf32> to vector<4x32xf32>
    %195 = arith.mulf %184, %194 : vector<4x32xf32>
    %196 = arith.addf %193, %195 : vector<4x32xf32>
    %197 = math.tanh %196 : vector<4x32xf32>
    %cst_45 = arith.constant 1.000000e+00 : f32
    %198 = vector.broadcast %cst_45 : f32 to vector<4x32xf32>
    %199 = arith.subf %198, %192 : vector<4x32xf32>
    %200 = arith.mulf %199, %197 : vector<4x32xf32>
    %201 = arith.mulf %192, %170 : vector<4x32xf32>
    %202 = arith.addf %200, %201 : vector<4x32xf32>
    %203 = vector.shape_cast %202 : vector<4x32xf32> to vector<4x1x32xf32>
    %c0_46 = arith.constant 0 : index
    %c5 = arith.constant 5 : index
    %c0_47 = arith.constant 0 : index
    %204 = vector.load %arg12[%c0_46, %c5, %c0_47] : memref<4x8x32xf32, #tpu.memory_space<vmem>>, vector<4x1x32xf32>
    tpu.vector_store %arg12[%c0_46, %c5, %c0_47], %203 {strides = array<i32>} : memref<4x8x32xf32, #tpu.memory_space<vmem>>, vector<4x1x32xf32>,
    %cst_48 = arith.constant dense<0.000000e+00> : vector<4x96xf32>
    %205 = tpu.matmul %202, %2, %cst_48 {dimension_numbers = #tpu.dot_dimension_numbers<[1], [0], [0], [1], [0, 0, 1, 1], [], []>} : vector<4x32xf32>, vector<32x96xf32>, vector<4x96xf32> -> vector<4x96xf32>
    %206 = arith.addf %205, %6 : vector<4x96xf32>
    %207 = vector.extract_strided_slice %11 {offsets = [0, 6, 0], sizes = [4, 1, 96], strides = [1, 1, 1]} : vector<4x8x96xf32> to vector<4x1x96xf32>
    %208 = vector.shape_cast %207 : vector<4x1x96xf32> to vector<4x96xf32>
    %209 = vector.extract_strided_slice %208 {offsets = [0, 0], sizes = [4, 32], strides = [1, 1]} : vector<4x96xf32> to vector<4x32xf32>
    %210 = vector.extract_strided_slice %206 {offsets = [0, 0], sizes = [4, 32], strides = [1, 1]} : vector<4x96xf32> to vector<4x32xf32>
    %211 = arith.addf %209, %210 : vector<4x32xf32>
    %212 = arith.negf %211 : vector<4x32xf32>
    %213 = math.exp %212 : vector<4x32xf32>
    %cst_49 = arith.constant 1.000000e+00 : f32
    %214 = vector.broadcast %cst_49 : f32 to vector<4x32xf32>
    %215 = arith.addf %214, %213 : vector<4x32xf32>
    %216 = arith.divf %214, %215 : vector<4x32xf32>
    %217 = vector.extract_strided_slice %208 {offsets = [0, 32], sizes = [4, 32], strides = [1, 1]} : vector<4x96xf32> to vector<4x32xf32>
    %218 = vector.extract_strided_slice %206 {offsets = [0, 32], sizes = [4, 32], strides = [1, 1]} : vector<4x96xf32> to vector<4x32xf32>
    %219 = arith.addf %217, %218 : vector<4x32xf32>
    %220 = arith.negf %219 : vector<4x32xf32>
    %221 = math.exp %220 : vector<4x32xf32>
    %cst_50 = arith.constant 1.000000e+00 : f32
    %222 = vector.broadcast %cst_50 : f32 to vector<4x32xf32>
    %223 = arith.addf %222, %221 : vector<4x32xf32>
    %224 = arith.divf %222, %223 : vector<4x32xf32>
    %225 = vector.extract_strided_slice %208 {offsets = [0, 64], sizes = [4, 32], strides = [1, 1]} : vector<4x96xf32> to vector<4x32xf32>
    %226 = vector.extract_strided_slice %206 {offsets = [0, 64], sizes = [4, 32], strides = [1, 1]} : vector<4x96xf32> to vector<4x32xf32>
    %227 = arith.mulf %216, %226 : vector<4x32xf32>
    %228 = arith.addf %225, %227 : vector<4x32xf32>
    %229 = math.tanh %228 : vector<4x32xf32>
    %cst_51 = arith.constant 1.000000e+00 : f32
    %230 = vector.broadcast %cst_51 : f32 to vector<4x32xf32>
    %231 = arith.subf %230, %224 : vector<4x32xf32>
    %232 = arith.mulf %231, %229 : vector<4x32xf32>
    %233 = arith.mulf %224, %202 : vector<4x32xf32>
    %234 = arith.addf %232, %233 : vector<4x32xf32>
    %235 = vector.shape_cast %234 : vector<4x32xf32> to vector<4x1x32xf32>
    %c0_52 = arith.constant 0 : index
    %c6 = arith.constant 6 : index
    %c0_53 = arith.constant 0 : index
    %236 = vector.load %arg12[%c0_52, %c6, %c0_53] : memref<4x8x32xf32, #tpu.memory_space<vmem>>, vector<4x1x32xf32>
    tpu.vector_store %arg12[%c0_52, %c6, %c0_53], %235 {strides = array<i32>} : memref<4x8x32xf32, #tpu.memory_space<vmem>>, vector<4x1x32xf32>,
    %cst_54 = arith.constant dense<0.000000e+00> : vector<4x96xf32>
    %237 = tpu.matmul %234, %2, %cst_54 {dimension_numbers = #tpu.dot_dimension_numbers<[1], [0], [0], [1], [0, 0, 1, 1], [], []>} : vector<4x32xf32>, vector<32x96xf32>, vector<4x96xf32> -> vector<4x96xf32>
    %238 = arith.addf %237, %6 : vector<4x96xf32>
    %239 = vector.extract_strided_slice %11 {offsets = [0, 7, 0], sizes = [4, 1, 96], strides = [1, 1, 1]} : vector<4x8x96xf32> to vector<4x1x96xf32>
    %240 = vector.shape_cast %239 : vector<4x1x96xf32> to vector<4x96xf32>
    %241 = vector.extract_strided_slice %240 {offsets = [0, 0], sizes = [4, 32], strides = [1, 1]} : vector<4x96xf32> to vector<4x32xf32>
    %242 = vector.extract_strided_slice %238 {offsets = [0, 0], sizes = [4, 32], strides = [1, 1]} : vector<4x96xf32> to vector<4x32xf32>
    %243 = arith.addf %241, %242 : vector<4x32xf32>
    %244 = arith.negf %243 : vector<4x32xf32>
    %245 = math.exp %244 : vector<4x32xf32>
    %cst_55 = arith.constant 1.000000e+00 : f32
    %246 = vector.broadcast %cst_55 : f32 to vector<4x32xf32>
    %247 = arith.addf %246, %245 : vector<4x32xf32>
    %248 = arith.divf %246, %247 : vector<4x32xf32>
    %249 = vector.extract_strided_slice %240 {offsets = [0, 32], sizes = [4, 32], strides = [1, 1]} : vector<4x96xf32> to vector<4x32xf32>
    %250 = vector.extract_strided_slice %238 {offsets = [0, 32], sizes = [4, 32], strides = [1, 1]} : vector<4x96xf32> to vector<4x32xf32>
    %251 = arith.addf %249, %250 : vector<4x32xf32>
    %252 = arith.negf %251 : vector<4x32xf32>
    %253 = math.exp %252 : vector<4x32xf32>
    %cst_56 = arith.constant 1.000000e+00 : f32
    %254 = vector.broadcast %cst_56 : f32 to vector<4x32xf32>
    %255 = arith.addf %254, %253 : vector<4x32xf32>
    %256 = arith.divf %254, %255 : vector<4x32xf32>
    %257 = vector.extract_strided_slice %240 {offsets = [0, 64], sizes = [4, 32], strides = [1, 1]} : vector<4x96xf32> to vector<4x32xf32>
    %258 = vector.extract_strided_slice %238 {offsets = [0, 64], sizes = [4, 32], strides = [1, 1]} : vector<4x96xf32> to vector<4x32xf32>
    %259 = arith.mulf %248, %258 : vector<4x32xf32>
    %260 = arith.addf %257, %259 : vector<4x32xf32>
    %261 = math.tanh %260 : vector<4x32xf32>
    %cst_57 = arith.constant 1.000000e+00 : f32
    %262 = vector.broadcast %cst_57 : f32 to vector<4x32xf32>
    %263 = arith.subf %262, %256 : vector<4x32xf32>
    %264 = arith.mulf %263, %261 : vector<4x32xf32>
    %265 = arith.mulf %256, %234 : vector<4x32xf32>
    %266 = arith.addf %264, %265 : vector<4x32xf32>
    %267 = vector.shape_cast %266 : vector<4x32xf32> to vector<4x1x32xf32>
    %c0_58 = arith.constant 0 : index
    %c7 = arith.constant 7 : index
    %c0_59 = arith.constant 0 : index
    %268 = vector.load %arg12[%c0_58, %c7, %c0_59] : memref<4x8x32xf32, #tpu.memory_space<vmem>>, vector<4x1x32xf32>
    tpu.vector_store %arg12[%c0_58, %c7, %c0_59], %267 {strides = array<i32>} : memref<4x8x32xf32, #tpu.memory_space<vmem>>, vector<4x1x32xf32>,
    %c0_60 = arith.constant 0 : index
    %c0_61 = arith.constant 0 : index
    %c0_62 = arith.constant 0 : index
    %269 = vector.load %arg12[%c0_60, %c0_61, %c0_62] : memref<4x8x32xf32, #tpu.memory_space<vmem>>, vector<4x8x32xf32>
    %c0_63 = arith.constant 0 : index
    %c0_64 = arith.constant 0 : index
    %270 = vector.load %arg5[%c0_63, %c0_64] : memref<32x96xf32, #tpu.memory_space<vmem>>, vector<32x96xf32>
    %c0_65 = arith.constant 0 : index
    %c0_66 = arith.constant 0 : index
    %271 = vector.load %arg6[%c0_65, %c0_66] : memref<32x96xf32, #tpu.memory_space<vmem>>, vector<32x96xf32>
    %c0_67 = arith.constant 0 : index
    %c0_68 = arith.constant 0 : index
    %272 = vector.load %arg7[%c0_67, %c0_68] : memref<1x96xf32, #tpu.memory_space<vmem>>, vector<1x96xf32>
    %c0_69 = arith.constant 0 : index
    %c0_70 = arith.constant 0 : index
    %273 = vector.load %arg8[%c0_69, %c0_70] : memref<1x96xf32, #tpu.memory_space<vmem>>, vector<1x96xf32>
    %274 = vector.shape_cast %273 : vector<1x96xf32> to vector<1x96xf32>
    %275 = vector.broadcast %274 : vector<1x96xf32> to vector<4x96xf32>
    %276 = vector.shape_cast %269 : vector<4x8x32xf32> to vector<32x32xf32>
    %cst_71 = arith.constant dense<0.000000e+00> : vector<32x96xf32>
    %277 = tpu.matmul %276, %270, %cst_71 {dimension_numbers = #tpu.dot_dimension_numbers<[1], [0], [0], [1], [0, 0, 1, 1], [], []>} : vector<32x32xf32>, vector<32x96xf32>, vector<32x96xf32> -> vector<32x96xf32>
    %278 = vector.broadcast %272 : vector<1x96xf32> to vector<32x96xf32>
    %279 = arith.addf %277, %278 : vector<32x96xf32>
    %280 = vector.shape_cast %279 : vector<32x96xf32> to vector<4x8x96xf32>
    %cst_72 = arith.constant 0.000000e+00 : f32
    %281 = vector.broadcast %cst_72 : f32 to vector<4x32xf32>
    %cst_73 = arith.constant dense<0.000000e+00> : vector<4x96xf32>
    %282 = tpu.matmul %281, %271, %cst_73 {dimension_numbers = #tpu.dot_dimension_numbers<[1], [0], [0], [1], [0, 0, 1, 1], [], []>} : vector<4x32xf32>, vector<32x96xf32>, vector<4x96xf32> -> vector<4x96xf32>
    %283 = arith.addf %282, %275 : vector<4x96xf32>
    %284 = vector.extract_strided_slice %280 {offsets = [0, 0, 0], sizes = [4, 1, 96], strides = [1, 1, 1]} : vector<4x8x96xf32> to vector<4x1x96xf32>
    %285 = vector.shape_cast %284 : vector<4x1x96xf32> to vector<4x96xf32>
    %286 = vector.extract_strided_slice %285 {offsets = [0, 0], sizes = [4, 32], strides = [1, 1]} : vector<4x96xf32> to vector<4x32xf32>
    %287 = vector.extract_strided_slice %283 {offsets = [0, 0], sizes = [4, 32], strides = [1, 1]} : vector<4x96xf32> to vector<4x32xf32>
    %288 = arith.addf %286, %287 : vector<4x32xf32>
    %289 = arith.negf %288 : vector<4x32xf32>
    %290 = math.exp %289 : vector<4x32xf32>
    %cst_74 = arith.constant 1.000000e+00 : f32
    %291 = vector.broadcast %cst_74 : f32 to vector<4x32xf32>
    %292 = arith.addf %291, %290 : vector<4x32xf32>
    %293 = arith.divf %291, %292 : vector<4x32xf32>
    %294 = vector.extract_strided_slice %285 {offsets = [0, 32], sizes = [4, 32], strides = [1, 1]} : vector<4x96xf32> to vector<4x32xf32>
    %295 = vector.extract_strided_slice %283 {offsets = [0, 32], sizes = [4, 32], strides = [1, 1]} : vector<4x96xf32> to vector<4x32xf32>
    %296 = arith.addf %294, %295 : vector<4x32xf32>
    %297 = arith.negf %296 : vector<4x32xf32>
    %298 = math.exp %297 : vector<4x32xf32>
    %cst_75 = arith.constant 1.000000e+00 : f32
    %299 = vector.broadcast %cst_75 : f32 to vector<4x32xf32>
    %300 = arith.addf %299, %298 : vector<4x32xf32>
    %301 = arith.divf %299, %300 : vector<4x32xf32>
    %302 = vector.extract_strided_slice %285 {offsets = [0, 64], sizes = [4, 32], strides = [1, 1]} : vector<4x96xf32> to vector<4x32xf32>
    %303 = vector.extract_strided_slice %283 {offsets = [0, 64], sizes = [4, 32], strides = [1, 1]} : vector<4x96xf32> to vector<4x32xf32>
    %304 = arith.mulf %293, %303 : vector<4x32xf32>
    %305 = arith.addf %302, %304 : vector<4x32xf32>
    %306 = math.tanh %305 : vector<4x32xf32>
    %cst_76 = arith.constant 1.000000e+00 : f32
    %307 = vector.broadcast %cst_76 : f32 to vector<4x32xf32>
    %308 = arith.subf %307, %301 : vector<4x32xf32>
    %309 = arith.mulf %308, %306 : vector<4x32xf32>
    %310 = arith.mulf %301, %281 : vector<4x32xf32>
    %311 = arith.addf %309, %310 : vector<4x32xf32>
    %312 = vector.shape_cast %311 : vector<4x32xf32> to vector<4x1x32xf32>
    %c0_77 = arith.constant 0 : index
    %c0_78 = arith.constant 0 : index
    %c0_79 = arith.constant 0 : index
    %313 = vector.load %arg12[%c0_77, %c0_78, %c0_79] : memref<4x8x32xf32, #tpu.memory_space<vmem>>, vector<4x1x32xf32>
    tpu.vector_store %arg12[%c0_77, %c0_78, %c0_79], %312 {strides = array<i32>} : memref<4x8x32xf32, #tpu.memory_space<vmem>>, vector<4x1x32xf32>,
    %cst_80 = arith.constant dense<0.000000e+00> : vector<4x96xf32>
    %314 = tpu.matmul %311, %271, %cst_80 {dimension_numbers = #tpu.dot_dimension_numbers<[1], [0], [0], [1], [0, 0, 1, 1], [], []>} : vector<4x32xf32>, vector<32x96xf32>, vector<4x96xf32> -> vector<4x96xf32>
    %315 = arith.addf %314, %275 : vector<4x96xf32>
    %316 = vector.extract_strided_slice %280 {offsets = [0, 1, 0], sizes = [4, 1, 96], strides = [1, 1, 1]} : vector<4x8x96xf32> to vector<4x1x96xf32>
    %317 = vector.shape_cast %316 : vector<4x1x96xf32> to vector<4x96xf32>
    %318 = vector.extract_strided_slice %317 {offsets = [0, 0], sizes = [4, 32], strides = [1, 1]} : vector<4x96xf32> to vector<4x32xf32>
    %319 = vector.extract_strided_slice %315 {offsets = [0, 0], sizes = [4, 32], strides = [1, 1]} : vector<4x96xf32> to vector<4x32xf32>
    %320 = arith.addf %318, %319 : vector<4x32xf32>
    %321 = arith.negf %320 : vector<4x32xf32>
    %322 = math.exp %321 : vector<4x32xf32>
    %cst_81 = arith.constant 1.000000e+00 : f32
    %323 = vector.broadcast %cst_81 : f32 to vector<4x32xf32>
    %324 = arith.addf %323, %322 : vector<4x32xf32>
    %325 = arith.divf %323, %324 : vector<4x32xf32>
    %326 = vector.extract_strided_slice %317 {offsets = [0, 32], sizes = [4, 32], strides = [1, 1]} : vector<4x96xf32> to vector<4x32xf32>
    %327 = vector.extract_strided_slice %315 {offsets = [0, 32], sizes = [4, 32], strides = [1, 1]} : vector<4x96xf32> to vector<4x32xf32>
    %328 = arith.addf %326, %327 : vector<4x32xf32>
    %329 = arith.negf %328 : vector<4x32xf32>
    %330 = math.exp %329 : vector<4x32xf32>
    %cst_82 = arith.constant 1.000000e+00 : f32
    %331 = vector.broadcast %cst_82 : f32 to vector<4x32xf32>
    %332 = arith.addf %331, %330 : vector<4x32xf32>
    %333 = arith.divf %331, %332 : vector<4x32xf32>
    %334 = vector.extract_strided_slice %317 {offsets = [0, 64], sizes = [4, 32], strides = [1, 1]} : vector<4x96xf32> to vector<4x32xf32>
    %335 = vector.extract_strided_slice %315 {offsets = [0, 64], sizes = [4, 32], strides = [1, 1]} : vector<4x96xf32> to vector<4x32xf32>
    %336 = arith.mulf %325, %335 : vector<4x32xf32>
    %337 = arith.addf %334, %336 : vector<4x32xf32>
    %338 = math.tanh %337 : vector<4x32xf32>
    %cst_83 = arith.constant 1.000000e+00 : f32
    %339 = vector.broadcast %cst_83 : f32 to vector<4x32xf32>
    %340 = arith.subf %339, %333 : vector<4x32xf32>
    %341 = arith.mulf %340, %338 : vector<4x32xf32>
    %342 = arith.mulf %333, %311 : vector<4x32xf32>
    %343 = arith.addf %341, %342 : vector<4x32xf32>
    %344 = vector.shape_cast %343 : vector<4x32xf32> to vector<4x1x32xf32>
    %c0_84 = arith.constant 0 : index
    %c1_85 = arith.constant 1 : index
    %c0_86 = arith.constant 0 : index
    %345 = vector.load %arg12[%c0_84, %c1_85, %c0_86] : memref<4x8x32xf32, #tpu.memory_space<vmem>>, vector<4x1x32xf32>
    tpu.vector_store %arg12[%c0_84, %c1_85, %c0_86], %344 {strides = array<i32>} : memref<4x8x32xf32, #tpu.memory_space<vmem>>, vector<4x1x32xf32>,
    %cst_87 = arith.constant dense<0.000000e+00> : vector<4x96xf32>
    %346 = tpu.matmul %343, %271, %cst_87 {dimension_numbers = #tpu.dot_dimension_numbers<[1], [0], [0], [1], [0, 0, 1, 1], [], []>} : vector<4x32xf32>, vector<32x96xf32>, vector<4x96xf32> -> vector<4x96xf32>
    %347 = arith.addf %346, %275 : vector<4x96xf32>
    %348 = vector.extract_strided_slice %280 {offsets = [0, 2, 0], sizes = [4, 1, 96], strides = [1, 1, 1]} : vector<4x8x96xf32> to vector<4x1x96xf32>
    %349 = vector.shape_cast %348 : vector<4x1x96xf32> to vector<4x96xf32>
    %350 = vector.extract_strided_slice %349 {offsets = [0, 0], sizes = [4, 32], strides = [1, 1]} : vector<4x96xf32> to vector<4x32xf32>
    %351 = vector.extract_strided_slice %347 {offsets = [0, 0], sizes = [4, 32], strides = [1, 1]} : vector<4x96xf32> to vector<4x32xf32>
    %352 = arith.addf %350, %351 : vector<4x32xf32>
    %353 = arith.negf %352 : vector<4x32xf32>
    %354 = math.exp %353 : vector<4x32xf32>
    %cst_88 = arith.constant 1.000000e+00 : f32
    %355 = vector.broadcast %cst_88 : f32 to vector<4x32xf32>
    %356 = arith.addf %355, %354 : vector<4x32xf32>
    %357 = arith.divf %355, %356 : vector<4x32xf32>
    %358 = vector.extract_strided_slice %349 {offsets = [0, 32], sizes = [4, 32], strides = [1, 1]} : vector<4x96xf32> to vector<4x32xf32>
    %359 = vector.extract_strided_slice %347 {offsets = [0, 32], sizes = [4, 32], strides = [1, 1]} : vector<4x96xf32> to vector<4x32xf32>
    %360 = arith.addf %358, %359 : vector<4x32xf32>
    %361 = arith.negf %360 : vector<4x32xf32>
    %362 = math.exp %361 : vector<4x32xf32>
    %cst_89 = arith.constant 1.000000e+00 : f32
    %363 = vector.broadcast %cst_89 : f32 to vector<4x32xf32>
    %364 = arith.addf %363, %362 : vector<4x32xf32>
    %365 = arith.divf %363, %364 : vector<4x32xf32>
    %366 = vector.extract_strided_slice %349 {offsets = [0, 64], sizes = [4, 32], strides = [1, 1]} : vector<4x96xf32> to vector<4x32xf32>
    %367 = vector.extract_strided_slice %347 {offsets = [0, 64], sizes = [4, 32], strides = [1, 1]} : vector<4x96xf32> to vector<4x32xf32>
    %368 = arith.mulf %357, %367 : vector<4x32xf32>
    %369 = arith.addf %366, %368 : vector<4x32xf32>
    %370 = math.tanh %369 : vector<4x32xf32>
    %cst_90 = arith.constant 1.000000e+00 : f32
    %371 = vector.broadcast %cst_90 : f32 to vector<4x32xf32>
    %372 = arith.subf %371, %365 : vector<4x32xf32>
    %373 = arith.mulf %372, %370 : vector<4x32xf32>
    %374 = arith.mulf %365, %343 : vector<4x32xf32>
    %375 = arith.addf %373, %374 : vector<4x32xf32>
    %376 = vector.shape_cast %375 : vector<4x32xf32> to vector<4x1x32xf32>
    %c0_91 = arith.constant 0 : index
    %c2_92 = arith.constant 2 : index
    %c0_93 = arith.constant 0 : index
    %377 = vector.load %arg12[%c0_91, %c2_92, %c0_93] : memref<4x8x32xf32, #tpu.memory_space<vmem>>, vector<4x1x32xf32>
    tpu.vector_store %arg12[%c0_91, %c2_92, %c0_93], %376 {strides = array<i32>} : memref<4x8x32xf32, #tpu.memory_space<vmem>>, vector<4x1x32xf32>,
    %cst_94 = arith.constant dense<0.000000e+00> : vector<4x96xf32>
    %378 = tpu.matmul %375, %271, %cst_94 {dimension_numbers = #tpu.dot_dimension_numbers<[1], [0], [0], [1], [0, 0, 1, 1], [], []>} : vector<4x32xf32>, vector<32x96xf32>, vector<4x96xf32> -> vector<4x96xf32>
    %379 = arith.addf %378, %275 : vector<4x96xf32>
    %380 = vector.extract_strided_slice %280 {offsets = [0, 3, 0], sizes = [4, 1, 96], strides = [1, 1, 1]} : vector<4x8x96xf32> to vector<4x1x96xf32>
    %381 = vector.shape_cast %380 : vector<4x1x96xf32> to vector<4x96xf32>
    %382 = vector.extract_strided_slice %381 {offsets = [0, 0], sizes = [4, 32], strides = [1, 1]} : vector<4x96xf32> to vector<4x32xf32>
    %383 = vector.extract_strided_slice %379 {offsets = [0, 0], sizes = [4, 32], strides = [1, 1]} : vector<4x96xf32> to vector<4x32xf32>
    %384 = arith.addf %382, %383 : vector<4x32xf32>
    %385 = arith.negf %384 : vector<4x32xf32>
    %386 = math.exp %385 : vector<4x32xf32>
    %cst_95 = arith.constant 1.000000e+00 : f32
    %387 = vector.broadcast %cst_95 : f32 to vector<4x32xf32>
    %388 = arith.addf %387, %386 : vector<4x32xf32>
    %389 = arith.divf %387, %388 : vector<4x32xf32>
    %390 = vector.extract_strided_slice %381 {offsets = [0, 32], sizes = [4, 32], strides = [1, 1]} : vector<4x96xf32> to vector<4x32xf32>
    %391 = vector.extract_strided_slice %379 {offsets = [0, 32], sizes = [4, 32], strides = [1, 1]} : vector<4x96xf32> to vector<4x32xf32>
    %392 = arith.addf %390, %391 : vector<4x32xf32>
    %393 = arith.negf %392 : vector<4x32xf32>
    %394 = math.exp %393 : vector<4x32xf32>
    %cst_96 = arith.constant 1.000000e+00 : f32
    %395 = vector.broadcast %cst_96 : f32 to vector<4x32xf32>
    %396 = arith.addf %395, %394 : vector<4x32xf32>
    %397 = arith.divf %395, %396 : vector<4x32xf32>
    %398 = vector.extract_strided_slice %381 {offsets = [0, 64], sizes = [4, 32], strides = [1, 1]} : vector<4x96xf32> to vector<4x32xf32>
    %399 = vector.extract_strided_slice %379 {offsets = [0, 64], sizes = [4, 32], strides = [1, 1]} : vector<4x96xf32> to vector<4x32xf32>
    %400 = arith.mulf %389, %399 : vector<4x32xf32>
    %401 = arith.addf %398, %400 : vector<4x32xf32>
    %402 = math.tanh %401 : vector<4x32xf32>
    %cst_97 = arith.constant 1.000000e+00 : f32
    %403 = vector.broadcast %cst_97 : f32 to vector<4x32xf32>
    %404 = arith.subf %403, %397 : vector<4x32xf32>
    %405 = arith.mulf %404, %402 : vector<4x32xf32>
    %406 = arith.mulf %397, %375 : vector<4x32xf32>
    %407 = arith.addf %405, %406 : vector<4x32xf32>
    %408 = vector.shape_cast %407 : vector<4x32xf32> to vector<4x1x32xf32>
    %c0_98 = arith.constant 0 : index
    %c3_99 = arith.constant 3 : index
    %c0_100 = arith.constant 0 : index
    %409 = vector.load %arg12[%c0_98, %c3_99, %c0_100] : memref<4x8x32xf32, #tpu.memory_space<vmem>>, vector<4x1x32xf32>
    tpu.vector_store %arg12[%c0_98, %c3_99, %c0_100], %408 {strides = array<i32>} : memref<4x8x32xf32, #tpu.memory_space<vmem>>, vector<4x1x32xf32>,
    %cst_101 = arith.constant dense<0.000000e+00> : vector<4x96xf32>
    %410 = tpu.matmul %407, %271, %cst_101 {dimension_numbers = #tpu.dot_dimension_numbers<[1], [0], [0], [1], [0, 0, 1, 1], [], []>} : vector<4x32xf32>, vector<32x96xf32>, vector<4x96xf32> -> vector<4x96xf32>
    %411 = arith.addf %410, %275 : vector<4x96xf32>
    %412 = vector.extract_strided_slice %280 {offsets = [0, 4, 0], sizes = [4, 1, 96], strides = [1, 1, 1]} : vector<4x8x96xf32> to vector<4x1x96xf32>
    %413 = vector.shape_cast %412 : vector<4x1x96xf32> to vector<4x96xf32>
    %414 = vector.extract_strided_slice %413 {offsets = [0, 0], sizes = [4, 32], strides = [1, 1]} : vector<4x96xf32> to vector<4x32xf32>
    %415 = vector.extract_strided_slice %411 {offsets = [0, 0], sizes = [4, 32], strides = [1, 1]} : vector<4x96xf32> to vector<4x32xf32>
    %416 = arith.addf %414, %415 : vector<4x32xf32>
    %417 = arith.negf %416 : vector<4x32xf32>
    %418 = math.exp %417 : vector<4x32xf32>
    %cst_102 = arith.constant 1.000000e+00 : f32
    %419 = vector.broadcast %cst_102 : f32 to vector<4x32xf32>
    %420 = arith.addf %419, %418 : vector<4x32xf32>
    %421 = arith.divf %419, %420 : vector<4x32xf32>
    %422 = vector.extract_strided_slice %413 {offsets = [0, 32], sizes = [4, 32], strides = [1, 1]} : vector<4x96xf32> to vector<4x32xf32>
    %423 = vector.extract_strided_slice %411 {offsets = [0, 32], sizes = [4, 32], strides = [1, 1]} : vector<4x96xf32> to vector<4x32xf32>
    %424 = arith.addf %422, %423 : vector<4x32xf32>
    %425 = arith.negf %424 : vector<4x32xf32>
    %426 = math.exp %425 : vector<4x32xf32>
    %cst_103 = arith.constant 1.000000e+00 : f32
    %427 = vector.broadcast %cst_103 : f32 to vector<4x32xf32>
    %428 = arith.addf %427, %426 : vector<4x32xf32>
    %429 = arith.divf %427, %428 : vector<4x32xf32>
    %430 = vector.extract_strided_slice %413 {offsets = [0, 64], sizes = [4, 32], strides = [1, 1]} : vector<4x96xf32> to vector<4x32xf32>
    %431 = vector.extract_strided_slice %411 {offsets = [0, 64], sizes = [4, 32], strides = [1, 1]} : vector<4x96xf32> to vector<4x32xf32>
    %432 = arith.mulf %421, %431 : vector<4x32xf32>
    %433 = arith.addf %430, %432 : vector<4x32xf32>
    %434 = math.tanh %433 : vector<4x32xf32>
    %cst_104 = arith.constant 1.000000e+00 : f32
    %435 = vector.broadcast %cst_104 : f32 to vector<4x32xf32>
    %436 = arith.subf %435, %429 : vector<4x32xf32>
    %437 = arith.mulf %436, %434 : vector<4x32xf32>
    %438 = arith.mulf %429, %407 : vector<4x32xf32>
    %439 = arith.addf %437, %438 : vector<4x32xf32>
    %440 = vector.shape_cast %439 : vector<4x32xf32> to vector<4x1x32xf32>
    %c0_105 = arith.constant 0 : index
    %c4_106 = arith.constant 4 : index
    %c0_107 = arith.constant 0 : index
    %441 = vector.load %arg12[%c0_105, %c4_106, %c0_107] : memref<4x8x32xf32, #tpu.memory_space<vmem>>, vector<4x1x32xf32>
    tpu.vector_store %arg12[%c0_105, %c4_106, %c0_107], %440 {strides = array<i32>} : memref<4x8x32xf32, #tpu.memory_space<vmem>>, vector<4x1x32xf32>,
    %cst_108 = arith.constant dense<0.000000e+00> : vector<4x96xf32>
    %442 = tpu.matmul %439, %271, %cst_108 {dimension_numbers = #tpu.dot_dimension_numbers<[1], [0], [0], [1], [0, 0, 1, 1], [], []>} : vector<4x32xf32>, vector<32x96xf32>, vector<4x96xf32> -> vector<4x96xf32>
    %443 = arith.addf %442, %275 : vector<4x96xf32>
    %444 = vector.extract_strided_slice %280 {offsets = [0, 5, 0], sizes = [4, 1, 96], strides = [1, 1, 1]} : vector<4x8x96xf32> to vector<4x1x96xf32>
    %445 = vector.shape_cast %444 : vector<4x1x96xf32> to vector<4x96xf32>
    %446 = vector.extract_strided_slice %445 {offsets = [0, 0], sizes = [4, 32], strides = [1, 1]} : vector<4x96xf32> to vector<4x32xf32>
    %447 = vector.extract_strided_slice %443 {offsets = [0, 0], sizes = [4, 32], strides = [1, 1]} : vector<4x96xf32> to vector<4x32xf32>
    %448 = arith.addf %446, %447 : vector<4x32xf32>
    %449 = arith.negf %448 : vector<4x32xf32>
    %450 = math.exp %449 : vector<4x32xf32>
    %cst_109 = arith.constant 1.000000e+00 : f32
    %451 = vector.broadcast %cst_109 : f32 to vector<4x32xf32>
    %452 = arith.addf %451, %450 : vector<4x32xf32>
    %453 = arith.divf %451, %452 : vector<4x32xf32>
    %454 = vector.extract_strided_slice %445 {offsets = [0, 32], sizes = [4, 32], strides = [1, 1]} : vector<4x96xf32> to vector<4x32xf32>
    %455 = vector.extract_strided_slice %443 {offsets = [0, 32], sizes = [4, 32], strides = [1, 1]} : vector<4x96xf32> to vector<4x32xf32>
    %456 = arith.addf %454, %455 : vector<4x32xf32>
    %457 = arith.negf %456 : vector<4x32xf32>
    %458 = math.exp %457 : vector<4x32xf32>
    %cst_110 = arith.constant 1.000000e+00 : f32
    %459 = vector.broadcast %cst_110 : f32 to vector<4x32xf32>
    %460 = arith.addf %459, %458 : vector<4x32xf32>
    %461 = arith.divf %459, %460 : vector<4x32xf32>
    %462 = vector.extract_strided_slice %445 {offsets = [0, 64], sizes = [4, 32], strides = [1, 1]} : vector<4x96xf32> to vector<4x32xf32>
    %463 = vector.extract_strided_slice %443 {offsets = [0, 64], sizes = [4, 32], strides = [1, 1]} : vector<4x96xf32> to vector<4x32xf32>
    %464 = arith.mulf %453, %463 : vector<4x32xf32>
    %465 = arith.addf %462, %464 : vector<4x32xf32>
    %466 = math.tanh %465 : vector<4x32xf32>
    %cst_111 = arith.constant 1.000000e+00 : f32
    %467 = vector.broadcast %cst_111 : f32 to vector<4x32xf32>
    %468 = arith.subf %467, %461 : vector<4x32xf32>
    %469 = arith.mulf %468, %466 : vector<4x32xf32>
    %470 = arith.mulf %461, %439 : vector<4x32xf32>
    %471 = arith.addf %469, %470 : vector<4x32xf32>
    %472 = vector.shape_cast %471 : vector<4x32xf32> to vector<4x1x32xf32>
    %c0_112 = arith.constant 0 : index
    %c5_113 = arith.constant 5 : index
    %c0_114 = arith.constant 0 : index
    %473 = vector.load %arg12[%c0_112, %c5_113, %c0_114] : memref<4x8x32xf32, #tpu.memory_space<vmem>>, vector<4x1x32xf32>
    tpu.vector_store %arg12[%c0_112, %c5_113, %c0_114], %472 {strides = array<i32>} : memref<4x8x32xf32, #tpu.memory_space<vmem>>, vector<4x1x32xf32>,
    %cst_115 = arith.constant dense<0.000000e+00> : vector<4x96xf32>
    %474 = tpu.matmul %471, %271, %cst_115 {dimension_numbers = #tpu.dot_dimension_numbers<[1], [0], [0], [1], [0, 0, 1, 1], [], []>} : vector<4x32xf32>, vector<32x96xf32>, vector<4x96xf32> -> vector<4x96xf32>
    %475 = arith.addf %474, %275 : vector<4x96xf32>
    %476 = vector.extract_strided_slice %280 {offsets = [0, 6, 0], sizes = [4, 1, 96], strides = [1, 1, 1]} : vector<4x8x96xf32> to vector<4x1x96xf32>
    %477 = vector.shape_cast %476 : vector<4x1x96xf32> to vector<4x96xf32>
    %478 = vector.extract_strided_slice %477 {offsets = [0, 0], sizes = [4, 32], strides = [1, 1]} : vector<4x96xf32> to vector<4x32xf32>
    %479 = vector.extract_strided_slice %475 {offsets = [0, 0], sizes = [4, 32], strides = [1, 1]} : vector<4x96xf32> to vector<4x32xf32>
    %480 = arith.addf %478, %479 : vector<4x32xf32>
    %481 = arith.negf %480 : vector<4x32xf32>
    %482 = math.exp %481 : vector<4x32xf32>
    %cst_116 = arith.constant 1.000000e+00 : f32
    %483 = vector.broadcast %cst_116 : f32 to vector<4x32xf32>
    %484 = arith.addf %483, %482 : vector<4x32xf32>
    %485 = arith.divf %483, %484 : vector<4x32xf32>
    %486 = vector.extract_strided_slice %477 {offsets = [0, 32], sizes = [4, 32], strides = [1, 1]} : vector<4x96xf32> to vector<4x32xf32>
    %487 = vector.extract_strided_slice %475 {offsets = [0, 32], sizes = [4, 32], strides = [1, 1]} : vector<4x96xf32> to vector<4x32xf32>
    %488 = arith.addf %486, %487 : vector<4x32xf32>
    %489 = arith.negf %488 : vector<4x32xf32>
    %490 = math.exp %489 : vector<4x32xf32>
    %cst_117 = arith.constant 1.000000e+00 : f32
    %491 = vector.broadcast %cst_117 : f32 to vector<4x32xf32>
    %492 = arith.addf %491, %490 : vector<4x32xf32>
    %493 = arith.divf %491, %492 : vector<4x32xf32>
    %494 = vector.extract_strided_slice %477 {offsets = [0, 64], sizes = [4, 32], strides = [1, 1]} : vector<4x96xf32> to vector<4x32xf32>
    %495 = vector.extract_strided_slice %475 {offsets = [0, 64], sizes = [4, 32], strides = [1, 1]} : vector<4x96xf32> to vector<4x32xf32>
    %496 = arith.mulf %485, %495 : vector<4x32xf32>
    %497 = arith.addf %494, %496 : vector<4x32xf32>
    %498 = math.tanh %497 : vector<4x32xf32>
    %cst_118 = arith.constant 1.000000e+00 : f32
    %499 = vector.broadcast %cst_118 : f32 to vector<4x32xf32>
    %500 = arith.subf %499, %493 : vector<4x32xf32>
    %501 = arith.mulf %500, %498 : vector<4x32xf32>
    %502 = arith.mulf %493, %471 : vector<4x32xf32>
    %503 = arith.addf %501, %502 : vector<4x32xf32>
    %504 = vector.shape_cast %503 : vector<4x32xf32> to vector<4x1x32xf32>
    %c0_119 = arith.constant 0 : index
    %c6_120 = arith.constant 6 : index
    %c0_121 = arith.constant 0 : index
    %505 = vector.load %arg12[%c0_119, %c6_120, %c0_121] : memref<4x8x32xf32, #tpu.memory_space<vmem>>, vector<4x1x32xf32>
    tpu.vector_store %arg12[%c0_119, %c6_120, %c0_121], %504 {strides = array<i32>} : memref<4x8x32xf32, #tpu.memory_space<vmem>>, vector<4x1x32xf32>,
    %cst_122 = arith.constant dense<0.000000e+00> : vector<4x96xf32>
    %506 = tpu.matmul %503, %271, %cst_122 {dimension_numbers = #tpu.dot_dimension_numbers<[1], [0], [0], [1], [0, 0, 1, 1], [], []>} : vector<4x32xf32>, vector<32x96xf32>, vector<4x96xf32> -> vector<4x96xf32>
    %507 = arith.addf %506, %275 : vector<4x96xf32>
    %508 = vector.extract_strided_slice %280 {offsets = [0, 7, 0], sizes = [4, 1, 96], strides = [1, 1, 1]} : vector<4x8x96xf32> to vector<4x1x96xf32>
    %509 = vector.shape_cast %508 : vector<4x1x96xf32> to vector<4x96xf32>
    %510 = vector.extract_strided_slice %509 {offsets = [0, 0], sizes = [4, 32], strides = [1, 1]} : vector<4x96xf32> to vector<4x32xf32>
    %511 = vector.extract_strided_slice %507 {offsets = [0, 0], sizes = [4, 32], strides = [1, 1]} : vector<4x96xf32> to vector<4x32xf32>
    %512 = arith.addf %510, %511 : vector<4x32xf32>
    %513 = arith.negf %512 : vector<4x32xf32>
    %514 = math.exp %513 : vector<4x32xf32>
    %cst_123 = arith.constant 1.000000e+00 : f32
    %515 = vector.broadcast %cst_123 : f32 to vector<4x32xf32>
    %516 = arith.addf %515, %514 : vector<4x32xf32>
    %517 = arith.divf %515, %516 : vector<4x32xf32>
    %518 = vector.extract_strided_slice %509 {offsets = [0, 32], sizes = [4, 32], strides = [1, 1]} : vector<4x96xf32> to vector<4x32xf32>
    %519 = vector.extract_strided_slice %507 {offsets = [0, 32], sizes = [4, 32], strides = [1, 1]} : vector<4x96xf32> to vector<4x32xf32>
    %520 = arith.addf %518, %519 : vector<4x32xf32>
    %521 = arith.negf %520 : vector<4x32xf32>
    %522 = math.exp %521 : vector<4x32xf32>
    %cst_124 = arith.constant 1.000000e+00 : f32
    %523 = vector.broadcast %cst_124 : f32 to vector<4x32xf32>
    %524 = arith.addf %523, %522 : vector<4x32xf32>
    %525 = arith.divf %523, %524 : vector<4x32xf32>
    %526 = vector.extract_strided_slice %509 {offsets = [0, 64], sizes = [4, 32], strides = [1, 1]} : vector<4x96xf32> to vector<4x32xf32>
    %527 = vector.extract_strided_slice %507 {offsets = [0, 64], sizes = [4, 32], strides = [1, 1]} : vector<4x96xf32> to vector<4x32xf32>
    %528 = arith.mulf %517, %527 : vector<4x32xf32>
    %529 = arith.addf %526, %528 : vector<4x32xf32>
    %530 = math.tanh %529 : vector<4x32xf32>
    %cst_125 = arith.constant 1.000000e+00 : f32
    %531 = vector.broadcast %cst_125 : f32 to vector<4x32xf32>
    %532 = arith.subf %531, %525 : vector<4x32xf32>
    %533 = arith.mulf %532, %530 : vector<4x32xf32>
    %534 = arith.mulf %525, %503 : vector<4x32xf32>
    %535 = arith.addf %533, %534 : vector<4x32xf32>
    %536 = vector.shape_cast %535 : vector<4x32xf32> to vector<4x1x32xf32>
    %c0_126 = arith.constant 0 : index
    %c7_127 = arith.constant 7 : index
    %c0_128 = arith.constant 0 : index
    %537 = vector.load %arg12[%c0_126, %c7_127, %c0_128] : memref<4x8x32xf32, #tpu.memory_space<vmem>>, vector<4x1x32xf32>
    tpu.vector_store %arg12[%c0_126, %c7_127, %c0_128], %536 {strides = array<i32>} : memref<4x8x32xf32, #tpu.memory_space<vmem>>, vector<4x1x32xf32>,
    %c0_129 = arith.constant 0 : index
    %c0_130 = arith.constant 0 : index
    %c0_131 = arith.constant 0 : index
    %538 = vector.load %arg12[%c0_129, %c0_130, %c0_131] : memref<4x8x32xf32, #tpu.memory_space<vmem>>, vector<4x8x32xf32>
    %539 = vector.shape_cast %538 : vector<4x8x32xf32> to vector<32x32xf32>
    %c0_132 = arith.constant 0 : index
    %c0_133 = arith.constant 0 : index
    %540 = vector.load %arg9[%c0_132, %c0_133] : memref<32x8xf32, #tpu.memory_space<vmem>>, vector<32x8xf32>
    %cst_134 = arith.constant dense<0.000000e+00> : vector<32x8xf32>
    %541 = tpu.matmul %539, %540, %cst_134 {dimension_numbers = #tpu.dot_dimension_numbers<[1], [0], [0], [1], [0, 0, 1, 1], [], []>} : vector<32x32xf32>, vector<32x8xf32>, vector<32x8xf32> -> vector<32x8xf32>
    %c0_135 = arith.constant 0 : index
    %c0_136 = arith.constant 0 : index
    %542 = vector.load %arg10[%c0_135, %c0_136] : memref<1x8xf32, #tpu.memory_space<vmem>>, vector<1x8xf32>
    %543 = vector.broadcast %542 : vector<1x8xf32> to vector<32x8xf32>
    %544 = arith.addf %541, %543 : vector<32x8xf32>
    %545 = arith.negf %544 : vector<32x8xf32>
    %546 = math.exp %545 : vector<32x8xf32>
    %cst_137 = arith.constant 1.000000e+00 : f32
    %547 = vector.broadcast %cst_137 : f32 to vector<32x8xf32>
    %548 = arith.addf %547, %546 : vector<32x8xf32>
    %549 = arith.divf %547, %548 : vector<32x8xf32>
    %550 = vector.shape_cast %549 : vector<32x8xf32> to vector<4x8x8xf32>
    %c0_138 = arith.constant 0 : index
    %c0_139 = arith.constant 0 : index
    %c0_140 = arith.constant 0 : index
    %551 = vector.load %arg11[%c0_138, %c0_139, %c0_140] : memref<4x8x8xf32, #tpu.memory_space<vmem>>, vector<4x8x8xf32>
    tpu.vector_store %arg11[%c0_138, %c0_139, %c0_140], %550 {strides = array<i32>} : memref<4x8x8xf32, #tpu.memory_space<vmem>>, vector<4x8x8xf32>,
    return
  }
}

</mosaic_0001>

<bundles_post_ra>
// kernel: net_forward_pallas.1
= control target key start
LH: loop header
LB: loop body
LE: loop exit
PB: predicated region body
PF: predicated region fallthrough
CT: control target
= control target key end

     0   :  { %16 = vsyncpa [#allocation4], 0  ;;  %s5734_s0 = inlined_call_operand.vmem [shape: f32[4,8,16], index: 0, kind: input, shape index: {}]   ;;  %s5735_s1 = inlined_call_operand.hbm [shape: f32[16,96], index: 1, kind: input, shape index: {}]   ;;  %s5736_s2 = inlined_call_operand.hbm [shape: f32[32,96], index: 2, kind: input, shape index: {}]   ;;  %s5737_s3 = inlined_call_operand.vmem [shape: f32[1,96], index: 3, kind: input, shape index: {}]   ;;  %s5738_s4 = inlined_call_operand.vmem [shape: f32[1,96], index: 4, kind: input, shape index: {}]   ;;  %s5739_s5 = inlined_call_operand.hbm [shape: f32[32,96], index: 5, kind: input, shape index: {}]   ;;  %s5740_s6 = inlined_call_operand.hbm [shape: f32[32,96], index: 6, kind: input, shape index: {}]   ;;  %s5741_s7 = inlined_call_operand.vmem [shape: f32[1,96], index: 7, kind: input, shape index: {}]   ;;  %s5742_s8 = inlined_call_operand.vmem [shape: f32[1,96], index: 8, kind: input, shape index: {}]   ;;  %s5743_s9 = inlined_call_operand.vmem [shape: f32[32,8], index: 9, kind: input, shape index: {}]   ;;  %s5744_s10 = inlined_call_operand.vmem [shape: f32[1,8], index: 10, kind: input, shape index: {}]   ;;  %s5745_s11 = inlined_call_operand.hbm [shape: f32[4,8,8], index: 11, kind: output, shape index: {}]  }
   0x1   :  { %17 = vsyncpa [#allocation7], 0 }
   0x2   :  { %18 = vsyncpa [#allocation10], 0 }
   0x3   :  { %19 = vsyncpa [#allocation5], 0  ;;  %s39_s19 = sshll.u32 %s5736_s2, 4  ;;  %s4498_s20 = smov [#allocation6]   ;;  %s40_s19 = int_to_ptr.hbm [resolvable:$true] %s39_s19 }
   0x4   :  { %s41_s21 = sshll.u32 %s4498_s20, 4  ;;  %s26_s24 = sshll.u32 %s5735_s1, 4  ;;  %s42_s21 = int_to_ptr.vmem [resolvable:$true] %s41_s21  ;;  %s27_s24 = int_to_ptr.hbm [resolvable:$true] %s26_s24 }
   0x5   :  { %s4499_s25 = smov 128   ;;  %s4500_s26 = smov 8  }
   0x6   :  { %47 = dma.hbm_to_vmem [thread:$0]  %s40_s19, 512, %s42_s21, [#allocation7], %s4499_s25, %s4499_s25, %s4500_s26  }
   0x7   :  { %s4501_s27 = smov [#allocation3]   ;;  %s56_s2 = sshll.u32 %s5739_s5, 4  ;;  %s57_s2 = int_to_ptr.hbm [resolvable:$true] %s56_s2 }
   0x8   :  { %s28_s28 = sshll.u32 %s4501_s27, 4  ;;  %s69_s13 = sshll.u32 %s5740_s6, 4  ;;  %s29_s28 = int_to_ptr.vmem [resolvable:$true] %s28_s28  ;;  %s70_s13 = int_to_ptr.hbm [resolvable:$true] %s69_s13 }
   0x9   :  { %34 = dma.hbm_to_vmem [thread:$0]  %s27_s24, 256, %s29_s28, [#allocation4], %s4499_s25, %s4499_s25, %s4500_s26  }
   0xa   :  { %s4502_s14 = smov [#allocation8]   ;;  %s4503_s16 = smov [#allocation9]  }
   0xb   :  { %s58_s15 = sshll.u32 %s4502_s14, 4  ;;  %s71_s5 = sshll.u32 %s4503_s16, 4  ;;  %s59_s15 = int_to_ptr.vmem [resolvable:$true] %s58_s15  ;;  %s72_s5 = int_to_ptr.vmem [resolvable:$true] %s71_s5 }
   0xc   :  { %64 = dma.hbm_to_vmem [thread:$0]  %s57_s2, 512, %s59_s15, [#allocation7], %s4499_s25, %s4499_s25, %s4500_s26  }
   0xd   :  { %77 = dma.hbm_to_vmem [thread:$0]  %s70_s13, 512, %s72_s5, [#allocation10], %s4499_s25, %s4499_s25, %s4500_s26  }
   0xe   :  { %4490 = dma.done.wait [#allocation4], 256  }
   0xf   :  { %4491 = vsyncadd [#allocation4], 4294967040 }
  0x10   :  { %4492 = dma.done.wait [#allocation7], 1024  }
  0x11   :  { %4493 = vsyncadd [#allocation7], 4294966272 }
  0x12   :  { %4494 = dma.done.wait [#allocation10], 512  }
  0x13   :  { %4495 = vsyncadd [#allocation10], 4294966784  ;;  %v107_v0 = vld [vmem:[#allocation3 + $0x8] sm:$0xff]  ;;  %v106_v1 = vld [vmem:[#allocation3] sm:$0xff]  ;;  %vm120_vm0 = vcmask 130048   ;;  %v4504_v10 = vmov 0.0  }
  0x14   :  { %3947 = vmatpush.msra.mxu1 %v107_v0  ;;  %v103_v2 = vld [vmem:[%s5734_s0 + $0x8] sm:$0xff]  ;;  %3948 = vmatpush.msra.mxu2 %v107_v0  ;;  %v4597_v4 = vld [vmem:[#allocation6 + $0x10] sm:$0xff]  ;;  %v104_v5 = vld [vmem:[%s5734_s0 + $0x10] sm:$0xff]  ;;  %s4505_s27 = smov 64  }
  0x15   :  { %v4595_v3 = vld [vmem:[#allocation6 + $0x18] sm:$0xff]  ;;  %3949 = vmatpush.msra.mxu3 %v107_v0  ;;  %147 = vmatpush.msra.mxu0 %v107_v0  ;;  %v105_v6 = vld [vmem:[%s5734_s0 + $0x18] sm:$0xff]  ;;  %v102_v7 = vld [vmem:[%s5734_s0] sm:$0xff]  ;;  %s3838_s0 = sshll.u32 %s5745_s11, 4  ;;  %s3839_s0 = int_to_ptr.hbm [resolvable:$true] %s3838_s0 }
  0x16   :  { %3950 = vmatpush.msra.mxu1 %v106_v1  ;;  %3951 = vmatpush.msra.mxu2 %v106_v1  ;;  %v4612_v8 = vld [vmem:[#allocation6 + $0x8] sm:$0xff]  ;;  %v4616_v9 = vld [vmem:[#allocation6] sm:$0xff]  ;;  %v4648_v12 = vld [vmem:[%s5738_s4] ss:$0 sm:$0xff] }
  0x17   :  { %3854 = vmatmul.msk.f32.vlgmr.msra.gmra.mxu1 %vm120_vm0, %v103_v2  ;;  %3952 = vmatpush.msra.mxu3 %v106_v1  ;;  %v3963_v19 = vld [vmem:[%s5737_s3] ss:$0 sm:$0xff]  ;;  %s4506_s3 = smov 96  }
  0x18   :  { %178 = vmatpush.msrb.mxu1 %v4595_v3  ;;  %3855 = vmatmul.msk.f32.vlgmr.msra.gmra.mxu2 %vm120_vm0, %v104_v5 }
  0x19   :  { %3856 = vmatmul.msk.f32.vlgmr.msra.gmra.mxu3 %vm120_vm0, %v105_v6  ;;  %148 = vmatpush.msra.mxu0 %v106_v1 }
  0x1a   :  { %179 = vmatpush.msrb.mxu1 %v4597_v4  ;;  %3853 = vmatmul.msk.f32.vlgmr.msra.gmra.mxu0 %vm120_vm0, %v102_v7 }
  0x1b   :  { %392 = vmatpush.msrb.mxu2 %v4595_v3  ;;  %610 = vmatpush.msrb.mxu3 %v4595_v3 }
  0x1c   :  { %180 = vmatpush.msrb.mxu1 %v4612_v8 }
  0x1d   :  { %393 = vmatpush.msrb.mxu2 %v4597_v4  ;;  %611 = vmatpush.msrb.mxu3 %v4597_v4 }
  0x1e   :  { %181 = vmatpush.msrb.mxu1 %v4616_v9 }
  0x1f   :  { %182 = vmatmul.f32.vlgmr.msrb.gmra.mxu1 %v4504_v10  ;;  %394 = vmatpush.msrb.mxu2 %v4612_v8 }
  0x20   :  { %612 = vmatpush.msrb.mxu3 %v4612_v8  ;;  %828 = vmatpush.msra.mxu1 %v4595_v3 }
  0x21   :  { %395 = vmatpush.msrb.mxu2 %v4616_v9 }
  0x22   :  { %613 = vmatpush.msrb.mxu3 %v4616_v9  ;;  %829 = vmatpush.msra.mxu1 %v4597_v4 }
  0x23   :  { %1046 = vmatpush.msra.mxu2 %v4595_v3 }
  0x24   :  { %1267 = vmatpush.msra.mxu3 %v4595_v3  ;;  %830 = vmatpush.msra.mxu1 %v4612_v8 }
  0x25   :  { %1047 = vmatpush.msra.mxu2 %v4597_v4 }
  0x26   :  { %1268 = vmatpush.msra.mxu3 %v4597_v4  ;;  %831 = vmatpush.msra.mxu1 %v4616_v9 }
  0x27   :  { %1048 = vmatpush.msra.mxu2 %v4612_v8 }
  0x28   :  { %1269 = vmatpush.msra.mxu3 %v4612_v8  ;;  %1488 = vmatpush.msrb.mxu1 %v4595_v3 }
  0x29   :  { %1049 = vmatpush.msra.mxu2 %v4616_v9 }
  0x2a   :  { %1270 = vmatpush.msra.mxu3 %v4616_v9  ;;  %1489 = vmatpush.msrb.mxu1 %v4597_v4 }
  0x2c   :  { %1490 = vmatpush.msrb.mxu1 %v4612_v8 }
  0x2e   :  { %1491 = vmatpush.msrb.mxu1 %v4616_v9 }
  0x94   :  { %v153_v11 = vpop.f32.mrf.mxu1 }
  0x95   :  { %v4660_v21 = vadd.f32 %v3963_v19, %v153_v11 }
  0x97   :  { %v150_v18 = vpop.f32.mrf.mxu0 }
  0x98   :  { %v4658_v20 = vadd.f32 %v3963_v19, %v150_v18 }
  0x9b   :  { %v156_v25 = vpop.f32.mrf.mxu2 }
  0x9c   :  { %v183_v13 = vpop.f32.mrf.mxu1  ;;  %v159_v23 = vpop.f32.mrf.mxu3  ;;  %v4666_v28 = vadd.f32 %v3963_v19, %v156_v25 }
  0x9d   :  { %v184_v14 = vadd.f32 %v4648_v12, %v183_v13  ;;  %v4664_v27 = vadd.f32 %v3963_v19, %v159_v23 }
  0x9f   :  { %274 = vrot.lane.b32.xlu1 %v184_v14, %s4505_s27  ;;  %v187_v15 = vrot.slane %v184_v14, 1  ;;  %v189_v16 = vrot.slane %v184_v14, 3  ;;  %v188_v17 = vrot.slane %v184_v14, 2  ;;  %v194_v22 = vadd.f32 %v184_v14, %v4658_v20 }
  0xa1   :  { %276 = vrot.lane.b32.xlu0 %v187_v15, %s4505_s27  ;;  %v195_v24 = vadd.f32 %v187_v15, %v4660_v21  ;;  %v3857_v26 = vmul.f32 -1.442695, %v194_v22  ;;  %v197_v30 = vadd.f32 %v189_v16, %v4664_v27  ;;  %v196_v31 = vadd.f32 %v188_v17, %v4666_v28 }
  0xa3   :  { %v3858_v29 = vmul.f32 -1.442695, %v195_v24  ;;  %3968 = vpow2.f32 %v3857_v26  ;;  %v3860_v32 = vmul.f32 -1.442695, %v197_v30  ;;  %v3859_v34 = vmul.f32 -1.442695, %v196_v31 }
  0xa5   :  { %3970 = vpow2.f32 %v3858_v29 }
  0xa6   :  { %3972 = vpow2.f32 %v3860_v32 }
  0xa7   :  { %280 = vrot.lane.b32.xlu1 %v189_v16, %s4505_s27  ;;  %3974 = vpow2.f32 %v3859_v34 }
  0xa9   :  { %278 = vrot.lane.b32.xlu0 %v188_v17, %s4505_s27  ;;  %v3969_v33 = vpop.eup %3968 }
  0xaa   :  { %v210_v36 = vadd.f32 1.0, %v3969_v33 }
  0xab   :  { %v3971_v35 = vpop.eup %3970 }
  0xac   :  { %v211_v37 = vadd.f32 1.0, %v3971_v35  ;;  %3976 = vrcp.f32 %v210_v36  ;;  %v3973_v38 = vpop.eup %3972  ;;  %vm219_vm2 = vweird.f32 %v210_v36  ;;  %v225_v56 = vand.u32 2147483648, %v210_v36 }
  0xad   :  { %v3975_v39 = vpop.eup %3974  ;;  %v213_v40 = vadd.f32 1.0, %v3973_v38  ;;  %v223_v57 = vand.u32 2147483647, %v210_v36 }
  0xae   :  { %3978 = vrcp.f32 %v211_v37  ;;  %v4670_v42 = vadd.f32 1.0, %v3975_v39  ;;  %v240_v60 = vand.u32 2147483648, %v211_v37  ;;  %vm234_vm5 = vweird.f32 %v211_v37 }
  0xaf   :  { %3980 = vrcp.f32 %v213_v40  ;;  %v238_v62 = vand.u32 2147483647, %v211_v37  ;;  %v226_v0 = vor.u32 1.1754944e-38, %v225_v56  ;;  %vm224_vm7 = vcmp.eq.f32.partialorder %v223_v57, 8.507059e+37 }
  0xb0   :  { %3982 = vrcp.f32 %v4670_v42  ;;  %v241_v7 = vor.u32 1.1754944e-38, %v240_v60  ;;  %vm264_vm10 = vweird.f32 %v213_v40  ;;  %v270_v16 = vand.u32 2147483648, %v213_v40 }
  0xb1   :  { %vm239_vm8 = vcmp.eq.f32.partialorder %v238_v62, 8.507059e+37  ;;  %v268_v18 = vand.u32 2147483647, %v213_v40  ;;  %v255_v22 = vand.u32 2147483648, %v4670_v42  ;;  %vm249_vm13 = vweird.f32 %v4670_v42 }
  0xb2   :  { %v3977_v41 = vpop.eup %3976  ;;  %v253_v24 = vand.u32 2147483647, %v4670_v42  ;;  %v271_v25 = vor.u32 1.1754944e-38, %v270_v16 }
  0xb3   :  { %v215_v44 = vmul.f32 %v3977_v41, %v210_v36  ;;  %vm220_vm1 = vweird.f32 %v3977_v41  ;;  %vm269_vm15 = vcmp.eq.f32.partialorder %v268_v18, 8.507059e+37  ;;  %v256_v31 = vor.u32 1.1754944e-38, %v255_v22 }
  0xb4   :  { %v3979_v43 = vpop.eup %3978  ;;  %vm221_vm4 = vmor %vm219_vm2, %vm220_vm1  ;;  %vm254_vm0 = vcmp.eq.f32.partialorder %v253_v24, 8.507059e+37  ;;  %vm368_vm1 = vcmask 1041409   ;;  %vm371_vm2 = vcmask 1042434  }
  0xb5   :  { %v230_v45 = vmul.f32 %v3979_v43, %v211_v37  ;;  %v216_v46 = vsub.f32 1.0, %v215_v44  ;;  %v3981_v47 = vpop.eup %3980  ;;  %vm235_vm3 = vweird.f32 %v3979_v43 }
  0xb6   :  { %v3983_v49 = vpop.eup %3982  ;;  %v260_v51 = vmul.f32 %v3981_v47, %v213_v40  ;;  %vm236_vm6 = vmor %vm234_vm5, %vm235_vm3  ;;  %vm265_vm9 = vweird.f32 %v3981_v47  ;;  %vm374_vm3 = vcmask 1043459  }
  0xb7   :  { %v231_v48 = vsub.f32 1.0, %v230_v45  ;;  %v217_v50 = vmul.f32 %v3977_v41, %v216_v46  ;;  %v245_v53 = vmul.f32 %v3983_v49, %v4670_v42  ;;  %vm250_vm11 = vweird.f32 %v3983_v49  ;;  %vm266_vm12 = vmor %vm264_vm10, %vm265_vm9 }
  0xb8   :  { %v261_v55 = vsub.f32 1.0, %v260_v51  ;;  %vm251_vm14 = vmor %vm249_vm13, %vm250_vm11 }
  0xb9   :  { %v232_v52 = vmul.f32 %v3979_v43, %v231_v48  ;;  %v218_v54 = vadd.f32 %v3977_v41, %v217_v50  ;;  %v246_v59 = vsub.f32 1.0, %v245_v53 }
  0xba   :  { %v262_v63 = vmul.f32 %v3981_v47, %v261_v55 }
  0xbb   :  { %v233_v58 = vadd.f32 %v3979_v43, %v232_v52  ;;  %v222_v61 = vsel %vm221_vm4, %v3977_v41, %v218_v54  ;;  %v247_v2 = vmul.f32 %v3983_v49, %v246_v59  ;;  %vm162_vm4 = vcmask 261120  }
  0xbc   :  { %v4674_v6 = vsel %vm224_vm7, %v226_v0, %v222_v61  ;;  %v263_v13 = vadd.f32 %v3981_v47, %v262_v63 }
  0xbd   :  { %v237_v1 = vsel %vm236_vm6, %v3979_v43, %v233_v58  ;;  %v248_v19 = vadd.f32 %v3983_v49, %v247_v2  ;;  %v314_v61 = vsub.f32 1.0, %v4674_v6 }
  0xbe   :  { %v242_v15 = vsel %vm239_vm8, %v241_v7, %v237_v1  ;;  %v267_v23 = vsel %vm266_vm12, %v3981_v47, %v263_v13  ;;  %v338_v1 = vmul.f32 0.0, %v4674_v6 }
  0xbf   :  { %v252_v26 = vsel %vm251_vm14, %v3983_v49, %v248_v19  ;;  %v272_v30 = vsel %vm269_vm15, %v271_v25, %v267_v23  ;;  %v315_v49 = vsub.f32 1.0, %v242_v15  ;;  %v339_v56 = vmul.f32 0.0, %v242_v15 }
  0xc0   :  { %v257_v33 = vsel %vm254_vm0, %v256_v31, %v252_v26  ;;  %v317_v54 = vsub.f32 1.0, %v272_v30  ;;  %v341_v60 = vmul.f32 0.0, %v272_v30 }
  0xc1   :  { %v316_v52 = vsub.f32 1.0, %v257_v33  ;;  %v340_v58 = vmul.f32 0.0, %v257_v33 }
 0x111   :  { %v275_v5 = vpop.permute.xlu1 %274 }
 0x112   :  { %v286_v11 = vmul.f32 %v275_v5, %v4674_v6 }
 0x113   :  { %v277_v14 = vpop.permute.xlu0 %276 }
 0x114   :  { %294 = vrot.lane.b32.xlu0 %v286_v11, %s4505_s27  ;;  %v287_v17 = vmul.f32 %v277_v14, %v242_v15 }
 0x116   :  { %296 = vrot.lane.b32.xlu2 %v287_v17, %s4505_s27 }
 0x119   :  { %v281_v29 = vpop.permute.xlu1 %280 }
 0x11a   :  { %v289_v32 = vmul.f32 %v281_v29, %v272_v30 }
 0x11b   :  { %v279_v34 = vpop.permute.xlu0 %278 }
 0x11c   :  { %v288_v35 = vmul.f32 %v279_v34, %v257_v33  ;;  %300 = vrot.lane.b32.xlu1 %v289_v32, %s4505_s27 }
 0x11e   :  { %298 = vrot.lane.b32.xlu2 %v288_v35, %s4505_s27 }
 0x170   :  { %v297_v36 = vpop.permute.xlu2 %296 }
 0x171   :  { %v307_v37 = vadd.f32 %v297_v36, %v4660_v21 }
 0x173   :  { %3984 = vtanh.f32 %v307_v37 }
 0x178   :  { %v299_v38 = vpop.permute.xlu2 %298 }
 0x179   :  { %v3985_v39 = vpop.eup %3984  ;;  %v308_v40 = vadd.f32 %v299_v38, %v4666_v28 }
 0x17a   :  { %324 = vrot.lane.b32.xlu2 %v3985_v39, %s4506_s3 }
 0x17b   :  { %3986 = vtanh.f32 %v308_v40 }
 0x181   :  { %v3987_v41 = vpop.eup %3986 }
 0x182   :  { %326 = vrot.lane.b32.xlu0 %v3987_v41, %s4506_s3 }
 0x186   :  { %v295_v42 = vpop.permute.xlu0 %294 }
 0x187   :  { %v306_v43 = vadd.f32 %v295_v42, %v4658_v20 }
 0x189   :  { %3988 = vtanh.f32 %v306_v43 }
 0x18e   :  { %v301_v44 = vpop.permute.xlu1 %300 }
 0x18f   :  { %v3989_v45 = vpop.eup %3988  ;;  %v309_v46 = vadd.f32 %v301_v44, %v4664_v27 }
 0x190   :  { %322 = vrot.lane.b32.xlu1 %v3989_v45, %s4506_s3 }
 0x191   :  { %3990 = vtanh.f32 %v309_v46 }
 0x197   :  { %v3991_v47 = vpop.eup %3990 }
 0x198   :  { %328 = vrot.lane.b32.xlu2 %v3991_v47, %s4506_s3 }
 0x1d4   :  { %v325_v48 = vpop.permute.xlu2 %324 }
 0x1d5   :  { %v335_v53 = vmul.f32 %v325_v48, %v315_v49 }
 0x1d7   :  { %v4692_v59 = vadd.f32 %v339_v56, %v335_v53 }
 0x1d9   :  { %v367_v5 = vrot.slane %v4692_v59, 7 }
 0x1f2   :  { %v329_v51 = vpop.permute.xlu2 %328 }
 0x1f3   :  { %v337_v57 = vmul.f32 %v329_v51, %v317_v54 }
 0x1f4   :  { %v327_v50 = vpop.permute.xlu0 %326 }
 0x1f5   :  { %v336_v55 = vmul.f32 %v327_v50, %v316_v52  ;;  %v4697_v0 = vadd.f32 %v341_v60, %v337_v57 }
 0x1f7   :  { %v4695_v62 = vadd.f32 %v340_v58, %v336_v55  ;;  %v373_v14 = vrot.slane %v4697_v0, 5 }
 0x1f9   :  { %v370_v11 = vrot.slane %v4695_v62, 6 }
 0x202   :  { %v323_v63 = vpop.permute.xlu1 %322 }
 0x203   :  { %v334_v2 = vmul.f32 %v323_v63, %v314_v61 }
 0x205   :  { %v4701_v7 = vadd.f32 %v338_v1, %v334_v2 }
 0x207   :  { %v369_v13 = vsel %vm368_vm1, %v367_v5, %v4701_v7 }
 0x208   :  { %v372_v15 = vsel %vm371_vm2, %v370_v11, %v369_v13 }
 0x209   :  { %v375_v6 = vsel %vm374_vm3, %v373_v14, %v372_v15 }
 0x20a   :  { %376 = vrot.lane.b32.xlu0 %v375_v6, %s4506_s3 }
 0x27c   :  { %v377_v16 = vpop.permute.xlu0 %376 }
 0x27d   :  { %3861 = vmatmul.msk.f32.vlgmr.msrb.gmra.mxu2 %vm162_vm4, %v377_v16 }
 0x27e   :  { %1709 = vmatpush.msrb.mxu2 %v4595_v3 }
 0x280   :  { %1710 = vmatpush.msrb.mxu2 %v4597_v4 }
 0x282   :  { %1711 = vmatpush.msrb.mxu2 %v4612_v8 }
 0x284   :  { %1712 = vmatpush.msrb.mxu2 %v4616_v9 }
 0x300   :  { %v397_v17 = vpop.f32.mrf.mxu2 }
 0x301   :  { %v398_v18 = vadd.f32 %v4648_v12, %v397_v17 }
 0x303   :  { %490 = vrot.lane.b32.xlu0 %v398_v18, %s4505_s27  ;;  %v402_v19 = vrot.slane %v398_v18, 1  ;;  %v401_v22 = vrot.slane %v398_v18, 7  ;;  %v403_v23 = vrot.slane %v398_v18, 2  ;;  %v409_v24 = vadd.f32 %v398_v18, %v4660_v21 }
 0x305   :  { %492 = vrot.lane.b32.xlu2 %v402_v19, %s4505_s27  ;;  %488 = vrot.lane.b32.xlu1 %v401_v22, %s4505_s27  ;;  %v410_v3 = vadd.f32 %v402_v19, %v4666_v28  ;;  %v408_v25 = vadd.f32 %v401_v22, %v4658_v20  ;;  %v3863_v26 = vmul.f32 -1.442695, %v409_v24  ;;  %v411_v32 = vadd.f32 %v403_v23, %v4664_v27 }
 0x307   :  { %v3864_v4 = vmul.f32 -1.442695, %v410_v3  ;;  %v3862_v30 = vmul.f32 -1.442695, %v408_v25  ;;  %v3865_v35 = vmul.f32 -1.442695, %v411_v32 }
 0x309   :  { %3992 = vpow2.f32 %v3864_v4 }
 0x30d   :  { %494 = vrot.lane.b32.xlu1 %v403_v23, %s4505_s27 }
 0x30f   :  { %v3993_v8 = vpop.eup %3992 }
 0x310   :  { %v426_v9 = vadd.f32 1.0, %v3993_v8 }
 0x312   :  { %3994 = vrcp.f32 %v426_v9  ;;  %v469_v41 = vand.u32 2147483648, %v426_v9  ;;  %vm463_vm6 = vweird.f32 %v426_v9  ;;  %v467_v42 = vand.u32 2147483647, %v426_v9 }
 0x313   :  { %3996 = vpow2.f32 %v3863_v26 }
 0x314   :  { %3998 = vpow2.f32 %v3862_v30  ;;  %v470_v45 = vor.u32 1.1754944e-38, %v469_v41  ;;  %vm468_vm8 = vcmp.eq.f32.partialorder %v467_v42, 8.507059e+37 }
 0x315   :  { %4000 = vpow2.f32 %v3865_v35 }
 0x318   :  { %v3995_v29 = vpop.eup %3994 }
 0x319   :  { %v459_v31 = vmul.f32 %v3995_v29, %v426_v9  ;;  %v3997_v34 = vpop.eup %3996  ;;  %vm464_vm5 = vweird.f32 %v3995_v29 }
 0x31a   :  { %v3999_v36 = vpop.eup %3998  ;;  %v425_v38 = vadd.f32 1.0, %v3997_v34  ;;  %vm465_vm7 = vmor %vm463_vm6, %vm464_vm5 }
 0x31b   :  { %v460_v33 = vsub.f32 1.0, %v459_v31  ;;  %v424_v39 = vadd.f32 1.0, %v3999_v36  ;;  %v4001_v43 = vpop.eup %4000 }
 0x31c   :  { %4002 = vrcp.f32 %v425_v38  ;;  %v427_v47 = vadd.f32 1.0, %v4001_v43  ;;  %vm448_vm10 = vweird.f32 %v425_v38  ;;  %v454_v63 = vand.u32 2147483648, %v425_v38 }
 0x31d   :  { %v461_v37 = vmul.f32 %v3995_v29, %v460_v33  ;;  %4004 = vrcp.f32 %v424_v39  ;;  %v452_v1 = vand.u32 2147483647, %v425_v38  ;;  %v439_v13 = vand.u32 2147483648, %v424_v39 }
 0x31e   :  { %4006 = vrcp.f32 %v427_v47  ;;  %vm433_vm13 = vweird.f32 %v424_v39  ;;  %v437_v15 = vand.u32 2147483647, %v424_v39  ;;  %v455_v6 = vor.u32 1.1754944e-38, %v454_v63 }
 0x31f   :  { %v462_v40 = vadd.f32 %v3995_v29, %v461_v37  ;;  %vm453_vm15 = vcmp.eq.f32.partialorder %v452_v1, 8.507059e+37  ;;  %v440_v22 = vor.u32 1.1754944e-38, %v439_v13  ;;  %v484_v24 = vand.u32 2147483648, %v427_v47 }
 0x320   :  { %vm438_vm0 = vcmp.eq.f32.partialorder %v437_v15, 8.507059e+37  ;;  %vm478_vm6 = vweird.f32 %v427_v47  ;;  %v482_v25 = vand.u32 2147483647, %v427_v47 }
 0x321   :  { %v466_v44 = vsel %vm465_vm7, %v3995_v29, %v462_v40  ;;  %v485_v29 = vor.u32 1.1754944e-38, %v484_v24 }
 0x322   :  { %v4003_v46 = vpop.eup %4002  ;;  %v4726_v49 = vsel %vm468_vm8, %v470_v45, %v466_v44  ;;  %vm483_vm8 = vcmp.eq.f32.partialorder %v482_v25, 8.507059e+37 }
 0x323   :  { %v4005_v51 = vpop.eup %4004  ;;  %v444_v52 = vmul.f32 %v4003_v46, %v425_v38  ;;  %vm449_vm9 = vweird.f32 %v4003_v46 }
 0x324   :  { %v429_v53 = vmul.f32 %v4005_v51, %v424_v39  ;;  %v4007_v56 = vpop.eup %4006  ;;  %vm434_vm11 = vweird.f32 %v4005_v51  ;;  %vm450_vm12 = vmor %vm448_vm10, %vm449_vm9 }
 0x325   :  { %v445_v54 = vsub.f32 1.0, %v444_v52  ;;  %v474_v60 = vmul.f32 %v4007_v56, %v427_v47  ;;  %vm435_vm14 = vmor %vm433_vm13, %vm434_vm11  ;;  %vm479_vm5 = vweird.f32 %v4007_v56  ;;  %v552_v47 = vrot.slane %v4701_v7, 7 }
 0x326   :  { %v430_v55 = vsub.f32 1.0, %v429_v53  ;;  %vm480_vm7 = vmor %vm478_vm6, %vm479_vm5 }
 0x327   :  { %v446_v57 = vmul.f32 %v4003_v46, %v445_v54  ;;  %v475_v11 = vsub.f32 1.0, %v474_v60  ;;  %v553_v54 = vrot.slane %v4695_v62, 7 }
 0x328   :  { %v431_v58 = vmul.f32 %v4005_v51, %v430_v55 }
 0x329   :  { %v447_v61 = vadd.f32 %v4003_v46, %v446_v57  ;;  %v476_v17 = vmul.f32 %v4007_v56, %v475_v11  ;;  %v554_v11 = vrot.slane %v4697_v0, 7 }
 0x32a   :  { %v432_v2 = vadd.f32 %v4005_v51, %v431_v58  ;;  %v561_v58 = vmul.f32 %v553_v54, %v4726_v49 }
 0x32b   :  { %v451_v14 = vsel %vm450_vm12, %v4003_v46, %v447_v61  ;;  %v477_v9 = vadd.f32 %v4007_v56, %v476_v17 }
 0x32c   :  { %v436_v16 = vsel %vm435_vm14, %v4005_v51, %v432_v2  ;;  %v456_v19 = vsel %vm453_vm15, %v455_v6, %v451_v14 }
 0x32d   :  { %v441_v4 = vsel %vm438_vm0, %v440_v22, %v436_v16  ;;  %v481_v26 = vsel %vm480_vm7, %v4007_v56, %v477_v9  ;;  %v529_v56 = vsub.f32 1.0, %v456_v19  ;;  %v560_v63 = vmul.f32 %v456_v19, %v367_v5 }
 0x32e   :  { %v486_v30 = vsel %vm483_vm8, %v485_v29, %v481_v26  ;;  %v528_v46 = vsub.f32 1.0, %v441_v4  ;;  %v559_v51 = vmul.f32 %v552_v47, %v441_v4 }
 0x32f   :  { %v531_v2 = vsub.f32 1.0, %v486_v30  ;;  %v562_v15 = vmul.f32 %v554_v11, %v486_v30 }
 0x35f   :  { %v493_v48 = vpop.permute.xlu2 %492 }
 0x360   :  { %v502_v50 = vmul.f32 %v493_v48, %v4726_v49  ;;  %v530_v48 = vsub.f32 1.0, %v4726_v49 }
 0x362   :  { %512 = vrot.lane.b32.xlu0 %v502_v50, %s4505_s27 }
 0x375   :  { %v491_v18 = vpop.permute.xlu0 %490 }
 0x376   :  { %v501_v23 = vmul.f32 %v491_v18, %v456_v19 }
 0x377   :  { %v489_v3 = vpop.permute.xlu1 %488 }
 0x378   :  { %v500_v8 = vmul.f32 %v489_v3, %v441_v4  ;;  %510 = vrot.lane.b32.xlu1 %v501_v23, %s4505_s27 }
 0x37a   :  { %508 = vrot.lane.b32.xlu2 %v500_v8, %s4505_s27 }
 0x37f   :  { %v495_v31 = vpop.permute.xlu1 %494 }
 0x380   :  { %v503_v32 = vmul.f32 %v495_v31, %v486_v30 }
 0x382   :  { %514 = vrot.lane.b32.xlu2 %v503_v32, %s4505_s27 }
 0x3d4   :  { %v513_v33 = vpop.permute.xlu0 %512  ;;  %v509_v34 = vpop.permute.xlu2 %508 }
 0x3d5   :  { %v522_v35 = vadd.f32 %v513_v33, %v4666_v28  ;;  %v520_v36 = vadd.f32 %v509_v34, %v4658_v20 }
 0x3d7   :  { %4008 = vtanh.f32 %v522_v35 }
 0x3d8   :  { %4010 = vtanh.f32 %v520_v36 }
 0x3dc   :  { %v515_v37 = vpop.permute.xlu2 %514 }
 0x3dd   :  { %v4009_v38 = vpop.eup %4008  ;;  %v523_v39 = vadd.f32 %v515_v37, %v4664_v27 }
 0x3de   :  { %v4011_v40 = vpop.eup %4010  ;;  %540 = vrot.lane.b32.xlu1 %v4009_v38, %s4506_s3 }
 0x3df   :  { %4012 = vtanh.f32 %v523_v39  ;;  %536 = vrot.lane.b32.xlu0 %v4011_v40, %s4506_s3 }
 0x3e5   :  { %v4013_v41 = vpop.eup %4012 }
 0x3e7   :  { %542 = vrot.lane.b32.xlu0 %v4013_v41, %s4506_s3 }
 0x3ea   :  { %v511_v42 = vpop.permute.xlu1 %510 }
 0x3eb   :  { %v521_v43 = vadd.f32 %v511_v42, %v4660_v21 }
 0x3ed   :  { %4014 = vtanh.f32 %v521_v43 }
 0x3f3   :  { %v4015_v44 = vpop.eup %4014 }
 0x3f4   :  { %538 = vrot.lane.b32.xlu2 %v4015_v44, %s4506_s3 }
 0x44e   :  { %v539_v53 = vpop.permute.xlu2 %538 }
 0x44f   :  { %v549_v60 = vmul.f32 %v539_v53, %v529_v56 }
 0x450   :  { %v541_v45 = vpop.permute.xlu1 %540 }
 0x451   :  { %v537_v50 = vpop.permute.xlu0 %536  ;;  %v550_v55 = vmul.f32 %v541_v45, %v530_v48  ;;  %v4753_v14 = vadd.f32 %v560_v63, %v549_v60 }
 0x452   :  { %v548_v52 = vmul.f32 %v537_v50, %v528_v46 }
 0x453   :  { %v4747_v61 = vadd.f32 %v561_v58, %v550_v55 }
 0x454   :  { %v4744_v57 = vadd.f32 %v559_v51, %v548_v52 }
 0x455   :  { %v590_v16 = vrot.slane %v4747_v61, 7 }
 0x456   :  { %v588_v1 = vrot.slane %v4744_v57, 1 }
 0x458   :  { %v589_v49 = vsel %vm368_vm1, %v4753_v14, %v588_v1 }
 0x459   :  { %v543_v13 = vpop.permute.xlu0 %542  ;;  %v591_v5 = vsel %vm371_vm2, %v590_v16, %v589_v49 }
 0x45a   :  { %v551_v6 = vmul.f32 %v543_v13, %v531_v2 }
 0x45c   :  { %v4756_v17 = vadd.f32 %v562_v15, %v551_v6 }
 0x45e   :  { %v592_v18 = vrot.slane %v4756_v17, 6 }
 0x460   :  { %v593_v19 = vsel %vm374_vm3, %v592_v18, %v591_v5 }
 0x461   :  { %594 = vrot.lane.b32.xlu1 %v593_v19, %s4506_s3 }
 0x4d3   :  { %v595_v22 = vpop.permute.xlu1 %594 }
 0x4d4   :  { %3866 = vmatmul.msk.f32.vlgmr.msrb.gmra.mxu3 %vm162_vm4, %v595_v22 }
 0x557   :  { %v615_v23 = vpop.f32.mrf.mxu3 }
 0x558   :  { %v616_v3 = vadd.f32 %v4648_v12, %v615_v23 }
 0x55a   :  { %v621_v4 = vrot.slane %v616_v3, 1  ;;  %v620_v8 = vrot.slane %v616_v3, 7  ;;  %v619_v9 = vrot.slane %v616_v3, 6  ;;  %v628_v26 = vadd.f32 %v616_v3, %v4666_v28 }
 0x55c   :  { %712 = vrot.lane.b32.xlu1 %v621_v4, %s4505_s27  ;;  %708 = vrot.lane.b32.xlu0 %v620_v8, %s4505_s27  ;;  %v626_v24 = vadd.f32 %v619_v9, %v4658_v20  ;;  %v3869_v29 = vmul.f32 -1.442695, %v628_v26  ;;  %v629_v33 = vadd.f32 %v621_v4, %v4664_v27  ;;  %v627_v34 = vadd.f32 %v620_v8, %v4660_v21 }
 0x55d   :  { %706 = vrot.lane.b32.xlu2 %v619_v9, %s4505_s27 }
 0x55e   :  { %v3867_v25 = vmul.f32 -1.442695, %v626_v24  ;;  %v3870_v36 = vmul.f32 -1.442695, %v629_v33  ;;  %v3868_v38 = vmul.f32 -1.442695, %v627_v34 }
 0x560   :  { %4016 = vpow2.f32 %v3867_v25 }
 0x561   :  { %4018 = vpow2.f32 %v3869_v29 }
 0x565   :  { %710 = vrot.lane.b32.xlu2 %v616_v3, %s4505_s27 }
 0x566   :  { %v4017_v30 = vpop.eup %4016 }
 0x567   :  { %v642_v31 = vadd.f32 1.0, %v4017_v30  ;;  %v4019_v32 = vpop.eup %4018 }
 0x568   :  { %v644_v35 = vadd.f32 1.0, %v4019_v32 }
 0x569   :  { %4020 = vrcp.f32 %v642_v31  ;;  %v657_v51 = vand.u32 2147483648, %v642_v31  ;;  %vm651_vm10 = vweird.f32 %v642_v31  ;;  %v655_v52 = vand.u32 2147483647, %v642_v31 }
 0x56a   :  { %4022 = vrcp.f32 %v644_v35  ;;  %v687_v11 = vand.u32 2147483648, %v644_v35  ;;  %vm681_vm14 = vweird.f32 %v644_v35  ;;  %v685_v13 = vand.u32 2147483647, %v644_v35 }
 0x56b   :  { %4024 = vpow2.f32 %v3870_v36  ;;  %v658_v55 = vor.u32 1.1754944e-38, %v657_v51  ;;  %vm656_vm12 = vcmp.eq.f32.partialorder %v655_v52, 8.507059e+37 }
 0x56c   :  { %4026 = vpow2.f32 %v3868_v38  ;;  %v688_v18 = vor.u32 1.1754944e-38, %v687_v11  ;;  %vm686_vm0 = vcmp.eq.f32.partialorder %v685_v13, 8.507059e+37 }
 0x56f   :  { %v4021_v37 = vpop.eup %4020 }
 0x570   :  { %v647_v39 = vmul.f32 %v4021_v37, %v642_v31  ;;  %v4023_v41 = vpop.eup %4022  ;;  %vm652_vm9 = vweird.f32 %v4021_v37 }
 0x571   :  { %v4025_v42 = vpop.eup %4024  ;;  %v677_v45 = vmul.f32 %v4023_v41, %v644_v35  ;;  %vm653_vm11 = vmor %vm651_vm10, %vm652_vm9  ;;  %vm682_vm13 = vweird.f32 %v4023_v41 }
 0x572   :  { %v648_v40 = vsub.f32 1.0, %v647_v39  ;;  %v4027_v43 = vpop.eup %4026  ;;  %v645_v46 = vadd.f32 1.0, %v4025_v42  ;;  %vm683_vm15 = vmor %vm681_vm14, %vm682_vm13 }
 0x573   :  { %v643_v47 = vadd.f32 1.0, %v4027_v43  ;;  %v678_v50 = vsub.f32 1.0, %v677_v45 }
 0x574   :  { %v649_v44 = vmul.f32 %v4021_v37, %v648_v40  ;;  %4028 = vrcp.f32 %v645_v46  ;;  %vm696_vm7 = vweird.f32 %v645_v46  ;;  %v702_v25 = vand.u32 2147483648, %v645_v46 }
 0x575   :  { %4030 = vrcp.f32 %v643_v47  ;;  %v679_v54 = vmul.f32 %v4023_v41, %v678_v50  ;;  %v672_v26 = vand.u32 2147483648, %v643_v47  ;;  %v700_v29 = vand.u32 2147483647, %v645_v46 }
 0x576   :  { %v650_v48 = vadd.f32 %v4021_v37, %v649_v44  ;;  %vm666_vm9 = vweird.f32 %v643_v47  ;;  %v670_v30 = vand.u32 2147483647, %v643_v47  ;;  %v703_v33 = vor.u32 1.1754944e-38, %v702_v25 }
 0x577   :  { %v680_v2 = vadd.f32 %v4023_v41, %v679_v54  ;;  %v673_v34 = vor.u32 1.1754944e-38, %v672_v26 }
 0x578   :  { %v654_v53 = vsel %vm653_vm11, %v4021_v37, %v650_v48  ;;  %vm701_vm11 = vcmp.eq.f32.partialorder %v700_v29, 8.507059e+37 }
 0x579   :  { %v4776_v60 = vsel %vm656_vm12, %v658_v55, %v654_v53  ;;  %v684_v49 = vsel %vm683_vm15, %v4023_v41, %v680_v2  ;;  %vm671_vm12 = vcmp.eq.f32.partialorder %v670_v30, 8.507059e+37 }
 0x57a   :  { %v4029_v56 = vpop.eup %4028  ;;  %v4780_v5 = vsel %vm686_vm0, %v688_v18, %v684_v49 }
 0x57b   :  { %v4031_v63 = vpop.eup %4030  ;;  %v692_v15 = vmul.f32 %v4029_v56, %v645_v46  ;;  %vm697_vm5 = vweird.f32 %v4029_v56 }
 0x57c   :  { %v662_v6 = vmul.f32 %v4031_v63, %v643_v47  ;;  %vm667_vm6 = vweird.f32 %v4031_v63  ;;  %vm698_vm8 = vmor %vm696_vm7, %vm697_vm5 }
 0x57d   :  { %v693_v22 = vsub.f32 1.0, %v692_v15  ;;  %vm668_vm10 = vmor %vm666_vm9, %vm667_vm6 }
 0x57e   :  { %v663_v23 = vsub.f32 1.0, %v662_v6 }
 0x57f   :  { %v694_v4 = vmul.f32 %v4029_v56, %v693_v22  ;;  %v772_v22 = vrot.slane %v4756_v17, 7 }
 0x580   :  { %v664_v8 = vmul.f32 %v4031_v63, %v663_v23 }
 0x581   :  { %v695_v9 = vadd.f32 %v4029_v56, %v694_v4  ;;  %v748_v4 = vsub.f32 1.0, %v4780_v5 }
 0x582   :  { %v665_v24 = vadd.f32 %v4031_v63, %v664_v8 }
 0x583   :  { %v699_v31 = vsel %vm698_vm8, %v4029_v56, %v695_v9  ;;  %v746_v56 = vsub.f32 1.0, %v4776_v60 }
 0x584   :  { %v669_v32 = vsel %vm668_vm10, %v4031_v63, %v665_v24  ;;  %v704_v36 = vsel %vm701_vm11, %v703_v33, %v699_v31 }
 0x585   :  { %v674_v38 = vsel %vm671_vm12, %v673_v34, %v669_v32  ;;  %v749_v49 = vsub.f32 1.0, %v704_v36 }
 0x586   :  { %v747_v54 = vsub.f32 1.0, %v674_v38 }
 0x5b7   :  { %v707_v58 = vpop.permute.xlu2 %706 }
 0x5b8   :  { %v718_v1 = vmul.f32 %v707_v58, %v4776_v60  ;;  %v771_v58 = vrot.slane %v4753_v14, 7 }
 0x5ba   :  { %726 = vrot.lane.b32.xlu0 %v718_v1, %s4505_s27  ;;  %v770_v1 = vrot.slane %v4744_v57, 7  ;;  %v778_v15 = vmul.f32 %v771_v58, %v674_v38 }
 0x5bc   :  { %v777_v6 = vmul.f32 %v770_v1, %v4776_v60  ;;  %v779_v60 = vmul.f32 %v4780_v5, %v590_v16 }
 0x5bf   :  { %v711_v19 = vpop.permute.xlu2 %710 }
 0x5c0   :  { %v720_v3 = vmul.f32 %v711_v19, %v4780_v5 }
 0x5c2   :  { %730 = vrot.lane.b32.xlu0 %v720_v3, %s4505_s27  ;;  %v780_v3 = vmul.f32 %v772_v22, %v704_v36 }
 0x5ce   :  { %v713_v35 = vpop.permute.xlu1 %712  ;;  %v709_v37 = vpop.permute.xlu0 %708 }
 0x5cf   :  { %v721_v39 = vmul.f32 %v713_v35, %v704_v36  ;;  %v719_v40 = vmul.f32 %v709_v37, %v674_v38 }
 0x5d1   :  { %728 = vrot.lane.b32.xlu1 %v719_v40, %s4505_s27  ;;  %732 = vrot.lane.b32.xlu2 %v721_v39, %s4505_s27 }
 0x62b   :  { %v733_v41 = vpop.permute.xlu2 %732 }
 0x62c   :  { %v741_v42 = vadd.f32 %v733_v41, %v4664_v27  ;;  %v727_v43 = vpop.permute.xlu0 %726 }
 0x62d   :  { %v738_v44 = vadd.f32 %v727_v43, %v4658_v20 }
 0x62e   :  { %4032 = vtanh.f32 %v741_v42 }
 0x62f   :  { %4034 = vtanh.f32 %v738_v44 }
 0x634   :  { %v4033_v45 = vpop.eup %4032  ;;  %v731_v46 = vpop.permute.xlu0 %730 }
 0x635   :  { %v4035_v47 = vpop.eup %4034  ;;  %v740_v48 = vadd.f32 %v731_v46, %v4666_v28  ;;  %760 = vrot.lane.b32.xlu0 %v4033_v45, %s4506_s3 }
 0x636   :  { %754 = vrot.lane.b32.xlu1 %v4035_v47, %s4506_s3 }
 0x637   :  { %4036 = vtanh.f32 %v740_v48 }
 0x63d   :  { %v4037_v50 = vpop.eup %4036 }
 0x63e   :  { %758 = vrot.lane.b32.xlu1 %v4037_v50, %s4506_s3 }
 0x643   :  { %v729_v51 = vpop.permute.xlu1 %728 }
 0x644   :  { %v739_v52 = vadd.f32 %v729_v51, %v4660_v21 }
 0x646   :  { %4038 = vtanh.f32 %v739_v52 }
 0x64c   :  { %v4039_v53 = vpop.eup %4038 }
 0x64d   :  { %756 = vrot.lane.b32.xlu2 %v4039_v53, %s4506_s3 }
 0x6a7   :  { %v757_v55 = vpop.permute.xlu2 %756  ;;  %v761_v13 = vpop.permute.xlu0 %760 }
 0x6a8   :  { %v767_v63 = vmul.f32 %v757_v55, %v747_v54  ;;  %v755_v2 = vpop.permute.xlu1 %754  ;;  %v769_v23 = vmul.f32 %v761_v13, %v749_v49 }
 0x6a9   :  { %v766_v11 = vmul.f32 %v755_v2, %v746_v56 }
 0x6aa   :  { %v4798_v18 = vadd.f32 %v778_v15, %v767_v63  ;;  %v4806_v24 = vadd.f32 %v780_v3, %v769_v23 }
 0x6ab   :  { %v4800_v19 = vadd.f32 %v777_v6, %v766_v11 }
 0x6ac   :  { %v807_v8 = vrot.slane %v4798_v18, 1  ;;  %v810_v30 = vrot.slane %v4806_v24, 7 }
 0x6ad   :  { %v806_v9 = vrot.slane %v4800_v19, 2 }
 0x6af   :  { %v808_v31 = vsel %vm368_vm1, %v807_v8, %v806_v9 }
 0x6b0   :  { %v759_v25 = vpop.permute.xlu1 %758 }
 0x6b1   :  { %v768_v26 = vmul.f32 %v759_v25, %v748_v4 }
 0x6b3   :  { %v4811_v29 = vadd.f32 %v779_v60, %v768_v26 }
 0x6b5   :  { %v809_v32 = vsel %vm371_vm2, %v4811_v29, %v808_v31 }
 0x6b6   :  { %v811_v33 = vsel %vm374_vm3, %v810_v30, %v809_v32 }
 0x6b7   :  { %812 = vrot.lane.b32.xlu2 %v811_v33, %s4506_s3 }
 0x711   :  { %v813_v34 = vpop.permute.xlu2 %812 }
 0x712   :  { %3871 = vmatmul.msk.f32.vlgmr.msra.gmra.mxu1 %vm162_vm4, %v813_v34 }
 0x78f   :  { %v833_v16 = vpop.f32.mrf.mxu1 }
 0x790   :  { %v834_v5 = vadd.f32 %v4648_v12, %v833_v16 }
 0x792   :  { %v839_v35 = vrot.slane %v834_v5, 7  ;;  %v838_v36 = vrot.slane %v834_v5, 6  ;;  %v837_v37 = vrot.slane %v834_v5, 5  ;;  %v847_v47 = vadd.f32 %v834_v5, %v4664_v27 }
 0x794   :  { %928 = vrot.lane.b32.xlu2 %v839_v35, %s4505_s27  ;;  %926 = vrot.lane.b32.xlu1 %v838_v36, %s4505_s27  ;;  %v846_v38 = vadd.f32 %v839_v35, %v4666_v28  ;;  %v845_v12 = vadd.f32 %v838_v36, %v4660_v21  ;;  %v844_v42 = vadd.f32 %v837_v37, %v4658_v20  ;;  %v3875_v50 = vmul.f32 -1.442695, %v847_v47 }
 0x795   :  { %924 = vrot.lane.b32.xlu0 %v837_v37, %s4505_s27 }
 0x796   :  { %v3874_v39 = vmul.f32 -1.442695, %v846_v38  ;;  %v3873_v44 = vmul.f32 -1.442695, %v845_v12  ;;  %v3872_v45 = vmul.f32 -1.442695, %v844_v42 }
 0x798   :  { %4040 = vpow2.f32 %v3874_v39 }
 0x79d   :  { %930 = vrot.lane.b32.xlu0 %v834_v5, %s4505_s27 }
 0x79e   :  { %v4041_v40 = vpop.eup %4040 }
 0x79f   :  { %v862_v41 = vadd.f32 1.0, %v4041_v40 }
 0x7a1   :  { %4042 = vrcp.f32 %v862_v41  ;;  %v905_v58 = vand.u32 2147483648, %v862_v41  ;;  %vm899_vm14 = vweird.f32 %v862_v41  ;;  %v903_v63 = vand.u32 2147483647, %v862_v41 }
 0x7a2   :  { %4044 = vpow2.f32 %v3873_v44 }
 0x7a3   :  { %4046 = vpow2.f32 %v3872_v45  ;;  %v906_v11 = vor.u32 1.1754944e-38, %v905_v58  ;;  %vm904_vm0 = vcmp.eq.f32.partialorder %v903_v63, 8.507059e+37 }
 0x7a4   :  { %4048 = vpow2.f32 %v3875_v50 }
 0x7a7   :  { %v4043_v43 = vpop.eup %4042 }
 0x7a8   :  { %v895_v46 = vmul.f32 %v4043_v43, %v862_v41  ;;  %v4045_v51 = vpop.eup %4044  ;;  %vm900_vm13 = vweird.f32 %v4043_v43 }
 0x7a9   :  { %v4047_v53 = vpop.eup %4046  ;;  %v861_v54 = vadd.f32 1.0, %v4045_v51  ;;  %vm901_vm15 = vmor %vm899_vm14, %vm900_vm13 }
 0x7aa   :  { %v896_v48 = vsub.f32 1.0, %v895_v46  ;;  %v860_v55 = vadd.f32 1.0, %v4047_v53  ;;  %v4049_v2 = vpop.eup %4048 }
 0x7ab   :  { %4050 = vrcp.f32 %v861_v54  ;;  %v863_v6 = vadd.f32 1.0, %v4049_v2  ;;  %v890_v33 = vand.u32 2147483648, %v861_v54  ;;  %vm884_vm7 = vweird.f32 %v861_v54 }
 0x7ac   :  { %v897_v52 = vmul.f32 %v4043_v43, %v896_v48  ;;  %4052 = vrcp.f32 %v860_v55  ;;  %v888_v5 = vand.u32 2147483647, %v861_v54  ;;  %v875_v35 = vand.u32 2147483648, %v860_v55 }
 0x7ad   :  { %4054 = vrcp.f32 %v863_v6  ;;  %vm869_vm9 = vweird.f32 %v860_v55  ;;  %v873_v36 = vand.u32 2147483647, %v860_v55  ;;  %v891_v38 = vor.u32 1.1754944e-38, %v890_v33 }
 0x7ae   :  { %v898_v56 = vadd.f32 %v4043_v43, %v897_v52  ;;  %vm889_vm11 = vcmp.eq.f32.partialorder %v888_v5, 8.507059e+37  ;;  %v876_v41 = vor.u32 1.1754944e-38, %v875_v35  ;;  %v920_v48 = vand.u32 2147483648, %v863_v6 }
 0x7af   :  { %vm874_vm12 = vcmp.eq.f32.partialorder %v873_v36, 8.507059e+37  ;;  %vm914_vm14 = vweird.f32 %v863_v6  ;;  %v918_v50 = vand.u32 2147483647, %v863_v6 }
 0x7b0   :  { %v902_v1 = vsel %vm901_vm15, %v4043_v43, %v898_v56  ;;  %v921_v52 = vor.u32 1.1754944e-38, %v920_v48 }
 0x7b1   :  { %v4831_v15 = vsel %vm904_vm0, %v906_v11, %v902_v1  ;;  %v4051_v22 = vpop.eup %4050  ;;  %vm919_vm0 = vcmp.eq.f32.partialorder %v918_v50, 8.507059e+37 }
 0x7b2   :  { %v4053_v23 = vpop.eup %4052  ;;  %v880_v3 = vmul.f32 %v4051_v22, %v861_v54  ;;  %vm885_vm5 = vweird.f32 %v4051_v22 }
 0x7b3   :  { %v865_v4 = vmul.f32 %v4053_v23, %v860_v55  ;;  %v4055_v25 = vpop.eup %4054  ;;  %vm870_vm6 = vweird.f32 %v4053_v23  ;;  %vm886_vm8 = vmor %vm884_vm7, %vm885_vm5 }
 0x7b4   :  { %v881_v8 = vsub.f32 1.0, %v880_v3  ;;  %v910_v31 = vmul.f32 %v4055_v25, %v863_v6  ;;  %vm871_vm10 = vmor %vm869_vm9, %vm870_vm6  ;;  %vm915_vm13 = vweird.f32 %v4055_v25 }
 0x7b5   :  { %v866_v9 = vsub.f32 1.0, %v865_v4  ;;  %vm916_vm15 = vmor %vm914_vm14, %vm915_vm13 }
 0x7b6   :  { %v882_v60 = vmul.f32 %v4051_v22, %v881_v8  ;;  %v911_v16 = vsub.f32 1.0, %v910_v31  ;;  %v989_v8 = vrot.slane %v4798_v18, 7 }
 0x7b7   :  { %v867_v26 = vmul.f32 %v4053_v23, %v866_v9 }
 0x7b8   :  { %v883_v32 = vadd.f32 %v4051_v22, %v882_v60  ;;  %v912_v40 = vmul.f32 %v4055_v25, %v911_v16  ;;  %v988_v60 = vrot.slane %v4800_v19, 7 }
 0x7b9   :  { %v868_v34 = vadd.f32 %v4053_v23, %v867_v26  ;;  %v966_v26 = vsub.f32 1.0, %v4831_v15 }
 0x7ba   :  { %v887_v37 = vsel %vm886_vm8, %v4051_v22, %v883_v32  ;;  %v913_v47 = vadd.f32 %v4055_v25, %v912_v40 }
 0x7bb   :  { %v872_v39 = vsel %vm871_vm10, %v4053_v23, %v868_v34  ;;  %v892_v42 = vsel %vm889_vm11, %v891_v38, %v887_v37  ;;  %v990_v34 = vrot.slane %v4811_v29, 7 }
 0x7bc   :  { %v877_v45 = vsel %vm874_vm12, %v876_v41, %v872_v39  ;;  %v917_v51 = vsel %vm916_vm15, %v4055_v25, %v913_v47  ;;  %v965_v4 = vsub.f32 1.0, %v892_v42  ;;  %v996_v31 = vmul.f32 %v989_v8, %v892_v42 }
 0x7bd   :  { %v922_v53 = vsel %vm919_vm0, %v921_v52, %v917_v51  ;;  %v964_v25 = vsub.f32 1.0, %v877_v45  ;;  %v995_v5 = vmul.f32 %v988_v60, %v877_v45  ;;  %v997_v38 = vmul.f32 %v990_v34, %v4831_v15 }
 0x7ee   :  { %v929_v13 = vpop.permute.xlu2 %928 }
 0x7ef   :  { %v938_v49 = vmul.f32 %v929_v13, %v4831_v15 }
 0x7f1   :  { %948 = vrot.lane.b32.xlu0 %v938_v49, %s4505_s27 }
 0x806   :  { %v927_v12 = vpop.permute.xlu1 %926 }
 0x807   :  { %v937_v43 = vmul.f32 %v927_v12, %v892_v42  ;;  %v925_v44 = vpop.permute.xlu0 %924  ;;  %v967_v42 = vsub.f32 1.0, %v922_v53 }
 0x808   :  { %v936_v46 = vmul.f32 %v925_v44, %v877_v45  ;;  %v998_v45 = vmul.f32 %v922_v53, %v810_v30  ;;  %v4873_v30 = vld [vmem:[%s5738_s4] ss:$0 sm:$0xff] }
 0x809   :  { %946 = vrot.lane.b32.xlu2 %v937_v43, %s4505_s27 }
 0x80a   :  { %944 = vrot.lane.b32.xlu1 %v936_v46, %s4505_s27 }
 0x80f   :  { %v931_v54 = vpop.permute.xlu0 %930 }
 0x810   :  { %v939_v55 = vmul.f32 %v931_v54, %v922_v53 }
 0x812   :  { %950 = vrot.lane.b32.xlu1 %v939_v55, %s4505_s27 }
 0x863   :  { %v947_v56 = vpop.permute.xlu2 %946  ;;  %v949_v58 = vpop.permute.xlu0 %948 }
 0x864   :  { %v957_v63 = vadd.f32 %v947_v56, %v4660_v21  ;;  %v958_v1 = vadd.f32 %v949_v58, %v4666_v28 }
 0x866   :  { %4056 = vtanh.f32 %v957_v63 }
 0x867   :  { %4058 = vtanh.f32 %v958_v1 }
 0x86c   :  { %v4057_v2 = vpop.eup %4056 }
 0x86d   :  { %v4059_v11 = vpop.eup %4058  ;;  %974 = vrot.lane.b32.xlu0 %v4057_v2, %s4506_s3 }
 0x86e   :  { %976 = vrot.lane.b32.xlu1 %v4059_v11, %s4506_s3 }
 0x87c   :  { %v945_v13 = vpop.permute.xlu1 %944 }
 0x87d   :  { %v956_v6 = vadd.f32 %v945_v13, %v4658_v20 }
 0x87f   :  { %4060 = vtanh.f32 %v956_v6 }
 0x884   :  { %v951_v49 = vpop.permute.xlu1 %950 }
 0x885   :  { %v4061_v22 = vpop.eup %4060  ;;  %v959_v23 = vadd.f32 %v951_v49, %v4664_v27 }
 0x886   :  { %972 = vrot.lane.b32.xlu2 %v4061_v22, %s4506_s3 }
 0x887   :  { %4062 = vtanh.f32 %v959_v23 }
 0x88d   :  { %v4063_v3 = vpop.eup %4062 }
 0x88e   :  { %978 = vrot.lane.b32.xlu2 %v4063_v3, %s4506_s3 }
 0x8df   :  { %v975_v9 = vpop.permute.xlu0 %974 }
 0x8e0   :  { %v985_v32 = vmul.f32 %v975_v9, %v965_v4  ;;  %v973_v33 = vpop.permute.xlu2 %972  ;;  %v977_v16 = vpop.permute.xlu1 %976 }
 0x8e1   :  { %v984_v35 = vmul.f32 %v973_v33, %v964_v25  ;;  %v986_v36 = vmul.f32 %v977_v16, %v966_v26 }
 0x8e2   :  { %v4850_v37 = vadd.f32 %v996_v31, %v985_v32 }
 0x8e3   :  { %v4853_v39 = vadd.f32 %v995_v5, %v984_v35  ;;  %v4855_v40 = vadd.f32 %v997_v38, %v986_v36 }
 0x8e4   :  { %v1025_v41 = vrot.slane %v4850_v37, 2 }
 0x8e5   :  { %v1024_v12 = vrot.slane %v4853_v39, 3  ;;  %v1027_v43 = vrot.slane %v4855_v40, 1 }
 0x8e7   :  { %v1026_v47 = vsel %vm368_vm1, %v1025_v41, %v1024_v12 }
 0x8e8   :  { %v979_v44 = vpop.permute.xlu2 %978  ;;  %v1028_v15 = vsel %vm371_vm2, %v1027_v43, %v1026_v47 }
 0x8e9   :  { %v987_v46 = vmul.f32 %v979_v44, %v967_v42 }
 0x8eb   :  { %v4863_v48 = vadd.f32 %v998_v45, %v987_v46 }
 0x8ed   :  { %v1029_v50 = vsel %vm374_vm3, %v4863_v48, %v1028_v15 }
 0x8ee   :  { %1030 = vrot.lane.b32.xlu0 %v1029_v50, %s4506_s3 }
 0x960   :  { %v1031_v51 = vpop.permute.xlu0 %1030 }
 0x961   :  { %3876 = vmatmul.msk.f32.vlgmr.msra.gmra.mxu2 %vm162_vm4, %v1031_v51 }
 0x9e4   :  { %v1051_v52 = vpop.f32.mrf.mxu2 }
 0x9e5   :  { %v1052_v53 = vadd.f32 %v4873_v30, %v1051_v52 }
 0x9e7   :  { %v1057_v54 = vrot.slane %v1052_v53, 6  ;;  %v1056_v55 = vrot.slane %v1052_v53, 5  ;;  %v1055_v56 = vrot.slane %v1052_v53, 4  ;;  %v1058_v58 = vrot.slane %v1052_v53, 7 }
 0x9e9   :  { %1147 = vrot.lane.b32.xlu0 %v1057_v54, %s4505_s27  ;;  %1145 = vrot.lane.b32.xlu2 %v1056_v55, %s4505_s27  ;;  %v1064_v63 = vadd.f32 %v1056_v55, %v4660_v21  ;;  %v1065_v13 = vadd.f32 %v1057_v54, %v4666_v28  ;;  %v1063_v6 = vadd.f32 %v1055_v56, %v4658_v20 }
 0x9ea   :  { %1143 = vrot.lane.b32.xlu1 %v1055_v56, %s4505_s27  ;;  %v1066_v4 = vadd.f32 %v1058_v58, %v4664_v27 }
 0x9eb   :  { %v3878_v1 = vmul.f32 -1.442695, %v1064_v63  ;;  %v3879_v22 = vmul.f32 -1.442695, %v1065_v13  ;;  %v3877_v23 = vmul.f32 -1.442695, %v1063_v6 }
 0x9ec   :  { %v3880_v9 = vmul.f32 -1.442695, %v1066_v4 }
 0x9ed   :  { %4064 = vpow2.f32 %v3878_v1 }
 0x9f2   :  { %1149 = vrot.lane.b32.xlu1 %v1058_v58, %s4505_s27 }
 0x9f3   :  { %v4065_v2 = vpop.eup %4064 }
 0x9f4   :  { %v1080_v11 = vadd.f32 1.0, %v4065_v2 }
 0x9f6   :  { %4066 = vrcp.f32 %v1080_v11  ;;  %v1109_v34 = vand.u32 2147483648, %v1080_v11  ;;  %vm1103_vm6 = vweird.f32 %v1080_v11  ;;  %v1107_v16 = vand.u32 2147483647, %v1080_v11 }
 0x9f7   :  { %4068 = vpow2.f32 %v3879_v22 }
 0x9f8   :  { %4070 = vpow2.f32 %v3877_v23  ;;  %v1110_v36 = vor.u32 1.1754944e-38, %v1109_v34  ;;  %vm1108_vm8 = vcmp.eq.f32.partialorder %v1107_v16, 8.507059e+37 }
 0x9f9   :  { %4072 = vpow2.f32 %v3880_v9 }
 0x9fc   :  { %v4067_v49 = vpop.eup %4066 }
 0x9fd   :  { %v1099_v3 = vmul.f32 %v4067_v49, %v1080_v11  ;;  %v4069_v25 = vpop.eup %4068  ;;  %vm1104_vm5 = vweird.f32 %v4067_v49 }
 0x9fe   :  { %v4071_v26 = vpop.eup %4070  ;;  %v1081_v31 = vadd.f32 1.0, %v4069_v25  ;;  %vm1105_vm7 = vmor %vm1103_vm6, %vm1104_vm5 }
 0x9ff   :  { %v1100_v8 = vsub.f32 1.0, %v1099_v3  ;;  %v1079_v32 = vadd.f32 1.0, %v4071_v26  ;;  %v4073_v35 = vpop.eup %4072 }
 0xa00   :  { %4074 = vrcp.f32 %v1081_v31  ;;  %v1082_v12 = vadd.f32 1.0, %v4073_v35  ;;  %v1124_v55 = vand.u32 2147483648, %v1081_v31  ;;  %vm1118_vm11 = vweird.f32 %v1081_v31 }
 0xa01   :  { %v1101_v60 = vmul.f32 %v4067_v49, %v1100_v8  ;;  %4076 = vrcp.f32 %v1079_v32  ;;  %v1122_v63 = vand.u32 2147483647, %v1081_v31  ;;  %v1094_v1 = vand.u32 2147483648, %v1079_v32 }
 0xa02   :  { %4078 = vrcp.f32 %v1082_v12  ;;  %vm1088_vm13 = vweird.f32 %v1079_v32  ;;  %v1092_v2 = vand.u32 2147483647, %v1079_v32  ;;  %v1125_v13 = vor.u32 1.1754944e-38, %v1124_v55 }
 0xa03   :  { %v1102_v33 = vadd.f32 %v4067_v49, %v1101_v60  ;;  %vm1123_vm15 = vcmp.eq.f32.partialorder %v1122_v63, 8.507059e+37  ;;  %v1095_v22 = vor.u32 1.1754944e-38, %v1094_v1  ;;  %v1139_v26 = vand.u32 2147483648, %v1082_v12 }
 0xa04   :  { %vm1093_vm0 = vcmp.eq.f32.partialorder %v1092_v2, 8.507059e+37  ;;  %vm1133_vm6 = vweird.f32 %v1082_v12  ;;  %v1207_v55 = vrot.slane %v4853_v39, 7 }
 0xa05   :  { %v1106_v5 = vsel %vm1105_vm7, %v4067_v49, %v1102_v33  ;;  %v1140_v33 = vor.u32 1.1754944e-38, %v1139_v26 }
 0xa06   :  { %v4884_v41 = vsel %vm1108_vm8, %v1110_v36, %v1106_v5  ;;  %v4075_v43 = vpop.eup %4074 }
 0xa07   :  { %v4077_v44 = vpop.eup %4076  ;;  %v1114_v45 = vmul.f32 %v4075_v43, %v1081_v31  ;;  %vm1119_vm9 = vweird.f32 %v4075_v43  ;;  %v1137_v31 = vand.u32 2147483647, %v1082_v12 }
 0xa08   :  { %v1084_v46 = vmul.f32 %v4077_v44, %v1079_v32  ;;  %v4079_v50 = vpop.eup %4078  ;;  %vm1089_vm10 = vweird.f32 %v4077_v44  ;;  %vm1120_vm12 = vmor %vm1118_vm11, %vm1119_vm9 }
 0xa09   :  { %v1115_v47 = vsub.f32 1.0, %v1114_v45  ;;  %v1129_v53 = vmul.f32 %v4079_v50, %v1082_v12  ;;  %vm1090_vm14 = vmor %vm1088_vm13, %vm1089_vm10  ;;  %vm1134_vm5 = vweird.f32 %v4079_v50  ;;  %vm1138_vm8 = vcmp.eq.f32.partialorder %v1137_v31, 8.507059e+37 }
 0xa0a   :  { %v1085_v15 = vsub.f32 1.0, %v1084_v46  ;;  %vm1135_vm7 = vmor %vm1133_vm6, %vm1134_vm5  ;;  %v1210_v31 = vrot.slane %v4863_v48, 7 }
 0xa0b   :  { %v1116_v51 = vmul.f32 %v4075_v43, %v1115_v47  ;;  %v1130_v58 = vsub.f32 1.0, %v1129_v53 }
 0xa0c   :  { %v1086_v52 = vmul.f32 %v4077_v44, %v1085_v15 }
 0xa0d   :  { %v1117_v54 = vadd.f32 %v4075_v43, %v1116_v51  ;;  %v1131_v49 = vmul.f32 %v4079_v50, %v1130_v58  ;;  %v1184_v51 = vsub.f32 1.0, %v4884_v41 }
 0xa0e   :  { %v1087_v56 = vadd.f32 %v4077_v44, %v1086_v52  ;;  %v1208_v52 = vrot.slane %v4850_v37, 7 }
 0xa0f   :  { %v1121_v11 = vsel %vm1120_vm12, %v4075_v43, %v1117_v54  ;;  %v1132_v60 = vadd.f32 %v4079_v50, %v1131_v49 }
 0xa10   :  { %v1091_v6 = vsel %vm1090_vm14, %v4077_v44, %v1087_v56  ;;  %v1126_v3 = vsel %vm1123_vm15, %v1125_v13, %v1121_v11  ;;  %v1216_v2 = vmul.f32 %v1208_v52, %v4884_v41 }
 0xa11   :  { %v1096_v9 = vsel %vm1093_vm0, %v1095_v22, %v1091_v6  ;;  %v1136_v32 = vsel %vm1135_vm7, %v4079_v50, %v1132_v60  ;;  %v1185_v1 = vsub.f32 1.0, %v1126_v3  ;;  %v1209_v6 = vrot.slane %v4855_v40, 7 }
 0xa12   :  { %v1141_v34 = vsel %vm1138_vm8, %v1140_v33, %v1136_v32  ;;  %v1183_v54 = vsub.f32 1.0, %v1096_v9  ;;  %v1215_v11 = vmul.f32 %v1207_v55, %v1096_v9 }
 0xa13   :  { %v1186_v26 = vsub.f32 1.0, %v1141_v34 }
 0xa43   :  { %v1146_v38 = vpop.permute.xlu2 %1145 }
 0xa44   :  { %v1156_v42 = vmul.f32 %v1146_v38, %v4884_v41 }
 0xa46   :  { %1165 = vrot.lane.b32.xlu0 %v1156_v42, %s4505_s27 }
 0xa5b   :  { %v1148_v23 = vpop.permute.xlu0 %1147 }
 0xa5c   :  { %v1157_v4 = vmul.f32 %v1148_v23, %v1126_v3  ;;  %v1144_v8 = vpop.permute.xlu1 %1143 }
 0xa5d   :  { %v1155_v25 = vmul.f32 %v1144_v8, %v1096_v9  ;;  %v1218_v9 = vmul.f32 %v1210_v31, %v1141_v34 }
 0xa5e   :  { %1167 = vrot.lane.b32.xlu1 %v1157_v4, %s4505_s27  ;;  %v1217_v4 = vmul.f32 %v1209_v6, %v1126_v3 }
 0xa5f   :  { %1163 = vrot.lane.b32.xlu2 %v1155_v25, %s4505_s27 }
 0xa64   :  { %v1150_v16 = vpop.permute.xlu1 %1149 }
 0xa65   :  { %v1158_v5 = vmul.f32 %v1150_v16, %v1141_v34 }
 0xa67   :  { %1169 = vrot.lane.b32.xlu2 %v1158_v5, %s4505_s27 }
 0xab8   :  { %v1166_v35 = vpop.permute.xlu0 %1165 }
 0xab9   :  { %v1176_v36 = vadd.f32 %v1166_v35, %v4660_v21  ;;  %v1164_v38 = vpop.permute.xlu2 %1163 }
 0xaba   :  { %v1175_v42 = vadd.f32 %v1164_v38, %v4658_v20 }
 0xabb   :  { %4080 = vtanh.f32 %v1176_v36 }
 0xabc   :  { %4082 = vtanh.f32 %v1175_v42 }
 0xac1   :  { %v4081_v43 = vpop.eup %4080  ;;  %v1170_v44 = vpop.permute.xlu2 %1169 }
 0xac2   :  { %v4083_v12 = vpop.eup %4082  ;;  %v1178_v45 = vadd.f32 %v1170_v44, %v4664_v27  ;;  %1193 = vrot.lane.b32.xlu1 %v4081_v43, %s4506_s3 }
 0xac3   :  { %1191 = vrot.lane.b32.xlu0 %v4083_v12, %s4506_s3 }
 0xac4   :  { %4084 = vtanh.f32 %v1178_v45 }
 0xaca   :  { %v4085_v46 = vpop.eup %4084 }
 0xacb   :  { %1197 = vrot.lane.b32.xlu0 %v4085_v46, %s4506_s3 }
 0xad0   :  { %v1168_v47 = vpop.permute.xlu1 %1167 }
 0xad1   :  { %v1177_v15 = vadd.f32 %v1168_v47, %v4666_v28 }
 0xad3   :  { %4086 = vtanh.f32 %v1177_v15 }
 0xad9   :  { %v4087_v50 = vpop.eup %4086 }
 0xada   :  { %1195 = vrot.lane.b32.xlu2 %v4087_v50, %s4506_s3 }
 0xb34   :  { %v1194_v53 = vpop.permute.xlu1 %1193  ;;  %v1196_v56 = vpop.permute.xlu2 %1195 }
 0xb35   :  { %v1204_v58 = vmul.f32 %v1194_v53, %v1184_v51  ;;  %v1192_v63 = vpop.permute.xlu0 %1191  ;;  %v1205_v49 = vmul.f32 %v1196_v56, %v1185_v1 }
 0xb36   :  { %v1203_v13 = vmul.f32 %v1192_v63, %v1183_v54 }
 0xb37   :  { %v4904_v22 = vadd.f32 %v1216_v2, %v1204_v58  ;;  %v4908_v8 = vadd.f32 %v1217_v4, %v1205_v49 }
 0xb38   :  { %v4906_v23 = vadd.f32 %v1215_v11, %v1203_v13 }
 0xb39   :  { %v1245_v25 = vrot.slane %v4904_v22, 3  ;;  %v1247_v33 = vrot.slane %v4908_v8, 2 }
 0xb3a   :  { %v1244_v60 = vrot.slane %v4906_v23, 4 }
 0xb3c   :  { %v1246_v5 = vsel %vm368_vm1, %v1245_v25, %v1244_v60 }
 0xb3d   :  { %v1198_v41 = vpop.permute.xlu0 %1197  ;;  %v1248_v35 = vsel %vm371_vm2, %v1247_v33, %v1246_v5 }
 0xb3e   :  { %v1206_v32 = vmul.f32 %v1198_v41, %v1186_v26 }
 0xb40   :  { %v4914_v16 = vadd.f32 %v1218_v9, %v1206_v32 }
 0xb42   :  { %v1249_v3 = vrot.slane %v4914_v16, 1 }
 0xb44   :  { %v1250_v36 = vsel %vm374_vm3, %v1249_v3, %v1248_v35 }
 0xb45   :  { %1251 = vrot.lane.b32.xlu1 %v1250_v36, %s4506_s3 }
 0xbb7   :  { %v1252_v38 = vpop.permute.xlu1 %1251 }
 0xbb8   :  { %3881 = vmatmul.msk.f32.vlgmr.msra.gmra.mxu3 %vm162_vm4, %v1252_v38 }
 0xc3b   :  { %v1272_v42 = vpop.f32.mrf.mxu3 }
 0xc3c   :  { %v1273_v34 = vadd.f32 %v4873_v30, %v1272_v42 }
 0xc3e   :  { %v1278_v43 = vrot.slane %v1273_v34, 5  ;;  %v1277_v44 = vrot.slane %v1273_v34, 4  ;;  %v1276_v12 = vrot.slane %v1273_v34, 3  ;;  %v1279_v45 = vrot.slane %v1273_v34, 6 }
 0xc40   :  { %1368 = vrot.lane.b32.xlu1 %v1278_v43, %s4505_s27  ;;  %1366 = vrot.lane.b32.xlu0 %v1277_v44, %s4505_s27  ;;  %v1284_v46 = vadd.f32 %v1276_v12, %v4658_v20  ;;  %v1287_v15 = vadd.f32 %v1279_v45, %v4664_v27  ;;  %v1286_v54 = vadd.f32 %v1278_v43, %v4666_v28 }
 0xc41   :  { %1364 = vrot.lane.b32.xlu2 %v1276_v12, %s4505_s27  ;;  %v1285_v55 = vadd.f32 %v1277_v44, %v4660_v21 }
 0xc42   :  { %v3882_v47 = vmul.f32 -1.442695, %v1284_v46  ;;  %v3885_v50 = vmul.f32 -1.442695, %v1287_v15  ;;  %v3884_v58 = vmul.f32 -1.442695, %v1286_v54 }
 0xc43   :  { %v3883_v1 = vmul.f32 -1.442695, %v1285_v55 }
 0xc44   :  { %4088 = vpow2.f32 %v3882_v47 }
 0xc45   :  { %4090 = vpow2.f32 %v3885_v50 }
 0xc49   :  { %1370 = vrot.lane.b32.xlu2 %v1279_v45, %s4505_s27 }
 0xc4a   :  { %v4089_v51 = vpop.eup %4088 }
 0xc4b   :  { %v1300_v52 = vadd.f32 1.0, %v4089_v51  ;;  %v4091_v53 = vpop.eup %4090 }
 0xc4c   :  { %v1303_v56 = vadd.f32 1.0, %v4091_v53 }
 0xc4d   :  { %4092 = vrcp.f32 %v1300_v52  ;;  %v1315_v9 = vand.u32 2147483648, %v1300_v52  ;;  %vm1309_vm10 = vweird.f32 %v1300_v52  ;;  %v1313_v32 = vand.u32 2147483647, %v1300_v52 }
 0xc4e   :  { %4094 = vrcp.f32 %v1303_v56  ;;  %v1360_v44 = vand.u32 2147483648, %v1303_v56  ;;  %vm1354_vm14 = vweird.f32 %v1303_v56  ;;  %v1358_v12 = vand.u32 2147483647, %v1303_v56 }
 0xc4f   :  { %4096 = vpow2.f32 %v3884_v58  ;;  %v1316_v3 = vor.u32 1.1754944e-38, %v1315_v9  ;;  %vm1314_vm12 = vcmp.eq.f32.partialorder %v1313_v32, 8.507059e+37 }
 0xc50   :  { %4098 = vpow2.f32 %v3883_v1  ;;  %v1361_v15 = vor.u32 1.1754944e-38, %v1360_v44  ;;  %vm1359_vm0 = vcmp.eq.f32.partialorder %v1358_v12, 8.507059e+37 }
 0xc53   :  { %v4093_v63 = vpop.eup %4092 }
 0xc54   :  { %v1305_v2 = vmul.f32 %v4093_v63, %v1300_v52  ;;  %v4095_v13 = vpop.eup %4094  ;;  %vm1310_vm9 = vweird.f32 %v4093_v63 }
 0xc55   :  { %v4097_v6 = vpop.eup %4096  ;;  %v1350_v25 = vmul.f32 %v4095_v13, %v1303_v56  ;;  %vm1311_vm11 = vmor %vm1309_vm10, %vm1310_vm9  ;;  %vm1355_vm13 = vweird.f32 %v4095_v13 }
 0xc56   :  { %v1306_v11 = vsub.f32 1.0, %v1305_v2  ;;  %v4099_v49 = vpop.eup %4098  ;;  %v1302_v60 = vadd.f32 1.0, %v4097_v6  ;;  %vm1356_vm15 = vmor %vm1354_vm14, %vm1355_vm13 }
 0xc57   :  { %v1301_v26 = vadd.f32 1.0, %v4099_v49  ;;  %v1351_v41 = vsub.f32 1.0, %v1350_v25 }
 0xc58   :  { %v1307_v4 = vmul.f32 %v4093_v63, %v1306_v11  ;;  %4100 = vrcp.f32 %v1302_v60  ;;  %vm1339_vm7 = vweird.f32 %v1302_v60  ;;  %v1345_v1 = vand.u32 2147483648, %v1302_v60 }
 0xc59   :  { %4102 = vrcp.f32 %v1301_v26  ;;  %v1352_v5 = vmul.f32 %v4095_v13, %v1351_v41  ;;  %v1330_v2 = vand.u32 2147483648, %v1301_v26  ;;  %v1343_v11 = vand.u32 2147483647, %v1302_v60 }
 0xc5a   :  { %v1308_v31 = vadd.f32 %v4093_v63, %v1307_v4  ;;  %vm1324_vm9 = vweird.f32 %v1301_v26  ;;  %v1346_v4 = vor.u32 1.1754944e-38, %v1345_v1 }
 0xc5b   :  { %v1353_v43 = vadd.f32 %v4095_v13, %v1352_v5  ;;  %v1331_v25 = vor.u32 1.1754944e-38, %v1330_v2 }
 0xc5c   :  { %v1312_v33 = vsel %vm1311_vm11, %v4093_v63, %v1308_v31  ;;  %vm1344_vm11 = vcmp.eq.f32.partialorder %v1343_v11, 8.507059e+37  ;;  %v1430_v11 = vrot.slane %v4908_v8, 7 }
 0xc5d   :  { %v4931_v38 = vsel %vm1314_vm12, %v1316_v3, %v1312_v33  ;;  %v1357_v47 = vsel %vm1356_vm15, %v4095_v13, %v1353_v43  ;;  %v1328_v13 = vand.u32 2147483647, %v1301_v26 }
 0xc5e   :  { %v4101_v35 = vpop.eup %4100  ;;  %v4935_v50 = vsel %vm1359_vm0, %v1361_v15, %v1357_v47  ;;  %v1429_v15 = vrot.slane %v4904_v22, 7 }
 0xc5f   :  { %v4103_v42 = vpop.eup %4102  ;;  %v1335_v45 = vmul.f32 %v4101_v35, %v1302_v60  ;;  %vm1340_vm5 = vweird.f32 %v4101_v35  ;;  %vm1329_vm12 = vcmp.eq.f32.partialorder %v1328_v13, 8.507059e+37 }
 0xc60   :  { %v1320_v46 = vmul.f32 %v4103_v42, %v1301_v26  ;;  %vm1325_vm6 = vweird.f32 %v4103_v42  ;;  %vm1341_vm8 = vmor %vm1339_vm7, %vm1340_vm5 }
 0xc61   :  { %v1336_v52 = vsub.f32 1.0, %v1335_v45  ;;  %vm1326_vm10 = vmor %vm1324_vm9, %vm1325_vm6 }
 0xc62   :  { %v1321_v53 = vsub.f32 1.0, %v1320_v46 }
 0xc63   :  { %v1337_v55 = vmul.f32 %v4101_v35, %v1336_v52  ;;  %v1404_v52 = vsub.f32 1.0, %v4931_v38 }
 0xc64   :  { %v1322_v58 = vmul.f32 %v4103_v42, %v1321_v53  ;;  %v1428_v53 = vrot.slane %v4906_v23, 7 }
 0xc65   :  { %v1338_v63 = vadd.f32 %v4101_v35, %v1337_v55 }
 0xc66   :  { %v1323_v56 = vadd.f32 %v4103_v42, %v1322_v58  ;;  %v1436_v1 = vmul.f32 %v1428_v53, %v4931_v38 }
 0xc67   :  { %v1342_v6 = vsel %vm1341_vm8, %v4101_v35, %v1338_v63 }
 0xc68   :  { %v1327_v49 = vsel %vm1326_vm10, %v4103_v42, %v1323_v56  ;;  %v1347_v41 = vsel %vm1344_vm11, %v1346_v4, %v1342_v6 }
 0xc69   :  { %v1332_v32 = vsel %vm1329_vm12, %v1331_v25, %v1327_v49  ;;  %v1406_v63 = vsub.f32 1.0, %v1347_v41  ;;  %v1438_v4 = vmul.f32 %v1430_v11, %v1347_v41 }
 0xc6a   :  { %v1405_v47 = vsub.f32 1.0, %v1332_v32  ;;  %v1437_v56 = vmul.f32 %v1429_v15, %v1332_v32 }
 0xc9b   :  { %v1365_v36 = vpop.permute.xlu2 %1364 }
 0xc9c   :  { %v1376_v34 = vmul.f32 %v1365_v36, %v4931_v38 }
 0xc9e   :  { %1384 = vrot.lane.b32.xlu0 %v1376_v34, %s4505_s27 }
 0xca3   :  { %v1371_v51 = vpop.permute.xlu2 %1370 }
 0xca4   :  { %v1379_v54 = vmul.f32 %v1371_v51, %v4935_v50 }
 0xca6   :  { %1390 = vrot.lane.b32.xlu0 %v1379_v54, %s4505_s27 }
 0xcb2   :  { %v1369_v31 = vpop.permute.xlu1 %1368  ;;  %v1367_v9 = vpop.permute.xlu0 %1366 }
 0xcb3   :  { %v1378_v33 = vmul.f32 %v1369_v31, %v1347_v41  ;;  %v1377_v5 = vmul.f32 %v1367_v9, %v1332_v32  ;;  %v1431_v32 = vrot.slane %v4914_v16, 7 }
 0xcb5   :  { %1386 = vrot.lane.b32.xlu1 %v1377_v5, %s4505_s27  ;;  %1388 = vrot.lane.b32.xlu2 %v1378_v33, %s4505_s27  ;;  %v1407_v33 = vsub.f32 1.0, %v4935_v50  ;;  %v1439_v5 = vmul.f32 %v1431_v32, %v4935_v50 }
 0xd0f   :  { %v1389_v60 = vpop.permute.xlu2 %1388 }
 0xd10   :  { %v1398_v26 = vadd.f32 %v1389_v60, %v4666_v28  ;;  %v1385_v3 = vpop.permute.xlu0 %1384 }
 0xd11   :  { %v1396_v35 = vadd.f32 %v1385_v3, %v4658_v20 }
 0xd12   :  { %4104 = vtanh.f32 %v1398_v26 }
 0xd13   :  { %4106 = vtanh.f32 %v1396_v35 }
 0xd18   :  { %v4105_v36 = vpop.eup %4104  ;;  %v1391_v42 = vpop.permute.xlu0 %1390 }
 0xd19   :  { %v4107_v34 = vpop.eup %4106  ;;  %v1399_v43 = vadd.f32 %v1391_v42, %v4664_v27  ;;  %1416 = vrot.lane.b32.xlu0 %v4105_v36, %s4506_s3 }
 0xd1a   :  { %1412 = vrot.lane.b32.xlu1 %v4107_v34, %s4506_s3 }
 0xd1b   :  { %4108 = vtanh.f32 %v1399_v43 }
 0xd21   :  { %v4109_v44 = vpop.eup %4108 }
 0xd22   :  { %1418 = vrot.lane.b32.xlu1 %v4109_v44, %s4506_s3 }
 0xd27   :  { %v1387_v12 = vpop.permute.xlu1 %1386 }
 0xd28   :  { %v1397_v45 = vadd.f32 %v1387_v12, %v4660_v21 }
 0xd2a   :  { %4110 = vtanh.f32 %v1397_v45 }
 0xd30   :  { %v4111_v46 = vpop.eup %4110 }
 0xd31   :  { %1414 = vrot.lane.b32.xlu2 %v4111_v46, %s4506_s3 }
 0xd8b   :  { %v1415_v51 = vpop.permute.xlu2 %1414  ;;  %v1417_v54 = vpop.permute.xlu0 %1416 }
 0xd8c   :  { %v1425_v55 = vmul.f32 %v1415_v51, %v1405_v47  ;;  %v1413_v58 = vpop.permute.xlu1 %1412  ;;  %v1426_v13 = vmul.f32 %v1417_v54, %v1406_v63 }
 0xd8d   :  { %v1424_v2 = vmul.f32 %v1413_v58, %v1404_v52 }
 0xd8e   :  { %v4954_v6 = vadd.f32 %v1437_v56, %v1425_v55  ;;  %v4958_v25 = vadd.f32 %v1438_v4, %v1426_v13 }
 0xd8f   :  { %v4956_v49 = vadd.f32 %v1436_v1, %v1424_v2 }
 0xd90   :  { %v1466_v31 = vrot.slane %v4954_v6, 4  ;;  %v1468_v26 = vrot.slane %v4958_v25, 3 }
 0xd91   :  { %v1465_v9 = vrot.slane %v4956_v49, 5 }
 0xd93   :  { %v1467_v41 = vsel %vm368_vm1, %v1466_v31, %v1465_v9 }
 0xd94   :  { %v1419_v38 = vpop.permute.xlu1 %1418  ;;  %v1469_v36 = vsel %vm371_vm2, %v1468_v26, %v1467_v41 }
 0xd95   :  { %v1427_v60 = vmul.f32 %v1419_v38, %v1407_v33 }
 0xd97   :  { %v4966_v3 = vadd.f32 %v1439_v5, %v1427_v60 }
 0xd99   :  { %v1470_v35 = vrot.slane %v4966_v3, 2 }
 0xd9b   :  { %v1471_v42 = vsel %vm374_vm3, %v1470_v35, %v1469_v36 }
 0xd9c   :  { %1472 = vrot.lane.b32.xlu2 %v1471_v42, %s4506_s3 }
 0xdf6   :  { %v1473_v34 = vpop.permute.xlu2 %1472 }
 0xdf7   :  { %3886 = vmatmul.msk.f32.vlgmr.msrb.gmra.mxu1 %vm162_vm4, %v1473_v34 }
 0xe74   :  { %v1493_v43 = vpop.f32.mrf.mxu1 }
 0xe75   :  { %v1494_v50 = vadd.f32 %v4873_v30, %v1493_v43 }
 0xe77   :  { %v1499_v44 = vrot.slane %v1494_v50, 4  ;;  %v1498_v12 = vrot.slane %v1494_v50, 3  ;;  %v1497_v45 = vrot.slane %v1494_v50, 2  ;;  %v1500_v46 = vrot.slane %v1494_v50, 5 }
 0xe79   :  { %1589 = vrot.lane.b32.xlu2 %v1499_v44, %s4505_s27  ;;  %1587 = vrot.lane.b32.xlu1 %v1498_v12, %s4505_s27  ;;  %v1507_v47 = vadd.f32 %v1499_v44, %v4666_v28  ;;  %v1506_v53 = vadd.f32 %v1498_v12, %v4660_v21  ;;  %v1505_v54 = vadd.f32 %v1497_v45, %v4658_v20 }
 0xe7a   :  { %1585 = vrot.lane.b32.xlu0 %v1497_v45, %s4505_s27  ;;  %v1508_v1 = vadd.f32 %v1500_v46, %v4664_v27 }
 0xe7b   :  { %v3889_v15 = vmul.f32 -1.442695, %v1507_v47  ;;  %v3888_v58 = vmul.f32 -1.442695, %v1506_v53  ;;  %v3887_v63 = vmul.f32 -1.442695, %v1505_v54 }
 0xe7c   :  { %v3890_v11 = vmul.f32 -1.442695, %v1508_v1 }
 0xe7d   :  { %4112 = vpow2.f32 %v3889_v15 }
 0xe82   :  { %1591 = vrot.lane.b32.xlu0 %v1500_v46, %s4505_s27 }
 0xe83   :  { %v4113_v51 = vpop.eup %4112 }
 0xe84   :  { %v1523_v52 = vadd.f32 1.0, %v4113_v51 }
 0xe86   :  { %4114 = vrcp.f32 %v1523_v52  ;;  %v1566_v38 = vand.u32 2147483648, %v1523_v52  ;;  %vm1560_vm14 = vweird.f32 %v1523_v52  ;;  %v1564_v5 = vand.u32 2147483647, %v1523_v52 }
 0xe87   :  { %4116 = vpow2.f32 %v3888_v58 }
 0xe88   :  { %4118 = vpow2.f32 %v3887_v63  ;;  %v1567_v41 = vor.u32 1.1754944e-38, %v1566_v38  ;;  %vm1565_vm0 = vcmp.eq.f32.partialorder %v1564_v5, 8.507059e+37 }
 0xe89   :  { %4120 = vpow2.f32 %v3890_v11 }
 0xe8c   :  { %v4115_v55 = vpop.eup %4114 }
 0xe8d   :  { %v1556_v56 = vmul.f32 %v4115_v55, %v1523_v52  ;;  %v4117_v13 = vpop.eup %4116  ;;  %vm1561_vm13 = vweird.f32 %v4115_v55 }
 0xe8e   :  { %v4119_v31 = vpop.eup %4118  ;;  %v1522_v9 = vadd.f32 1.0, %v4117_v13  ;;  %vm1562_vm15 = vmor %vm1560_vm14, %vm1561_vm13 }
 0xe8f   :  { %v1557_v2 = vsub.f32 1.0, %v1556_v56  ;;  %v1521_v33 = vadd.f32 1.0, %v4119_v31  ;;  %v4121_v26 = vpop.eup %4120 }
 0xe90   :  { %4122 = vrcp.f32 %v1522_v9  ;;  %v1524_v42 = vadd.f32 1.0, %v4121_v26  ;;  %v1551_v54 = vand.u32 2147483648, %v1522_v9  ;;  %vm1545_vm7 = vweird.f32 %v1522_v9 }
 0xe91   :  { %v1558_v4 = vmul.f32 %v4115_v55, %v1557_v2  ;;  %4124 = vrcp.f32 %v1521_v33  ;;  %v1549_v63 = vand.u32 2147483647, %v1522_v9  ;;  %v1536_v56 = vand.u32 2147483648, %v1521_v33 }
 0xe92   :  { %4126 = vrcp.f32 %v1524_v42  ;;  %vm1530_vm9 = vweird.f32 %v1521_v33  ;;  %v1534_v1 = vand.u32 2147483647, %v1521_v33  ;;  %v1552_v11 = vor.u32 1.1754944e-38, %v1551_v54 }
 0xe93   :  { %v1559_v32 = vadd.f32 %v4115_v55, %v1558_v4  ;;  %vm1550_vm11 = vcmp.eq.f32.partialorder %v1549_v63, 8.507059e+37  ;;  %v1537_v31 = vor.u32 1.1754944e-38, %v1536_v56  ;;  %vm1575_vm14 = vweird.f32 %v1524_v42 }
 0xe94   :  { %vm1535_vm12 = vcmp.eq.f32.partialorder %v1534_v1, 8.507059e+37  ;;  %v1650_v1 = vrot.slane %v4954_v6, 7 }
 0xe95   :  { %v1563_v60 = vsel %vm1562_vm15, %v4115_v55, %v1559_v32 }
 0xe96   :  { %v4983_v36 = vsel %vm1565_vm0, %v1567_v41, %v1563_v60  ;;  %v4123_v43 = vpop.eup %4122 }
 0xe97   :  { %v4125_v50 = vpop.eup %4124  ;;  %v1541_v44 = vmul.f32 %v4123_v43, %v1522_v9  ;;  %vm1546_vm5 = vweird.f32 %v4123_v43  ;;  %v1581_v9 = vand.u32 2147483648, %v1524_v42 }
 0xe98   :  { %v1526_v12 = vmul.f32 %v4125_v50, %v1521_v33  ;;  %v4127_v47 = vpop.eup %4126  ;;  %vm1531_vm6 = vweird.f32 %v4125_v50  ;;  %vm1547_vm8 = vmor %vm1545_vm7, %vm1546_vm5  ;;  %v1579_v33 = vand.u32 2147483647, %v1524_v42 }
 0xe99   :  { %v1542_v45 = vsub.f32 1.0, %v1541_v44  ;;  %v1571_v52 = vmul.f32 %v4127_v47, %v1524_v42  ;;  %vm1532_vm10 = vmor %vm1530_vm9, %vm1531_vm6  ;;  %vm1576_vm13 = vweird.f32 %v4127_v47 }
 0xe9a   :  { %v1527_v46 = vsub.f32 1.0, %v1526_v12  ;;  %vm1577_vm15 = vmor %vm1575_vm14, %vm1576_vm13  ;;  %vm1580_vm0 = vcmp.eq.f32.partialorder %v1579_v33, 8.507059e+37 }
 0xe9b   :  { %v1543_v15 = vmul.f32 %v4123_v43, %v1542_v45  ;;  %v1572_v58 = vsub.f32 1.0, %v1571_v52 }
 0xe9c   :  { %v1528_v51 = vmul.f32 %v4125_v50, %v1527_v46 }
 0xe9d   :  { %v1544_v53 = vadd.f32 %v4123_v43, %v1543_v15  ;;  %v1573_v4 = vmul.f32 %v4127_v47, %v1572_v58 }
 0xe9e   :  { %v1529_v55 = vadd.f32 %v4125_v50, %v1528_v51 }
 0xe9f   :  { %v1548_v2 = vsel %vm1547_vm8, %v4123_v43, %v1544_v53  ;;  %v1582_v43 = vor.u32 1.1754944e-38, %v1581_v9  ;;  %v1651_v9 = vrot.slane %v4958_v25, 7 }
 0xea0   :  { %v1533_v13 = vsel %vm1532_vm10, %v4125_v50, %v1529_v55  ;;  %v1553_v38 = vsel %vm1550_vm11, %v1552_v11, %v1548_v2 }
 0xea1   :  { %v1538_v26 = vsel %vm1535_vm12, %v1537_v31, %v1533_v13  ;;  %v1626_v56 = vsub.f32 1.0, %v1553_v38  ;;  %v1649_v13 = vrot.slane %v4956_v49, 7 }
 0xea2   :  { %v1625_v11 = vsub.f32 1.0, %v1538_v26 }
 0xed3   :  { %v1590_v35 = vpop.permute.xlu2 %1589 }
 0xed4   :  { %v1599_v34 = vmul.f32 %v1590_v35, %v4983_v36  ;;  %v1574_v35 = vadd.f32 %v4127_v47, %v1573_v4 }
 0xed6   :  { %1609 = vrot.lane.b32.xlu0 %v1599_v34, %s4505_s27  ;;  %v1578_v34 = vsel %vm1577_vm15, %v4127_v47, %v1574_v35 }
 0xed7   :  { %v1583_v50 = vsel %vm1580_vm0, %v1582_v43, %v1578_v34 }
 0xeeb   :  { %v1588_v32 = vpop.permute.xlu1 %1587 }
 0xeec   :  { %v1598_v5 = vmul.f32 %v1588_v32, %v1553_v38  ;;  %v1586_v60 = vpop.permute.xlu0 %1585  ;;  %v1627_v32 = vsub.f32 1.0, %v4983_v36 }
 0xeed   :  { %v1597_v41 = vmul.f32 %v1586_v60, %v1538_v26  ;;  %v1658_v60 = vmul.f32 %v1650_v1, %v1553_v38  ;;  %v1652_v38 = vrot.slane %v4966_v3, 7 }
 0xeee   :  { %1607 = vrot.lane.b32.xlu2 %v1598_v5, %s4505_s27 }
 0xeef   :  { %1605 = vrot.lane.b32.xlu1 %v1597_v41, %s4505_s27  ;;  %v1657_v41 = vmul.f32 %v1649_v13, %v1538_v26 }
 0xef4   :  { %v1592_v44 = vpop.permute.xlu0 %1591 }
 0xef5   :  { %v1600_v12 = vmul.f32 %v1592_v44, %v1583_v50  ;;  %v1659_v44 = vmul.f32 %v1651_v9, %v4983_v36 }
 0xef7   :  { %1611 = vrot.lane.b32.xlu1 %v1600_v12, %s4505_s27 }
 0xf48   :  { %v1608_v45 = vpop.permute.xlu2 %1607  ;;  %v1610_v46 = vpop.permute.xlu0 %1609 }
 0xf49   :  { %v1618_v15 = vadd.f32 %v1608_v45, %v4660_v21  ;;  %v1619_v51 = vadd.f32 %v1610_v46, %v4666_v28 }
 0xf4b   :  { %4128 = vtanh.f32 %v1618_v15  ;;  %v1628_v15 = vsub.f32 1.0, %v1583_v50 }
 0xf4c   :  { %4130 = vtanh.f32 %v1619_v51  ;;  %v1660_v51 = vmul.f32 %v1652_v38, %v1583_v50 }
 0xf51   :  { %v4129_v52 = vpop.eup %4128 }
 0xf52   :  { %v4131_v53 = vpop.eup %4130  ;;  %1635 = vrot.lane.b32.xlu0 %v4129_v52, %s4506_s3 }
 0xf53   :  { %1637 = vrot.lane.b32.xlu1 %v4131_v53, %s4506_s3 }
 0xf61   :  { %v1606_v42 = vpop.permute.xlu1 %1605 }
 0xf62   :  { %v1617_v47 = vadd.f32 %v1606_v42, %v4658_v20 }
 0xf64   :  { %4132 = vtanh.f32 %v1617_v47 }
 0xf69   :  { %v1612_v54 = vpop.permute.xlu1 %1611 }
 0xf6a   :  { %v4133_v55 = vpop.eup %4132  ;;  %v1620_v58 = vadd.f32 %v1612_v54, %v4664_v27 }
 0xf6b   :  { %1633 = vrot.lane.b32.xlu2 %v4133_v55, %s4506_s3 }
 0xf6c   :  { %4134 = vtanh.f32 %v1620_v58 }
 0xf72   :  { %v4135_v63 = vpop.eup %4134 }
 0xf73   :  { %1639 = vrot.lane.b32.xlu2 %v4135_v63, %s4506_s3 }
 0xfc4   :  { %v1636_v2 = vpop.permute.xlu0 %1635 }
 0xfc5   :  { %v1646_v4 = vmul.f32 %v1636_v2, %v1626_v56  ;;  %v1634_v31 = vpop.permute.xlu2 %1633  ;;  %v1638_v5 = vpop.permute.xlu1 %1637 }
 0xfc6   :  { %v1645_v35 = vmul.f32 %v1634_v31, %v1625_v11  ;;  %v1647_v33 = vmul.f32 %v1638_v5, %v1627_v32 }
 0xfc7   :  { %v5002_v34 = vadd.f32 %v1658_v60, %v1646_v4 }
 0xfc8   :  { %v5004_v43 = vadd.f32 %v1657_v41, %v1645_v35  ;;  %v5007_v12 = vadd.f32 %v1659_v44, %v1647_v33 }
 0xfc9   :  { %v1687_v45 = vrot.slane %v5002_v34, 5 }
 0xfca   :  { %v1686_v46 = vrot.slane %v5004_v43, 6  ;;  %v1689_v53 = vrot.slane %v5007_v12, 4 }
 0xfcc   :  { %v1688_v47 = vsel %vm368_vm1, %v1687_v45, %v1686_v46 }
 0xfcd   :  { %v1640_v26 = vpop.permute.xlu2 %1639  ;;  %v1690_v54 = vsel %vm371_vm2, %v1689_v53, %v1688_v47 }
 0xfce   :  { %v1648_v52 = vmul.f32 %v1640_v26, %v1628_v15 }
 0xfd0   :  { %v5013_v42 = vadd.f32 %v1660_v51, %v1648_v52 }
 0xfd2   :  { %v1691_v36 = vrot.slane %v5013_v42, 3 }
 0xfd4   :  { %v1692_v55 = vsel %vm374_vm3, %v1691_v36, %v1690_v54 }
 0xfd5   :  { %1693 = vrot.lane.b32.xlu0 %v1692_v55, %s4506_s3 }
0x1047   :  { %v1694_v58 = vpop.permute.xlu0 %1693 }
0x1048   :  { %3891 = vmatmul.msk.f32.vlgmr.msrb.gmra.mxu2 %vm162_vm4, %v1694_v58 }
0x10cb   :  { %v1714_v63 = vpop.f32.mrf.mxu2 }
0x10cc   :  { %v1715_v50 = vadd.f32 %v4873_v30, %v1714_v63 }
0x10ce   :  { %v1720_v56 = vrot.slane %v1715_v50, 3  ;;  %v1719_v1 = vrot.slane %v1715_v50, 2  ;;  %v1718_v2 = vrot.slane %v1715_v50, 1  ;;  %v1721_v11 = vrot.slane %v1715_v50, 4 }
0x10d0   :  { %1810 = vrot.lane.b32.xlu0 %v1720_v56, %s4505_s27  ;;  %1808 = vrot.lane.b32.xlu2 %v1719_v1, %s4505_s27  ;;  %v1727_v13 = vadd.f32 %v1719_v1, %v4660_v21  ;;  %v1728_v30 = vadd.f32 %v1720_v56, %v4666_v28  ;;  %v1726_v5 = vadd.f32 %v1718_v2, %v4658_v20 }
0x10d1   :  { %1806 = vrot.lane.b32.xlu1 %v1718_v2, %s4505_s27  ;;  %v1729_v33 = vadd.f32 %v1721_v11, %v4664_v27 }
0x10d2   :  { %v3893_v4 = vmul.f32 -1.442695, %v1727_v13  ;;  %v3894_v41 = vmul.f32 -1.442695, %v1728_v30  ;;  %v3892_v35 = vmul.f32 -1.442695, %v1726_v5 }
0x10d3   :  { %v3895_v45 = vmul.f32 -1.442695, %v1729_v33 }
0x10d4   :  { %4136 = vpow2.f32 %v3893_v4 }
0x10d9   :  { %1812 = vrot.lane.b32.xlu1 %v1721_v11, %s4505_s27 }
0x10da   :  { %v4137_v31 = vpop.eup %4136 }
0x10db   :  { %v1743_v32 = vadd.f32 1.0, %v4137_v31 }
0x10dd   :  { %4138 = vrcp.f32 %v1743_v32  ;;  %v1772_v53 = vand.u32 2147483648, %v1743_v32  ;;  %vm1766_vm6 = vweird.f32 %v1743_v32  ;;  %v1770_v47 = vand.u32 2147483647, %v1743_v32 }
0x10de   :  { %4140 = vpow2.f32 %v3894_v41 }
0x10df   :  { %4142 = vpow2.f32 %v3892_v35  ;;  %v1773_v55 = vor.u32 1.1754944e-38, %v1772_v53  ;;  %vm1771_vm8 = vcmp.eq.f32.partialorder %v1770_v47, 8.507059e+37 }
0x10e0   :  { %4144 = vpow2.f32 %v3895_v45 }
0x10e3   :  { %v4139_v60 = vpop.eup %4138 }
0x10e4   :  { %v1762_v9 = vmul.f32 %v4139_v60, %v1743_v32  ;;  %v4141_v46 = vpop.eup %4140  ;;  %vm1767_vm5 = vweird.f32 %v4139_v60 }
0x10e5   :  { %v4143_v38 = vpop.eup %4142  ;;  %v1744_v26 = vadd.f32 1.0, %v4141_v46  ;;  %vm1768_vm7 = vmor %vm1766_vm6, %vm1767_vm5 }
0x10e6   :  { %v1763_v44 = vsub.f32 1.0, %v1762_v9  ;;  %v1742_v51 = vadd.f32 1.0, %v4143_v38  ;;  %v4145_v54 = vpop.eup %4144 }
0x10e7   :  { %4146 = vrcp.f32 %v1744_v26  ;;  %v1745_v50 = vadd.f32 1.0, %v4145_v54  ;;  %v1787_v35 = vand.u32 2147483648, %v1744_v26  ;;  %vm1781_vm11 = vweird.f32 %v1744_v26 }
0x10e8   :  { %v1764_v15 = vmul.f32 %v4139_v60, %v1763_v44  ;;  %4148 = vrcp.f32 %v1742_v51  ;;  %v1785_v44 = vand.u32 2147483647, %v1744_v26  ;;  %v1757_v45 = vand.u32 2147483648, %v1742_v51 }
0x10e9   :  { %4150 = vrcp.f32 %v1745_v50  ;;  %vm1751_vm13 = vweird.f32 %v1742_v51  ;;  %v1755_v46 = vand.u32 2147483647, %v1742_v51  ;;  %vm1796_vm6 = vweird.f32 %v1745_v50 }
0x10ea   :  { %v1765_v52 = vadd.f32 %v4139_v60, %v1764_v15  ;;  %vm1786_vm15 = vcmp.eq.f32.partialorder %v1785_v44, 8.507059e+37  ;;  %v1758_v53 = vor.u32 1.1754944e-38, %v1757_v45 }
0x10eb   :  { %vm1756_vm0 = vcmp.eq.f32.partialorder %v1755_v46, 8.507059e+37 }
0x10ec   :  { %v1769_v36 = vsel %vm1768_vm7, %v4139_v60, %v1765_v52 }
0x10ed   :  { %v5030_v63 = vsel %vm1771_vm8, %v1773_v55, %v1769_v36  ;;  %v4147_v1 = vpop.eup %4146 }
0x10ee   :  { %v4149_v2 = vpop.eup %4148  ;;  %v1777_v11 = vmul.f32 %v4147_v1, %v1744_v26  ;;  %vm1782_vm9 = vweird.f32 %v4147_v1 }
0x10ef   :  { %v1747_v13 = vmul.f32 %v4149_v2, %v1742_v51  ;;  %v4151_v32 = vpop.eup %4150  ;;  %vm1752_vm10 = vweird.f32 %v4149_v2  ;;  %vm1783_vm12 = vmor %vm1781_vm11, %vm1782_vm9  ;;  %v1802_v51 = vand.u32 2147483648, %v1745_v50  ;;  %vm801_vm9 = vcmask 256002  }
0x10f0   :  { %v1778_v4 = vsub.f32 1.0, %v1777_v11  ;;  %v1792_v60 = vmul.f32 %v4151_v32, %v1745_v50  ;;  %vm1753_vm14 = vmor %vm1751_vm13, %vm1752_vm10  ;;  %vm1797_vm5 = vweird.f32 %v4151_v32  ;;  %vm1460_vm10 = vcmask 259077  }
0x10f1   :  { %v1748_v31 = vsub.f32 1.0, %v1747_v13  ;;  %vm1798_vm7 = vmor %vm1796_vm6, %vm1797_vm5  ;;  %vm583_vm11 = vcmask 254977   ;;  %vm5749_vm13 = vcmask 253952  }
0x10f2   :  { %v1779_v30 = vmul.f32 %v4147_v1, %v1778_v4  ;;  %v1793_v33 = vsub.f32 1.0, %v1792_v60 }
0x10f3   :  { %v1749_v5 = vmul.f32 %v4149_v2, %v1748_v31 }
0x10f4   :  { %v1780_v41 = vadd.f32 %v4147_v1, %v1779_v30  ;;  %v1794_v52 = vmul.f32 %v4151_v32, %v1793_v33 }
0x10f5   :  { %v1750_v9 = vadd.f32 %v4149_v2, %v1749_v5 }
0x10f6   :  { %v1784_v15 = vsel %vm1783_vm12, %v4147_v1, %v1780_v41  ;;  %vm5750_vm12 = vcmask 258052  }
0x10f7   :  { %v1754_v38 = vsel %vm1753_vm14, %v4149_v2, %v1750_v9  ;;  %v1803_v2 = vor.u32 1.1754944e-38, %v1802_v51  ;;  %vm5748_vm14 = vcmask 257027  }
0x10f8   :  { %v5041_v55 = vsel %vm1756_vm0, %v1758_v53, %v1754_v38  ;;  %v5128_v53 = vld [vmem:[#allocation9 + $0x10] sm:$0xff]  ;;  %vm5746_vm0 = vcmask 261127  }
0x112a   :  { %v1809_v58 = vpop.permute.xlu2 %1808 }
0x112b   :  { %v1819_v56 = vmul.f32 %v1809_v58, %v5030_v63  ;;  %v1795_v58 = vadd.f32 %v4151_v32, %v1794_v52 }
0x112d   :  { %1828 = vrot.lane.b32.xlu0 %v1819_v56, %s4505_s27  ;;  %v1800_v56 = vand.u32 2147483647, %v1745_v50  ;;  %v1799_v1 = vsel %vm1798_vm7, %v4151_v32, %v1795_v58 }
0x112f   :  { %vm1801_vm8 = vcmp.eq.f32.partialorder %v1800_v56, 8.507059e+37 }
0x1130   :  { %v5046_v11 = vsel %vm1801_vm8, %v1803_v2, %v1799_v1 }
0x1135   :  { %789 = vrot.lane.b32.xlu0 %v4800_v19, %s4506_s3  ;;  %v1788_v19 = vor.u32 1.1754944e-38, %v1787_v35  ;;  %v1870_v35 = vrot.slane %v5004_v43, 7 }
0x1137   :  { %v5038_v36 = vsel %vm1786_vm15, %v1788_v19, %v1784_v15  ;;  %vm5747_vm15 = vcmask 260102   ;;  %v1878_v46 = vmul.f32 %v1870_v35, %v5041_v55  ;;  %v5118_v15 = vld [vmem:[#allocation9 + $0x18] sm:$0xff] }
0x1138   :  { %1980 = vmatpush.msra.mxu1 %v5118_v15  ;;  %2190 = vmatpush.msra.mxu2 %v5118_v15 }
0x1139   :  { %2407 = vmatpush.msrb.mxu0 %v5118_v15 }
0x113a   :  { %1981 = vmatpush.msra.mxu1 %v5128_v53  ;;  %2191 = vmatpush.msra.mxu2 %v5128_v53 }
0x113b   :  { %2408 = vmatpush.msrb.mxu0 %v5128_v53 }
0x113d   :  { %1448 = vrot.lane.b32.xlu0 %v4956_v49, %s4506_s3 }
0x1142   :  { %v1811_v47 = vpop.permute.xlu0 %1810 }
0x1143   :  { %v1820_v54 = vmul.f32 %v1811_v47, %v5038_v36  ;;  %v1807_v49 = vpop.permute.xlu1 %1806  ;;  %v5132_v47 = vld [vmem:[#allocation9 + $0x8] sm:$0xff] }
0x1144   :  { %v1818_v26 = vmul.f32 %v1807_v49, %v5041_v55  ;;  %1982 = vmatpush.msra.mxu1 %v5132_v47  ;;  %2192 = vmatpush.msra.mxu2 %v5132_v47 }
0x1145   :  { %1830 = vrot.lane.b32.xlu1 %v1820_v54, %s4505_s27  ;;  %2409 = vmatpush.msrb.mxu0 %v5132_v47 }
0x1146   :  { %1826 = vrot.lane.b32.xlu2 %v1818_v26, %s4505_s27 }
0x114b   :  { %v1813_v13 = vpop.permute.xlu1 %1812 }
0x114c   :  { %v1821_v4 = vmul.f32 %v1813_v13, %v5046_v11 }
0x114d   :  { %350 = vrot.lane.b32.xlu1 %v4701_v7, %s4506_s3 }
0x114e   :  { %1832 = vrot.lane.b32.xlu2 %v1821_v4, %s4505_s27  ;;  %v1914_v4 = vld [vmem:[#allocation8 + $0x18] sm:$0xff] }
0x114f   :  { %1951 = vmatpush.msrb.mxu3 %v1914_v4 }
0x1155   :  { %1007 = vrot.lane.b32.xlu1 %v4853_v39, %s4506_s3 }
0x1156   :  { %571 = vrot.lane.b32.xlu2 %v4744_v57, %s4506_s3 }
0x115d   :  { %1669 = vrot.lane.b32.xlu1 %v5004_v43, %s4506_s3 }
0x115e   :  { %1227 = vrot.lane.b32.xlu2 %v4906_v23, %s4506_s3 }
0x1166   :  { %791 = vrot.lane.b32.xlu2 %v4798_v18, %s4506_s3 }
0x116e   :  { %1450 = vrot.lane.b32.xlu2 %v4954_v6, %s4506_s3 }
0x119f   :  { %v1829_v7 = vpop.permute.xlu0 %1828 }
0x11a0   :  { %v1839_v50 = vadd.f32 %v1829_v7, %v4660_v21  ;;  %v1827_v31 = vpop.permute.xlu2 %1826  ;;  %v1913_v7 = vld [vmem:[#allocation8 + $0x10] sm:$0xff] }
0x11a1   :  { %v1838_v39 = vadd.f32 %v1827_v31, %v4658_v20  ;;  %1952 = vmatpush.msrb.mxu3 %v1913_v7  ;;  %v1911_v31 = vld [vmem:[#allocation8] sm:$0xff] }
0x11a2   :  { %4152 = vtanh.f32 %v1839_v50  ;;  %v1912_v50 = vld [vmem:[#allocation8 + $0x8] sm:$0xff] }
0x11a3   :  { %4154 = vtanh.f32 %v1838_v39  ;;  %1953 = vmatpush.msrb.mxu3 %v1912_v50 }
0x11a5   :  { %1954 = vmatpush.msrb.mxu3 %v1911_v31 }
0x11a7   :  { %v790_v57 = vpop.permute.xlu0 %789 }
0x11a8   :  { %v4153_v32 = vpop.eup %4152  ;;  %802 = vst.msk [vmem:[#allocation2] sm:$0x4] %vm801_vm9, %v790_v57  ;;  %v1833_v23 = vpop.permute.xlu2 %1832 }
0x11a9   :  { %v4155_v30 = vpop.eup %4154  ;;  %1856 = vrot.lane.b32.xlu1 %v4153_v32, %s4506_s3  ;;  %v1841_v20 = vadd.f32 %v1833_v23, %v4664_v27 }
0x11aa   :  { %1854 = vrot.lane.b32.xlu0 %v4155_v30, %s4506_s3 }
0x11af   :  { %v1449_v18 = vpop.permute.xlu0 %1448 }
0x11b0   :  { %1461 = vst.msk [vmem:[#allocation2] sm:$0x20] %vm1460_vm10, %v1449_v18  ;;  %v572_v21 = vpop.permute.xlu2 %571 }
0x11b1   :  { %584 = vst.msk [vmem:[#allocation2] sm:$0x2] %vm583_vm11, %v572_v21  ;;  %573 = vrot.lane.b32.xlu1 %v4753_v14, %s4506_s3 }
0x11b2   :  { %352 = vrot.lane.b32.xlu0 %v4692_v59, %s4506_s3 }
0x11b7   :  { %v1831_v6 = vpop.permute.xlu1 %1830 }
0x11b8   :  { %v1840_v5 = vadd.f32 %v1831_v6, %v4666_v28  ;;  %v1228_v60 = vpop.permute.xlu2 %1227 }
0x11b9   :  { %1240 = vst.msk [vmem:[#allocation2] sm:$0x10] %vm5750_vm12, %v1228_v60  ;;  %1229 = vrot.lane.b32.xlu1 %v4904_v22, %s4506_s3  ;;  %v1871_v22 = vrot.slane %v5002_v34, 7 }
0x11ba   :  { %4156 = vtanh.f32 %v1840_v5  ;;  %1009 = vrot.lane.b32.xlu0 %v4850_v37, %s4506_s3 }
0x11bb   :  { %4158 = vtanh.f32 %v1841_v20  ;;  %v1879_v33 = vmul.f32 %v1871_v22, %v5030_v63  ;;  %v3966_v22 = vld [vmem:[%s5741_s7] ss:$0 sm:$0xff] }
0x11bf   :  { %v351_v14 = vpop.permute.xlu1 %350 }
0x11c0   :  { %v4157_v59 = vpop.eup %4156  ;;  %363 = vst.msk [vmem:[#allocation2] sm:$0x1] %vm5749_vm13, %v351_v14  ;;  %v792_v27 = vpop.permute.xlu2 %791 }
0x11c1   :  { %v4159_v41 = vpop.eup %4158  ;;  %803 = vst.msk [vmem:[#allocation2 + $0x8] sm:$0x4] %vm801_vm9, %v792_v27  ;;  %793 = vrot.lane.b32.xlu1 %v4811_v29, %s4506_s3  ;;  %1858 = vrot.lane.b32.xlu2 %v4157_v59, %s4506_s3  ;;  %v5201_v59 = vld [vmem:[%s5742_s8] ss:$0 sm:$0xff] }
0x11c2   :  { %1860 = vrot.lane.b32.xlu0 %v4159_v41, %s4506_s3 }
0x11c7   :  { %v1008_v28 = vpop.permute.xlu1 %1007 }
0x11c8   :  { %1020 = vst.msk [vmem:[#allocation2] sm:$0x8] %vm5748_vm14, %v1008_v28  ;;  %v1451_v37 = vpop.permute.xlu2 %1450 }
0x11c9   :  { %1462 = vst.msk [vmem:[#allocation2 + $0x8] sm:$0x20] %vm1460_vm10, %v1451_v37  ;;  %1452 = vrot.lane.b32.xlu1 %v4958_v25, %s4506_s3  ;;  %354 = vrot.lane.b32.xlu2 %v4695_v62, %s4506_s3  ;;  %v1847_v62 = vsub.f32 1.0, %v5030_v63 }
0x11ca   :  { %1671 = vrot.lane.b32.xlu0 %v5002_v34, %s4506_s3 }
0x11cf   :  { %v1670_v29 = vpop.permute.xlu1 %1669 }
0x11d0   :  { %1682 = vst.msk [vmem:[#allocation2] sm:$0x40] %vm5747_vm15, %v1670_v29 }
0x11d1   :  { %356 = vrot.lane.b32.xlu1 %v4697_v0, %s4506_s3  ;;  %1011 = vrot.lane.b32.xlu2 %v4855_v40, %s4506_s3  ;;  %v1848_v0 = vsub.f32 1.0, %v5038_v36  ;;  %v1872_v40 = vrot.slane %v5007_v12, 7 }
0x11d2   :  { %575 = vrot.lane.b32.xlu0 %v4747_v61, %s4506_s3  ;;  %v1846_v61 = vsub.f32 1.0, %v5041_v55 }
0x11d9   :  { %1673 = vrot.lane.b32.xlu2 %v5007_v12, %s4506_s3 }
0x11da   :  { %1231 = vrot.lane.b32.xlu0 %v4908_v8, %s4506_s3 }
0x11e2   :  { %795 = vrot.lane.b32.xlu0 %v4806_v24, %s4506_s3  ;;  %v1880_v24 = vmul.f32 %v1872_v40, %v5038_v36  ;;  %v5140_v36 = vld [vmem:[#allocation9] sm:$0xff] }
0x11e3   :  { %1983 = vmatpush.msra.mxu1 %v5140_v36  ;;  %2193 = vmatpush.msra.mxu2 %v5140_v36 }
0x11e4   :  { %1984 = vmatmul.f32.vlgmr.msra.gmra.mxu1 %v4504_v10  ;;  %2410 = vmatpush.msrb.mxu0 %v5140_v36 }
0x11e5   :  { %2624 = vmatpush.msrb.mxu1 %v5118_v15  ;;  %2841 = vmatpush.msrb.mxu2 %v5118_v15 }
0x11e6   :  { %3061 = vmatpush.msra.mxu0 %v5118_v15 }
0x11e7   :  { %2625 = vmatpush.msrb.mxu1 %v5128_v53  ;;  %2842 = vmatpush.msrb.mxu2 %v5128_v53 }
0x11e8   :  { %3062 = vmatpush.msra.mxu0 %v5128_v53 }
0x11e9   :  { %2626 = vmatpush.msrb.mxu1 %v5132_v47  ;;  %2843 = vmatpush.msrb.mxu2 %v5132_v47 }
0x11ea   :  { %3063 = vmatpush.msra.mxu0 %v5132_v47 }
0x11eb   :  { %2627 = vmatpush.msrb.mxu1 %v5140_v36  ;;  %2844 = vmatpush.msrb.mxu2 %v5140_v36 }
0x11ec   :  { %3064 = vmatpush.msra.mxu0 %v5140_v36 }
0x11ed   :  { %3281 = vmatpush.msra.mxu1 %v5118_v15 }
0x11ef   :  { %3282 = vmatpush.msra.mxu1 %v5128_v53 }
0x11f1   :  { %3283 = vmatpush.msra.mxu1 %v5132_v47 }
0x11f3   :  { %3284 = vmatpush.msra.mxu1 %v5140_v36 }
0x121b   :  { %v1857_v25 = vpop.permute.xlu1 %1856  ;;  %v1859_v9 = vpop.permute.xlu2 %1858 }
0x121c   :  { %v1867_v8 = vmul.f32 %v1857_v25, %v1847_v62  ;;  %v1855_v44 = vpop.permute.xlu0 %1854  ;;  %v1868_v45 = vmul.f32 %v1859_v9, %v1848_v0 }
0x121d   :  { %v1866_v34 = vmul.f32 %v1855_v44, %v1846_v61 }
0x121e   :  { %v1883_v19 = vadd.f32 %v1879_v33, %v1867_v8  ;;  %v1884_v12 = vadd.f32 %v1880_v24, %v1868_v45 }
0x121f   :  { %v1882_v43 = vadd.f32 %v1878_v46, %v1866_v34 }
0x1220   :  { %1892 = vrot.lane.b32.xlu1 %v1883_v19, %s4506_s3  ;;  %1894 = vrot.lane.b32.xlu0 %v1884_v12, %s4506_s3 }
0x1221   :  { %1890 = vrot.lane.b32.xlu2 %v1882_v43, %s4506_s3 }
0x1223   :  { %v574_v63 = vpop.permute.xlu1 %573  ;;  %v355_v38 = vpop.permute.xlu2 %354 }
0x1224   :  { %585 = vst.msk [vmem:[#allocation2 + $0x8] sm:$0x2] %vm583_vm11, %v574_v63  ;;  %v353_v52 = vpop.permute.xlu0 %352 }
0x1225   :  { %364 = vst.msk [vmem:[#allocation2 + $0x8] sm:$0x1] %vm5749_vm13, %v353_v52 }
0x1226   :  { %365 = vst.msk [vmem:[#allocation2 + $0x10] sm:$0x1] %vm5749_vm13, %v355_v38 }
0x1228   :  { %1013 = vrot.lane.b32.xlu1 %v4863_v48, %s4506_s3  ;;  %1454 = vrot.lane.b32.xlu0 %v4966_v3, %s4506_s3  ;;  %v1873_v3 = vrot.slane %v5013_v42, 7 }
0x1229   :  { %577 = vrot.lane.b32.xlu2 %v4756_v17, %s4506_s3  ;;  %v1849_v17 = vsub.f32 1.0, %v5046_v11 }
0x122b   :  { %v1230_v54 = vpop.permute.xlu1 %1229  ;;  %v1012_v49 = vpop.permute.xlu2 %1011 }
0x122c   :  { %1241 = vst.msk [vmem:[#allocation2 + $0x8] sm:$0x10] %vm5750_vm12, %v1230_v54  ;;  %v1010_v48 = vpop.permute.xlu0 %1009 }
0x122d   :  { %1021 = vst.msk [vmem:[#allocation2 + $0x8] sm:$0x8] %vm5748_vm14, %v1010_v48 }
0x122e   :  { %1022 = vst.msk [vmem:[#allocation2 + $0x10] sm:$0x8] %vm5748_vm14, %v1012_v49 }
0x1230   :  { %1675 = vrot.lane.b32.xlu1 %v5013_v42, %s4506_s3 }
0x1231   :  { %1233 = vrot.lane.b32.xlu2 %v4914_v16, %s4506_s3  ;;  %v1881_v16 = vmul.f32 %v1873_v3, %v5046_v11 }
0x1233   :  { %v794_v10 = vpop.permute.xlu1 %793  ;;  %v1674_v55 = vpop.permute.xlu2 %1673 }
0x1234   :  { %804 = vst.msk [vmem:[#allocation2 + $0x10] sm:$0x4] %vm801_vm9, %v794_v10  ;;  %v1861_v26 = vpop.permute.xlu0 %1860 }
0x1235   :  { %v1869_v58 = vmul.f32 %v1861_v26, %v1849_v17  ;;  %1684 = vst.msk [vmem:[#allocation2 + $0x10] sm:$0x40] %vm5747_vm15, %v1674_v55 }
0x1237   :  { %v1885_v42 = vadd.f32 %v1881_v16, %v1869_v58 }
0x1239   :  { %1896 = vrot.lane.b32.xlu2 %v1885_v42, %s4506_s3 }
0x123b   :  { %v1453_v51 = vpop.permute.xlu1 %1452 }
0x123c   :  { %1463 = vst.msk [vmem:[#allocation2 + $0x10] sm:$0x20] %vm1460_vm10, %v1453_v51  ;;  %v1672_v56 = vpop.permute.xlu0 %1671 }
0x123d   :  { %1683 = vst.msk [vmem:[#allocation2 + $0x8] sm:$0x40] %vm5747_vm15, %v1672_v56 }
0x1243   :  { %v357_v1 = vpop.permute.xlu1 %356 }
0x1244   :  { %366 = vst.msk [vmem:[#allocation2 + $0x18] sm:$0x1] %vm5749_vm13, %v357_v1  ;;  %v576_v2 = vpop.permute.xlu0 %575 }
0x1245   :  { %586 = vst.msk [vmem:[#allocation2 + $0x10] sm:$0x2] %vm583_vm11, %v576_v2 }
0x124c   :  { %v1232_v11 = vpop.permute.xlu0 %1231 }
0x124d   :  { %1242 = vst.msk [vmem:[#allocation2 + $0x10] sm:$0x10] %vm5750_vm12, %v1232_v11 }
0x1254   :  { %v796_v13 = vpop.permute.xlu0 %795 }
0x1255   :  { %805 = vst.msk [vmem:[#allocation2 + $0x18] sm:$0x4] %vm801_vm9, %v796_v13 }
0x1261   :  { %v1985_v27 = vpop.f32.mrf.mxu1 }
0x1262   :  { %v1986_v28 = vadd.f32 %v5201_v59, %v1985_v27 }
0x1264   :  { %2076 = vrot.lane.b32.xlu2 %v1986_v28, %s4505_s27  ;;  %v1989_v37 = vrot.slane %v1986_v28, 1  ;;  %v1990_v29 = vrot.slane %v1986_v28, 2  ;;  %v1991_v62 = vrot.slane %v1986_v28, 3 }
0x1266   :  { %2078 = vrot.lane.b32.xlu0 %v1989_v37, %s4505_s27  ;;  %2080 = vrot.lane.b32.xlu1 %v1990_v29, %s4505_s27 }
0x126e   :  { %2082 = vrot.lane.b32.xlu0 %v1991_v62, %s4505_s27 }
0x127b   :  { %v1891_v39 = vpop.permute.xlu2 %1890 }
0x127c   :  { %1903 = vst.msk [vmem:[#allocation2] sm:$0x80] %vm5746_vm0, %v1891_v39 }
0x1283   :  { %v578_v57 = vpop.permute.xlu2 %577  ;;  %v1907_v32 = vld [vmem:[#allocation2] sm:$0xff] }
0x1284   :  { %587 = vst.msk [vmem:[#allocation2 + $0x18] sm:$0x2] %vm583_vm11, %v578_v57  ;;  %3896 = vmatmul.msk.f32.vlgmr.msrb.gmra.mxu3 %vm162_vm4, %v1907_v32 }
0x128b   :  { %v1234_v23 = vpop.permute.xlu2 %1233 }
0x128c   :  { %1243 = vst.msk [vmem:[#allocation2 + $0x18] sm:$0x10] %vm5750_vm12, %v1234_v23 }
0x1292   :  { %v1893_v30 = vpop.permute.xlu1 %1892  ;;  %v1895_v18 = vpop.permute.xlu0 %1894 }
0x1293   :  { %1904 = vst.msk [vmem:[#allocation2 + $0x8] sm:$0x80] %vm5746_vm0, %v1893_v30  ;;  %v1897_v21 = vpop.permute.xlu2 %1896 }
0x1294   :  { %1905 = vst.msk [vmem:[#allocation2 + $0x10] sm:$0x80] %vm5746_vm0, %v1895_v18 }
0x1295   :  { %1906 = vst.msk [vmem:[#allocation2 + $0x18] sm:$0x80] %vm5746_vm0, %v1897_v21 }
0x129a   :  { %v1014_v20 = vpop.permute.xlu1 %1013  ;;  %v1455_v6 = vpop.permute.xlu0 %1454  ;;  %v1908_v5 = vld [vmem:[#allocation2 + $0x8] sm:$0xff] }
0x129b   :  { %1023 = vst.msk [vmem:[#allocation2 + $0x18] sm:$0x8] %vm5748_vm14, %v1014_v20  ;;  %3897 = vmatmul.msk.f32.gmra.mxu3 %vm162_vm4, %v1908_v5  ;;  %v1909_v14 = vld [vmem:[#allocation2 + $0x10] sm:$0xff] }
0x129c   :  { %1464 = vst.msk [vmem:[#allocation2 + $0x18] sm:$0x20] %vm1460_vm10, %v1455_v6 }
0x12a2   :  { %v1676_v60 = vpop.permute.xlu1 %1675 }
0x12a3   :  { %1685 = vst.msk [vmem:[#allocation2 + $0x18] sm:$0x40] %vm5747_vm15, %v1676_v60  ;;  %3898 = vmatmul.msk.f32.gmra.mxu3 %vm162_vm4, %v1909_v14 }
0x12aa   :  { %v1910_v41 = vld [vmem:[#allocation2 + $0x18] sm:$0xff] }
0x12ab   :  { %3899 = vmatmul.msk.f32.gmra.mxu3 %vm162_vm4, %v1910_v41 }
0x12be   :  { %v2077_v52 = vpop.permute.xlu2 %2076 }
0x12d8   :  { %v2079_v23 = vpop.permute.xlu0 %2078 }
0x1307   :  { %v1956_v0 = vpop.f32.mrf.mxu3 }
0x1308   :  { %v5212_v40 = vadd.f32 %v3966_v22, %v1956_v0 }
0x130a   :  { %v1996_v25 = vadd.f32 %v1986_v28, %v5212_v40 }
0x130c   :  { %v3900_v61 = vmul.f32 -1.442695, %v1996_v25 }
0x130e   :  { %4160 = vpow2.f32 %v3900_v61 }
0x1314   :  { %v4161_v35 = vpop.eup %4160 }
0x1315   :  { %v2012_v9 = vadd.f32 1.0, %v4161_v35 }
0x1317   :  { %4162 = vrcp.f32 %v2012_v9  ;;  %v2027_v46 = vand.u32 2147483648, %v2012_v9  ;;  %v2025_v12 = vand.u32 2147483647, %v2012_v9  ;;  %vm2021_vm6 = vweird.f32 %v2012_v9 }
0x1319   :  { %v2028_v38 = vor.u32 1.1754944e-38, %v2027_v46  ;;  %vm2026_vm8 = vcmp.eq.f32.partialorder %v2025_v12, 8.507059e+37 }
0x131d   :  { %v4163_v33 = vpop.eup %4162 }
0x131e   :  { %v1959_v8 = vpop.f32.mrf.mxu3  ;;  %v2017_v44 = vmul.f32 %v4163_v33, %v2012_v9  ;;  %vm2022_vm5 = vweird.f32 %v4163_v33 }
0x131f   :  { %v5215_v24 = vadd.f32 %v3966_v22, %v1959_v8  ;;  %vm2023_vm7 = vmor %vm2021_vm6, %vm2022_vm5 }
0x1320   :  { %v2018_v45 = vsub.f32 1.0, %v2017_v44 }
0x1321   :  { %v1997_v34 = vadd.f32 %v1989_v37, %v5215_v24 }
0x1322   :  { %v2019_v19 = vmul.f32 %v4163_v33, %v2018_v45 }
0x1323   :  { %v3901_v43 = vmul.f32 -1.442695, %v1997_v34  ;;  %v2083_v34 = vpop.permute.xlu0 %2082 }
0x1324   :  { %v2020_v63 = vadd.f32 %v4163_v33, %v2019_v19 }
0x1325   :  { %4164 = vpow2.f32 %v3901_v43 }
0x1326   :  { %v1962_v54 = vpop.f32.mrf.mxu3  ;;  %v2024_v49 = vsel %vm2023_vm7, %v4163_v33, %v2020_v63 }
0x1327   :  { %v5218_v48 = vadd.f32 %v3966_v22, %v1962_v54  ;;  %v5220_v10 = vsel %vm2026_vm8, %v2028_v38, %v2024_v49 }
0x1328   :  { %v2088_v17 = vmul.f32 %v2077_v52, %v5220_v10 }
0x1329   :  { %v1998_v3 = vadd.f32 %v1990_v29, %v5218_v48  ;;  %v2081_v29 = vpop.permute.xlu1 %2080 }
0x132a   :  { %2096 = vrot.lane.b32.xlu0 %v2088_v17, %s4505_s27 }
0x132b   :  { %v4165_v55 = vpop.eup %4164  ;;  %v3902_v26 = vmul.f32 -1.442695, %v1998_v3 }
0x132c   :  { %v2013_v16 = vadd.f32 1.0, %v4165_v55 }
0x132d   :  { %4166 = vpow2.f32 %v3902_v26 }
0x132e   :  { %v1965_v58 = vpop.f32.mrf.mxu3  ;;  %4168 = vrcp.f32 %v2013_v16  ;;  %v2042_v7 = vand.u32 2147483648, %v2013_v16  ;;  %v2040_v31 = vand.u32 2147483647, %v2013_v16  ;;  %vm2036_vm6 = vweird.f32 %v2013_v16 }
0x132f   :  { %v5225_v42 = vadd.f32 %v3966_v22, %v1965_v58 }
0x1330   :  { %v2043_v30 = vor.u32 1.1754944e-38, %v2042_v7  ;;  %vm2041_vm8 = vcmp.eq.f32.partialorder %v2040_v31, 8.507059e+37  ;;  %v2116_v31 = vsub.f32 1.0, %v5220_v10 }
0x1331   :  { %v1999_v51 = vadd.f32 %v1991_v62, %v5225_v42 }
0x1333   :  { %v4167_v56 = vpop.eup %4166  ;;  %v3903_v1 = vmul.f32 -1.442695, %v1999_v51 }
0x1334   :  { %v4169_v2 = vpop.eup %4168  ;;  %v2014_v11 = vadd.f32 1.0, %v4167_v56 }
0x1335   :  { %v2032_v13 = vmul.f32 %v4169_v2, %v2013_v16  ;;  %4170 = vpow2.f32 %v3903_v1  ;;  %vm2037_vm5 = vweird.f32 %v4169_v2 }
0x1336   :  { %4172 = vrcp.f32 %v2014_v11  ;;  %vm2038_vm7 = vmor %vm2036_vm6, %vm2037_vm5  ;;  %v2057_v14 = vand.u32 2147483648, %v2014_v11  ;;  %v2055_v41 = vand.u32 2147483647, %v2014_v11  ;;  %vm2051_vm15 = vweird.f32 %v2014_v11 }
0x1337   :  { %v2033_v4 = vsub.f32 1.0, %v2032_v13 }
0x1338   :  { %v2058_v62 = vor.u32 1.1754944e-38, %v2057_v14  ;;  %vm2056_vm6 = vcmp.eq.f32.partialorder %v2055_v41, 8.507059e+37 }
0x1339   :  { %v2034_v50 = vmul.f32 %v4169_v2, %v2033_v4 }
0x133b   :  { %v4171_v39 = vpop.eup %4170  ;;  %v2035_v57 = vadd.f32 %v4169_v2, %v2034_v50 }
0x133c   :  { %v4173_v32 = vpop.eup %4172  ;;  %v2015_v18 = vadd.f32 1.0, %v4171_v39 }
0x133d   :  { %v2039_v21 = vsel %vm2038_vm7, %v4169_v2, %v2035_v57  ;;  %v2047_v20 = vmul.f32 %v4173_v32, %v2014_v11  ;;  %vm2052_vm0 = vweird.f32 %v4173_v32 }
0x133e   :  { %v2044_v6 = vsel %vm2041_vm8, %v2043_v30, %v2039_v21  ;;  %4174 = vrcp.f32 %v2015_v18  ;;  %vm2053_vm5 = vmor %vm2051_vm15, %vm2052_vm0  ;;  %v2072_v9 = vand.u32 2147483648, %v2015_v18  ;;  %v2070_v8 = vand.u32 2147483647, %v2015_v18 }
0x133f   :  { %v2089_v5 = vmul.f32 %v2079_v23, %v2044_v6  ;;  %v2048_v60 = vsub.f32 1.0, %v2047_v20  ;;  %vm2066_vm8 = vweird.f32 %v2015_v18  ;;  %v2117_v56 = vsub.f32 1.0, %v2044_v6 }
0x1340   :  { %v2073_v45 = vor.u32 1.1754944e-38, %v2072_v9  ;;  %vm2071_vm13 = vcmp.eq.f32.partialorder %v2070_v8, 8.507059e+37  ;;  %v2141_v4 = vmul.f32 0.0, %v2044_v6 }
0x1341   :  { %2098 = vrot.lane.b32.xlu1 %v2089_v5, %s4505_s27  ;;  %v2049_v27 = vmul.f32 %v4173_v32, %v2048_v60 }
0x1343   :  { %v2050_v28 = vadd.f32 %v4173_v32, %v2049_v27 }
0x1344   :  { %v4175_v37 = vpop.eup %4174 }
0x1345   :  { %v2054_v22 = vsel %vm2053_vm5, %v4173_v32, %v2050_v28  ;;  %v2062_v0 = vmul.f32 %v4175_v37, %v2015_v18  ;;  %vm2067_vm7 = vweird.f32 %v4175_v37  ;;  %v2140_v18 = vmul.f32 0.0, %v5220_v10 }
0x1346   :  { %v2059_v25 = vsel %vm2056_vm6, %v2058_v62, %v2054_v22  ;;  %vm2068_vm14 = vmor %vm2066_vm8, %vm2067_vm7 }
0x1347   :  { %v2090_v61 = vmul.f32 %v2081_v29, %v2059_v25  ;;  %v2063_v35 = vsub.f32 1.0, %v2062_v0  ;;  %v2118_v1 = vsub.f32 1.0, %v2059_v25  ;;  %v2142_v50 = vmul.f32 0.0, %v2059_v25 }
0x1349   :  { %v2064_v33 = vmul.f32 %v4175_v37, %v2063_v35  ;;  %2100 = vrot.lane.b32.xlu2 %v2090_v61, %s4505_s27 }
0x134b   :  { %v2065_v44 = vadd.f32 %v4175_v37, %v2064_v33 }
0x134d   :  { %v2069_v46 = vsel %vm2068_vm14, %v4175_v37, %v2065_v44 }
0x134e   :  { %v2074_v19 = vsel %vm2071_vm13, %v2073_v45, %v2069_v46 }
0x134f   :  { %v2091_v12 = vmul.f32 %v2083_v34, %v2074_v19  ;;  %v2119_v23 = vsub.f32 1.0, %v2074_v19  ;;  %v2143_v20 = vmul.f32 0.0, %v2074_v19 }
0x1351   :  { %2102 = vrot.lane.b32.xlu1 %v2091_v12, %s4505_s27 }
0x139c   :  { %v2097_v43 = vpop.permute.xlu0 %2096 }
0x139d   :  { %v2108_v63 = vadd.f32 %v2097_v43, %v5212_v40 }
0x139f   :  { %4176 = vtanh.f32 %v2108_v63 }
0x13a3   :  { %v2101_v38 = vpop.permute.xlu2 %2100 }
0x13a4   :  { %v2110_v52 = vadd.f32 %v2101_v38, %v5218_v48 }
0x13a5   :  { %v4177_v54 = vpop.eup %4176 }
0x13a6   :  { %4178 = vtanh.f32 %v2110_v52  ;;  %2124 = vrot.lane.b32.xlu1 %v4177_v54, %s4506_s3 }
0x13ac   :  { %v4179_v49 = vpop.eup %4178 }
0x13ad   :  { %2128 = vrot.lane.b32.xlu0 %v4179_v49, %s4506_s3 }
0x13b3   :  { %v2099_v17 = vpop.permute.xlu1 %2098 }
0x13b4   :  { %v2109_v3 = vadd.f32 %v2099_v17, %v5215_v24 }
0x13b6   :  { %4180 = vtanh.f32 %v2109_v3 }
0x13bc   :  { %v4181_v55 = vpop.eup %4180 }
0x13bd   :  { %2126 = vrot.lane.b32.xlu2 %v4181_v55, %s4506_s3 }
0x13c3   :  { %v2103_v26 = vpop.permute.xlu1 %2102 }
0x13c4   :  { %v2111_v16 = vadd.f32 %v2103_v26, %v5225_v42 }
0x13c6   :  { %4182 = vtanh.f32 %v2111_v16 }
0x13cc   :  { %v4183_v58 = vpop.eup %4182 }
0x13cd   :  { %2130 = vrot.lane.b32.xlu2 %v4183_v58, %s4506_s3 }
0x1417   :  { %v2127_v51 = vpop.permute.xlu2 %2126 }
0x1418   :  { %v2137_v11 = vmul.f32 %v2127_v51, %v2117_v56  ;;  %v2125_v7 = vpop.permute.xlu1 %2124 }
0x1419   :  { %v2136_v32 = vmul.f32 %v2125_v7, %v2116_v31 }
0x141a   :  { %v5240_v39 = vadd.f32 %v2141_v4, %v2137_v11 }
0x141b   :  { %v5247_v6 = vadd.f32 %v2140_v18, %v2136_v32 }
0x141c   :  { %v2168_v21 = vrot.slane %v5240_v39, 7 }
0x141e   :  { %v2169_v41 = vsel %vm368_vm1, %v2168_v21, %v5247_v6 }
0x141f   :  { %v2129_v2 = vpop.permute.xlu0 %2128 }
0x1420   :  { %v2138_v13 = vmul.f32 %v2129_v2, %v2118_v1 }
0x1422   :  { %v5242_v57 = vadd.f32 %v2142_v50, %v2138_v13 }
0x1424   :  { %v2170_v60 = vrot.slane %v5242_v57, 6 }
0x1426   :  { %v2171_v28 = vsel %vm371_vm2, %v2170_v60, %v2169_v41 }
0x1427   :  { %v2131_v30 = vpop.permute.xlu2 %2130 }
0x1428   :  { %v2139_v5 = vmul.f32 %v2131_v30, %v2119_v23 }
0x142a   :  { %v5249_v14 = vadd.f32 %v2143_v20, %v2139_v5 }
0x142c   :  { %v2172_v27 = vrot.slane %v5249_v14, 5 }
0x142e   :  { %v2173_v10 = vsel %vm374_vm3, %v2172_v27, %v2171_v28 }
0x142f   :  { %2174 = vrot.lane.b32.xlu0 %v2173_v10, %s4506_s3 }
0x14a1   :  { %v2175_v37 = vpop.permute.xlu0 %2174 }
0x14a2   :  { %3904 = vmatmul.msk.f32.vlgmr.msra.gmra.mxu2 %vm162_vm4, %v2175_v37 }
0x14a3   :  { %3501 = vmatpush.msra.mxu2 %v5118_v15 }
0x14a5   :  { %3502 = vmatpush.msra.mxu2 %v5128_v53 }
0x14a7   :  { %3503 = vmatpush.msra.mxu2 %v5132_v47 }
0x14a9   :  { %3504 = vmatpush.msra.mxu2 %v5140_v36 }
0x1525   :  { %v2195_v29 = vpop.f32.mrf.mxu2 }
0x1526   :  { %v2196_v62 = vadd.f32 %v5201_v59, %v2195_v29 }
0x1528   :  { %2288 = vrot.lane.b32.xlu0 %v2196_v62, %s4505_s27  ;;  %v2200_v22 = vrot.slane %v2196_v62, 1  ;;  %v2199_v0 = vrot.slane %v2196_v62, 7  ;;  %v2201_v25 = vrot.slane %v2196_v62, 2  ;;  %v2207_v61 = vadd.f32 %v2196_v62, %v5215_v24 }
0x152a   :  { %2290 = vrot.lane.b32.xlu2 %v2200_v22, %s4505_s27  ;;  %2286 = vrot.lane.b32.xlu1 %v2199_v0, %s4505_s27  ;;  %v2208_v15 = vadd.f32 %v2200_v22, %v5218_v48  ;;  %v2206_v35 = vadd.f32 %v2199_v0, %v5212_v40  ;;  %v3906_v9 = vmul.f32 -1.442695, %v2207_v61  ;;  %v2209_v45 = vadd.f32 %v2201_v25, %v5225_v42 }
0x152c   :  { %v3907_v53 = vmul.f32 -1.442695, %v2208_v15  ;;  %v3905_v8 = vmul.f32 -1.442695, %v2206_v35  ;;  %v3908_v19 = vmul.f32 -1.442695, %v2209_v45 }
0x152e   :  { %4184 = vpow2.f32 %v3907_v53 }
0x1532   :  { %2292 = vrot.lane.b32.xlu1 %v2201_v25, %s4505_s27 }
0x1534   :  { %v4185_v47 = vpop.eup %4184 }
0x1535   :  { %v2224_v36 = vadd.f32 1.0, %v4185_v47 }
0x1537   :  { %4186 = vrcp.f32 %v2224_v36  ;;  %v2267_v54 = vand.u32 2147483648, %v2224_v36  ;;  %vm2261_vm14 = vweird.f32 %v2224_v36  ;;  %v2265_v49 = vand.u32 2147483647, %v2224_v36 }
0x1538   :  { %4188 = vpow2.f32 %v3906_v9 }
0x1539   :  { %4190 = vpow2.f32 %v3905_v8  ;;  %v2268_v55 = vor.u32 1.1754944e-38, %v2267_v54  ;;  %vm2266_vm0 = vcmp.eq.f32.partialorder %v2265_v49, 8.507059e+37 }
0x153a   :  { %4192 = vpow2.f32 %v3908_v19 }
0x153d   :  { %v4187_v33 = vpop.eup %4186 }
0x153e   :  { %v2257_v44 = vmul.f32 %v4187_v33, %v2224_v36  ;;  %v4189_v34 = vpop.eup %4188  ;;  %vm2262_vm13 = vweird.f32 %v4187_v33 }
0x153f   :  { %v4191_v12 = vpop.eup %4190  ;;  %v2223_v63 = vadd.f32 1.0, %v4189_v34  ;;  %vm2263_vm15 = vmor %vm2261_vm14, %vm2262_vm13 }
0x1540   :  { %v2258_v46 = vsub.f32 1.0, %v2257_v44  ;;  %v2222_v38 = vadd.f32 1.0, %v4191_v12  ;;  %v4193_v17 = vpop.eup %4192 }
0x1541   :  { %4194 = vrcp.f32 %v2223_v63  ;;  %v2225_v16 = vadd.f32 1.0, %v4193_v17  ;;  %vm2246_vm6 = vweird.f32 %v2223_v63  ;;  %v2252_v30 = vand.u32 2147483648, %v2223_v63 }
0x1542   :  { %v2259_v43 = vmul.f32 %v4187_v33, %v2258_v46  ;;  %4196 = vrcp.f32 %v2222_v38  ;;  %v2250_v18 = vand.u32 2147483647, %v2223_v63  ;;  %v2237_v60 = vand.u32 2147483648, %v2222_v38 }
0x1543   :  { %4198 = vrcp.f32 %v2225_v16  ;;  %vm2231_vm13 = vweird.f32 %v2222_v38  ;;  %v2235_v41 = vand.u32 2147483647, %v2222_v38  ;;  %v2253_v28 = vor.u32 1.1754944e-38, %v2252_v30 }
0x1544   :  { %v2260_v52 = vadd.f32 %v4187_v33, %v2259_v43  ;;  %v2238_v22 = vor.u32 1.1754944e-38, %v2237_v60  ;;  %v2282_v36 = vand.u32 2147483648, %v2225_v16  ;;  %v2280_v61 = vand.u32 2147483647, %v2225_v16 }
0x1546   :  { %v2264_v3 = vsel %vm2263_vm15, %v4187_v33, %v2260_v52  ;;  %vm2251_vm15 = vcmp.eq.f32.partialorder %v2250_v18, 8.507059e+37  ;;  %v2283_v9 = vor.u32 1.1754944e-38, %v2282_v36 }
0x1547   :  { %v4195_v26 = vpop.eup %4194  ;;  %v5273_v51 = vsel %vm2266_vm0, %v2268_v55, %v2264_v3  ;;  %vm2236_vm0 = vcmp.eq.f32.partialorder %v2235_v41, 8.507059e+37 }
0x1548   :  { %v4197_v1 = vpop.eup %4196  ;;  %v2242_v2 = vmul.f32 %v4195_v26, %v2223_v63  ;;  %vm2247_vm5 = vweird.f32 %v4195_v26 }
0x1549   :  { %v2227_v11 = vmul.f32 %v4197_v1, %v2222_v38  ;;  %v4199_v7 = vpop.eup %4198  ;;  %vm2232_vm7 = vweird.f32 %v4197_v1  ;;  %vm2248_vm8 = vmor %vm2246_vm6, %vm2247_vm5  ;;  %vm2276_vm6 = vweird.f32 %v2225_v16 }
0x154a   :  { %v2243_v13 = vsub.f32 1.0, %v2242_v2  ;;  %v2272_v32 = vmul.f32 %v4199_v7, %v2225_v16  ;;  %vm2233_vm14 = vmor %vm2231_vm13, %vm2232_vm7  ;;  %vm2277_vm5 = vweird.f32 %v4199_v7  ;;  %v2328_v16 = vsub.f32 1.0, %v5273_v51 }
0x154b   :  { %v2228_v4 = vsub.f32 1.0, %v2227_v11  ;;  %vm2278_vm7 = vmor %vm2276_vm6, %vm2277_vm5  ;;  %v2351_v11 = vrot.slane %v5242_v57, 7 }
0x154c   :  { %v2244_v50 = vmul.f32 %v4195_v26, %v2243_v13  ;;  %v2273_v5 = vsub.f32 1.0, %v2272_v32 }
0x154d   :  { %v2229_v31 = vmul.f32 %v4197_v1, %v2228_v4 }
0x154e   :  { %v2245_v23 = vadd.f32 %v4195_v26, %v2244_v50  ;;  %v2274_v37 = vmul.f32 %v4199_v7, %v2273_v5  ;;  %v2359_v50 = vmul.f32 %v2351_v11, %v5273_v51 }
0x154f   :  { %v2230_v20 = vadd.f32 %v4197_v1, %v2229_v31 }
0x1550   :  { %v2249_v27 = vsel %vm2248_vm8, %v4195_v26, %v2245_v23  ;;  %v2275_v47 = vadd.f32 %v4199_v7, %v2274_v37  ;;  %vm2281_vm8 = vcmp.eq.f32.partialorder %v2280_v61, 8.507059e+37  ;;  %v2350_v26 = vrot.slane %v5247_v6, 7 }
0x1551   :  { %v2234_v10 = vsel %vm2233_vm14, %v4197_v1, %v2230_v20  ;;  %v2254_v62 = vsel %vm2251_vm15, %v2253_v28, %v2249_v27  ;;  %v2352_v20 = vrot.slane %v5249_v14, 7 }
0x1552   :  { %v2239_v15 = vsel %vm2236_vm0, %v2238_v22, %v2234_v10  ;;  %v2279_v35 = vsel %vm2278_vm7, %v4199_v7, %v2275_v47  ;;  %v2327_v4 = vsub.f32 1.0, %v2254_v62  ;;  %v2358_v23 = vmul.f32 %v2254_v62, %v2168_v21 }
0x1553   :  { %v2284_v33 = vsel %vm2281_vm8, %v2283_v9, %v2279_v35  ;;  %v2326_v55 = vsub.f32 1.0, %v2239_v15 }
0x1554   :  { %v2329_v18 = vsub.f32 1.0, %v2284_v33  ;;  %v2360_v27 = vmul.f32 %v2352_v20, %v2284_v33 }
0x1584   :  { %v2291_v58 = vpop.permute.xlu2 %2290 }
0x1585   :  { %v2300_v56 = vmul.f32 %v2291_v58, %v5273_v51 }
0x1587   :  { %2310 = vrot.lane.b32.xlu0 %v2300_v56, %s4505_s27  ;;  %v2357_v56 = vmul.f32 %v2350_v26, %v2239_v15 }
0x159a   :  { %v2289_v29 = vpop.permute.xlu0 %2288 }
0x159b   :  { %v2299_v0 = vmul.f32 %v2289_v29, %v2254_v62 }
0x159c   :  { %v2287_v25 = vpop.permute.xlu1 %2286 }
0x159d   :  { %v2298_v53 = vmul.f32 %v2287_v25, %v2239_v15  ;;  %2308 = vrot.lane.b32.xlu1 %v2299_v0, %s4505_s27 }
0x159f   :  { %2306 = vrot.lane.b32.xlu2 %v2298_v53, %s4505_s27 }
0x15a4   :  { %v2293_v8 = vpop.permute.xlu1 %2292 }
0x15a5   :  { %v2301_v44 = vmul.f32 %v2293_v8, %v2284_v33 }
0x15a7   :  { %2312 = vrot.lane.b32.xlu2 %v2301_v44, %s4505_s27 }
0x15f9   :  { %v2311_v45 = vpop.permute.xlu0 %2310  ;;  %v2307_v46 = vpop.permute.xlu2 %2306 }
0x15fa   :  { %v2320_v34 = vadd.f32 %v2311_v45, %v5218_v48  ;;  %v2318_v19 = vadd.f32 %v2307_v46, %v5212_v40 }
0x15fc   :  { %4200 = vtanh.f32 %v2320_v34 }
0x15fd   :  { %4202 = vtanh.f32 %v2318_v19 }
0x1601   :  { %v2313_v12 = vpop.permute.xlu2 %2312 }
0x1602   :  { %v4201_v43 = vpop.eup %4200  ;;  %v2321_v63 = vadd.f32 %v2313_v12, %v5225_v42 }
0x1603   :  { %v4203_v38 = vpop.eup %4202  ;;  %2338 = vrot.lane.b32.xlu1 %v4201_v43, %s4506_s3 }
0x1604   :  { %4204 = vtanh.f32 %v2321_v63  ;;  %2334 = vrot.lane.b32.xlu0 %v4203_v38, %s4506_s3 }
0x160a   :  { %v4205_v52 = vpop.eup %4204 }
0x160c   :  { %2340 = vrot.lane.b32.xlu0 %v4205_v52, %s4506_s3 }
0x160f   :  { %v2309_v54 = vpop.permute.xlu1 %2308 }
0x1610   :  { %v2319_v49 = vadd.f32 %v2309_v54, %v5215_v24 }
0x1612   :  { %4206 = vtanh.f32 %v2319_v49 }
0x1618   :  { %v4207_v17 = vpop.eup %4206 }
0x1619   :  { %2336 = vrot.lane.b32.xlu2 %v4207_v17, %s4506_s3 }
0x1673   :  { %v2337_v2 = vpop.permute.xlu2 %2336 }
0x1674   :  { %v2347_v31 = vmul.f32 %v2337_v2, %v2327_v4 }
0x1675   :  { %v2339_v3 = vpop.permute.xlu1 %2338 }
0x1676   :  { %v2335_v58 = vpop.permute.xlu0 %2334  ;;  %v2348_v13 = vmul.f32 %v2339_v3, %v2328_v16  ;;  %v5300_v60 = vadd.f32 %v2358_v23, %v2347_v31 }
0x1677   :  { %v2346_v1 = vmul.f32 %v2335_v58, %v2326_v55 }
0x1678   :  { %v5294_v32 = vadd.f32 %v2359_v50, %v2348_v13 }
0x1679   :  { %v5291_v7 = vadd.f32 %v2357_v56, %v2346_v1 }
0x167a   :  { %v2387_v28 = vrot.slane %v5294_v32, 7 }
0x167b   :  { %v2385_v30 = vrot.slane %v5291_v7, 1 }
0x167d   :  { %v2386_v51 = vsel %vm368_vm1, %v5300_v60, %v2385_v30 }
0x167e   :  { %v2341_v5 = vpop.permute.xlu0 %2340  ;;  %v2388_v21 = vsel %vm371_vm2, %v2387_v28, %v2386_v51 }
0x167f   :  { %v2349_v41 = vmul.f32 %v2341_v5, %v2329_v18 }
0x1681   :  { %v5303_v10 = vadd.f32 %v2360_v27, %v2349_v41 }
0x1683   :  { %v2389_v37 = vrot.slane %v5303_v10, 6 }
0x1685   :  { %v2390_v29 = vsel %vm374_vm3, %v2389_v37, %v2388_v21 }
0x1686   :  { %2391 = vrot.lane.b32.xlu1 %v2390_v29, %s4506_s3 }
0x16f8   :  { %v2392_v62 = vpop.permute.xlu1 %2391 }
0x16f9   :  { %3909 = vmatmul.msk.f32.vlgmr.msrb.gmra.mxu0 %vm162_vm4, %v2392_v62 }
0x1776   :  { %v2412_v22 = vpop.f32.mrf.mxu0 }
0x1777   :  { %v2413_v0 = vadd.f32 %v5201_v59, %v2412_v22 }
0x1779   :  { %v2418_v25 = vrot.slane %v2413_v0, 1  ;;  %v2417_v15 = vrot.slane %v2413_v0, 7  ;;  %v2416_v53 = vrot.slane %v2413_v0, 6  ;;  %v2425_v61 = vadd.f32 %v2413_v0, %v5218_v48 }
0x177b   :  { %2509 = vrot.lane.b32.xlu1 %v2418_v25, %s4505_s27  ;;  %2505 = vrot.lane.b32.xlu0 %v2417_v15, %s4505_s27  ;;  %v2423_v47 = vadd.f32 %v2416_v53, %v5212_v40  ;;  %v3912_v35 = vmul.f32 -1.442695, %v2425_v61  ;;  %v2426_v44 = vadd.f32 %v2418_v25, %v5225_v42  ;;  %v2424_v45 = vadd.f32 %v2417_v15, %v5215_v24 }
0x177c   :  { %2503 = vrot.lane.b32.xlu2 %v2416_v53, %s4505_s27 }
0x177d   :  { %v3910_v36 = vmul.f32 -1.442695, %v2423_v47  ;;  %v3913_v34 = vmul.f32 -1.442695, %v2426_v44  ;;  %v3911_v12 = vmul.f32 -1.442695, %v2424_v45 }
0x177f   :  { %4208 = vpow2.f32 %v3910_v36 }
0x1780   :  { %4210 = vpow2.f32 %v3912_v35 }
0x1784   :  { %2507 = vrot.lane.b32.xlu2 %v2413_v0, %s4505_s27 }
0x1785   :  { %v4209_v9 = vpop.eup %4208 }
0x1786   :  { %v2439_v33 = vadd.f32 1.0, %v4209_v9  ;;  %v4211_v8 = vpop.eup %4210 }
0x1787   :  { %v2441_v46 = vadd.f32 1.0, %v4211_v8 }
0x1788   :  { %4212 = vrcp.f32 %v2439_v33  ;;  %v2454_v58 = vand.u32 2147483648, %v2439_v33  ;;  %vm2448_vm14 = vweird.f32 %v2439_v33  ;;  %v2452_v56 = vand.u32 2147483647, %v2439_v33 }
0x1789   :  { %4214 = vrcp.f32 %v2441_v46  ;;  %v2484_v18 = vand.u32 2147483648, %v2441_v46  ;;  %vm2478_vm6 = vweird.f32 %v2441_v46  ;;  %v2482_v20 = vand.u32 2147483647, %v2441_v46 }
0x178a   :  { %4216 = vpow2.f32 %v3913_v34  ;;  %v2455_v11 = vor.u32 1.1754944e-38, %v2454_v58  ;;  %vm2453_vm0 = vcmp.eq.f32.partialorder %v2452_v56, 8.507059e+37 }
0x178b   :  { %4218 = vpow2.f32 %v3911_v12  ;;  %v2485_v51 = vor.u32 1.1754944e-38, %v2484_v18  ;;  %vm2483_vm8 = vcmp.eq.f32.partialorder %v2482_v20, 8.507059e+37 }
0x178e   :  { %v4213_v19 = vpop.eup %4212 }
0x178f   :  { %v2444_v43 = vmul.f32 %v4213_v19, %v2439_v33  ;;  %v4215_v38 = vpop.eup %4214  ;;  %vm2449_vm13 = vweird.f32 %v4213_v19 }
0x1790   :  { %v4217_v52 = vpop.eup %4216  ;;  %v2474_v17 = vmul.f32 %v4215_v38, %v2441_v46  ;;  %vm2450_vm15 = vmor %vm2448_vm14, %vm2449_vm13  ;;  %vm2479_vm5 = vweird.f32 %v4215_v38 }
0x1791   :  { %v2445_v63 = vsub.f32 1.0, %v2444_v43  ;;  %v4219_v54 = vpop.eup %4218  ;;  %v2442_v3 = vadd.f32 1.0, %v4217_v52  ;;  %vm2480_vm7 = vmor %vm2478_vm6, %vm2479_vm5 }
0x1792   :  { %v2440_v55 = vadd.f32 1.0, %v4219_v54  ;;  %v2475_v16 = vsub.f32 1.0, %v2474_v17 }
0x1793   :  { %v2446_v49 = vmul.f32 %v4213_v19, %v2445_v63  ;;  %4220 = vrcp.f32 %v2442_v3  ;;  %v2499_v47 = vand.u32 2147483648, %v2442_v3  ;;  %v2497_v61 = vand.u32 2147483647, %v2442_v3 }
0x1794   :  { %4222 = vrcp.f32 %v2440_v55  ;;  %v2476_v2 = vmul.f32 %v4215_v38, %v2475_v16  ;;  %v2469_v36 = vand.u32 2147483648, %v2440_v55  ;;  %vm2463_vm5 = vweird.f32 %v2440_v55 }
0x1795   :  { %v2447_v26 = vadd.f32 %v4213_v19, %v2446_v49  ;;  %v2467_v35 = vand.u32 2147483647, %v2440_v55  ;;  %v2500_v8 = vor.u32 1.1754944e-38, %v2499_v47 }
0x1796   :  { %v2477_v30 = vadd.f32 %v4215_v38, %v2476_v2  ;;  %v2470_v44 = vor.u32 1.1754944e-38, %v2469_v36 }
0x1797   :  { %v2451_v1 = vsel %vm2450_vm15, %v4213_v19, %v2447_v26  ;;  %vm2493_vm15 = vweird.f32 %v2442_v3 }
0x1798   :  { %v5323_v50 = vsel %vm2453_vm0, %v2455_v11, %v2451_v1  ;;  %v2481_v41 = vsel %vm2480_vm7, %v4215_v38, %v2477_v30  ;;  %vm2498_vm7 = vcmp.eq.f32.partialorder %v2497_v61, 8.507059e+37 }
0x1799   :  { %v4221_v13 = vpop.eup %4220  ;;  %v5327_v37 = vsel %vm2483_vm8, %v2485_v51, %v2481_v41  ;;  %vm2468_vm8 = vcmp.eq.f32.partialorder %v2467_v35, 8.507059e+37  ;;  %v2543_v11 = vsub.f32 1.0, %v5323_v50 }
0x179a   :  { %v4223_v31 = vpop.eup %4222  ;;  %v2489_v5 = vmul.f32 %v4221_v13, %v2442_v3  ;;  %vm2494_vm13 = vweird.f32 %v4221_v13 }
0x179b   :  { %v2459_v27 = vmul.f32 %v4223_v31, %v2440_v55  ;;  %vm2464_vm14 = vweird.f32 %v4223_v31  ;;  %vm2495_vm0 = vmor %vm2493_vm15, %vm2494_vm13 }
0x179c   :  { %v2490_v29 = vsub.f32 1.0, %v2489_v5  ;;  %vm2465_vm6 = vmor %vm2463_vm5, %vm2464_vm14 }
0x179d   :  { %v2460_v62 = vsub.f32 1.0, %v2459_v27 }
0x179e   :  { %v2491_v0 = vmul.f32 %v4221_v13, %v2490_v29 }
0x179f   :  { %v2461_v25 = vmul.f32 %v4223_v31, %v2460_v62 }
0x17a0   :  { %v2492_v15 = vadd.f32 %v4221_v13, %v2491_v0 }
0x17a1   :  { %v2462_v53 = vadd.f32 %v4223_v31, %v2461_v25 }
0x17a2   :  { %v2496_v9 = vsel %vm2495_vm0, %v4221_v13, %v2492_v15  ;;  %v2568_v13 = vrot.slane %v5300_v60, 7 }
0x17a3   :  { %v2466_v33 = vsel %vm2465_vm6, %v4223_v31, %v2462_v53  ;;  %v2501_v46 = vsel %vm2498_vm7, %v2500_v8, %v2496_v9  ;;  %v2567_v31 = vrot.slane %v5291_v7, 7 }
0x17a4   :  { %v2471_v19 = vsel %vm2468_vm8, %v2470_v44, %v2466_v33  ;;  %v2546_v27 = vsub.f32 1.0, %v2501_v46 }
0x17a5   :  { %v2544_v1 = vsub.f32 1.0, %v2471_v19  ;;  %v2575_v20 = vmul.f32 %v2568_v13, %v2471_v19  ;;  %v2574_v5 = vmul.f32 %v2567_v31, %v5323_v50 }
0x17d6   :  { %v2504_v4 = vpop.permute.xlu2 %2503 }
0x17d7   :  { %v2515_v23 = vmul.f32 %v2504_v4, %v5323_v50  ;;  %v2576_v50 = vmul.f32 %v5327_v37, %v2387_v28 }
0x17d9   :  { %2523 = vrot.lane.b32.xlu0 %v2515_v23, %s4505_s27 }
0x17de   :  { %v2508_v21 = vpop.permute.xlu2 %2507 }
0x17df   :  { %v2517_v22 = vmul.f32 %v2508_v21, %v5327_v37  ;;  %v2569_v21 = vrot.slane %v5303_v10, 7 }
0x17e1   :  { %2527 = vrot.lane.b32.xlu0 %v2517_v22, %s4505_s27  ;;  %v2577_v62 = vmul.f32 %v2569_v21, %v2501_v46  ;;  %v2545_v22 = vsub.f32 1.0, %v5327_v37 }
0x17ed   :  { %v2510_v45 = vpop.permute.xlu1 %2509  ;;  %v2506_v34 = vpop.permute.xlu0 %2505 }
0x17ee   :  { %v2518_v12 = vmul.f32 %v2510_v45, %v2501_v46  ;;  %v2516_v43 = vmul.f32 %v2506_v34, %v2471_v19 }
0x17f0   :  { %2525 = vrot.lane.b32.xlu1 %v2516_v43, %s4505_s27  ;;  %2529 = vrot.lane.b32.xlu2 %v2518_v12, %s4505_s27 }
0x184a   :  { %v2530_v63 = vpop.permute.xlu2 %2529 }
0x184b   :  { %v2538_v38 = vadd.f32 %v2530_v63, %v5225_v42  ;;  %v2524_v52 = vpop.permute.xlu0 %2523 }
0x184c   :  { %v2535_v54 = vadd.f32 %v2524_v52, %v5212_v40 }
0x184d   :  { %4224 = vtanh.f32 %v2538_v38 }
0x184e   :  { %4226 = vtanh.f32 %v2535_v54 }
0x1853   :  { %v4225_v49 = vpop.eup %4224  ;;  %v2528_v17 = vpop.permute.xlu0 %2527 }
0x1854   :  { %v4227_v3 = vpop.eup %4226  ;;  %v2537_v55 = vadd.f32 %v2528_v17, %v5218_v48  ;;  %2557 = vrot.lane.b32.xlu0 %v4225_v49, %s4506_s3 }
0x1855   :  { %2551 = vrot.lane.b32.xlu1 %v4227_v3, %s4506_s3 }
0x1856   :  { %4228 = vtanh.f32 %v2537_v55 }
0x185c   :  { %v4229_v26 = vpop.eup %4228 }
0x185d   :  { %2555 = vrot.lane.b32.xlu1 %v4229_v26, %s4506_s3 }
0x1862   :  { %v2526_v16 = vpop.permute.xlu1 %2525 }
0x1863   :  { %v2536_v58 = vadd.f32 %v2526_v16, %v5215_v24 }
0x1865   :  { %4230 = vtanh.f32 %v2536_v58 }
0x186b   :  { %v4231_v56 = vpop.eup %4230 }
0x186c   :  { %2553 = vrot.lane.b32.xlu2 %v4231_v56, %s4506_s3 }
0x18c6   :  { %v2554_v2 = vpop.permute.xlu2 %2553  ;;  %v2558_v18 = vpop.permute.xlu0 %2557 }
0x18c7   :  { %v2564_v4 = vmul.f32 %v2554_v2, %v2544_v1  ;;  %v2552_v23 = vpop.permute.xlu1 %2551  ;;  %v2566_v29 = vmul.f32 %v2558_v18, %v2546_v27 }
0x18c8   :  { %v2563_v30 = vmul.f32 %v2552_v23, %v2543_v11 }
0x18c9   :  { %v5345_v41 = vadd.f32 %v2575_v20, %v2564_v4  ;;  %v5353_v15 = vadd.f32 %v2577_v62, %v2566_v29 }
0x18ca   :  { %v5347_v51 = vadd.f32 %v2574_v5, %v2563_v30 }
0x18cb   :  { %v2603_v0 = vrot.slane %v5345_v41, 1  ;;  %v2606_v61 = vrot.slane %v5353_v15, 7 }
0x18cc   :  { %v2602_v25 = vrot.slane %v5347_v51, 2 }
0x18ce   :  { %v2604_v35 = vsel %vm368_vm1, %v2603_v0, %v2602_v25 }
0x18cf   :  { %v2556_v53 = vpop.permute.xlu1 %2555 }
0x18d0   :  { %v2565_v47 = vmul.f32 %v2556_v53, %v2545_v22 }
0x18d2   :  { %v5358_v36 = vadd.f32 %v2576_v50, %v2565_v47 }
0x18d4   :  { %v2605_v9 = vsel %vm371_vm2, %v5358_v36, %v2604_v35 }
0x18d5   :  { %v2607_v33 = vsel %vm374_vm3, %v2606_v61, %v2605_v9 }
0x18d6   :  { %2608 = vrot.lane.b32.xlu2 %v2607_v33, %s4506_s3 }
0x1930   :  { %v2609_v8 = vpop.permute.xlu2 %2608 }
0x1931   :  { %3914 = vmatmul.msk.f32.vlgmr.msrb.gmra.mxu1 %vm162_vm4, %v2609_v8 }
0x19ae   :  { %v2629_v28 = vpop.f32.mrf.mxu1 }
0x19af   :  { %v2630_v37 = vadd.f32 %v5201_v59, %v2629_v28 }
0x19b1   :  { %v2635_v44 = vrot.slane %v2630_v37, 7  ;;  %v2634_v45 = vrot.slane %v2630_v37, 6  ;;  %v2633_v46 = vrot.slane %v2630_v37, 5  ;;  %v2643_v17 = vadd.f32 %v2630_v37, %v5225_v42 }
0x19b3   :  { %2724 = vrot.lane.b32.xlu2 %v2635_v44, %s4505_s27  ;;  %2722 = vrot.lane.b32.xlu1 %v2634_v45, %s4505_s27  ;;  %v2642_v34 = vadd.f32 %v2635_v44, %v5218_v48  ;;  %v2641_v59 = vadd.f32 %v2634_v45, %v5215_v24  ;;  %v2640_v63 = vadd.f32 %v2633_v46, %v5212_v40  ;;  %v3918_v55 = vmul.f32 -1.442695, %v2643_v17 }
0x19b4   :  { %2720 = vrot.lane.b32.xlu0 %v2633_v46, %s4505_s27 }
0x19b5   :  { %v3917_v19 = vmul.f32 -1.442695, %v2642_v34  ;;  %v3916_v52 = vmul.f32 -1.442695, %v2641_v59  ;;  %v3915_v54 = vmul.f32 -1.442695, %v2640_v63 }
0x19b7   :  { %4232 = vpow2.f32 %v3917_v19 }
0x19bc   :  { %2726 = vrot.lane.b32.xlu0 %v2630_v37, %s4505_s27 }
0x19bd   :  { %v4233_v12 = vpop.eup %4232 }
0x19be   :  { %v2658_v43 = vadd.f32 1.0, %v4233_v12 }
0x19c0   :  { %4234 = vrcp.f32 %v2658_v43  ;;  %v2701_v11 = vand.u32 2147483648, %v2658_v43  ;;  %vm2695_vm14 = vweird.f32 %v2658_v43  ;;  %v2699_v13 = vand.u32 2147483647, %v2658_v43 }
0x19c1   :  { %4236 = vpow2.f32 %v3916_v52 }
0x19c2   :  { %4238 = vpow2.f32 %v3915_v54  ;;  %v2702_v23 = vor.u32 1.1754944e-38, %v2701_v11  ;;  %vm2700_vm0 = vcmp.eq.f32.partialorder %v2699_v13, 8.507059e+37 }
0x19c3   :  { %4240 = vpow2.f32 %v3918_v55 }
0x19c6   :  { %v4235_v38 = vpop.eup %4234 }
0x19c7   :  { %v2691_v49 = vmul.f32 %v4235_v38, %v2658_v43  ;;  %v4237_v26 = vpop.eup %4236  ;;  %vm2696_vm13 = vweird.f32 %v4235_v38 }
0x19c8   :  { %v4239_v58 = vpop.eup %4238  ;;  %v2657_v56 = vadd.f32 1.0, %v4237_v26  ;;  %vm2697_vm15 = vmor %vm2695_vm14, %vm2696_vm13 }
0x19c9   :  { %v2692_v3 = vsub.f32 1.0, %v2691_v49  ;;  %v2656_v1 = vadd.f32 1.0, %v4239_v58  ;;  %v4241_v31 = vpop.eup %4240 }
0x19ca   :  { %4242 = vrcp.f32 %v2657_v56  ;;  %v2659_v20 = vadd.f32 1.0, %v4241_v31  ;;  %v2686_v9 = vand.u32 2147483648, %v2657_v56  ;;  %vm2680_vm7 = vweird.f32 %v2657_v56 }
0x19cb   :  { %v2693_v16 = vmul.f32 %v4235_v38, %v2692_v3  ;;  %4244 = vrcp.f32 %v2656_v1  ;;  %v2684_v28 = vand.u32 2147483647, %v2657_v56  ;;  %v2671_v37 = vand.u32 2147483648, %v2656_v1 }
0x19cc   :  { %4246 = vrcp.f32 %v2659_v20  ;;  %vm2665_vm13 = vweird.f32 %v2656_v1  ;;  %v2669_v44 = vand.u32 2147483647, %v2656_v1  ;;  %v2687_v46 = vor.u32 1.1754944e-38, %v2686_v9 }
0x19cd   :  { %v2694_v2 = vadd.f32 %v4235_v38, %v2693_v16  ;;  %v2672_v12 = vor.u32 1.1754944e-38, %v2671_v37  ;;  %v2716_v17 = vand.u32 2147483648, %v2659_v20  ;;  %v2714_v3 = vand.u32 2147483647, %v2659_v20 }
0x19ce   :  { %v2786_v9 = vrot.slane %v5358_v36, 7 }
0x19cf   :  { %v2698_v4 = vsel %vm2697_vm15, %v4235_v38, %v2694_v2  ;;  %vm2685_vm15 = vcmp.eq.f32.partialorder %v2684_v28, 8.507059e+37  ;;  %v2717_v26 = vor.u32 1.1754944e-38, %v2716_v17 }
0x19d0   :  { %v5378_v18 = vsel %vm2700_vm0, %v2702_v23, %v2698_v4  ;;  %v4243_v27 = vpop.eup %4242  ;;  %vm2670_vm0 = vcmp.eq.f32.partialorder %v2669_v44, 8.507059e+37 }
0x19d1   :  { %v4245_v21 = vpop.eup %4244  ;;  %v2676_v29 = vmul.f32 %v4243_v27, %v2657_v56  ;;  %vm2681_vm5 = vweird.f32 %v4243_v27 }
0x19d2   :  { %v2661_v62 = vmul.f32 %v4245_v21, %v2656_v1  ;;  %v4247_v25 = vpop.eup %4246  ;;  %vm2666_vm6 = vweird.f32 %v4245_v21  ;;  %vm2682_vm8 = vmor %vm2680_vm7, %vm2681_vm5  ;;  %vm2710_vm5 = vweird.f32 %v2659_v20  ;;  %vm2715_vm7 = vcmp.eq.f32.partialorder %v2714_v3, 8.507059e+37 }
0x19d3   :  { %v2677_v22 = vsub.f32 1.0, %v2676_v29  ;;  %v2706_v47 = vmul.f32 %v4247_v25, %v2659_v20  ;;  %vm2667_vm14 = vmor %vm2665_vm13, %vm2666_vm6  ;;  %vm2711_vm12 = vweird.f32 %v4247_v25 }
0x19d4   :  { %v2662_v0 = vsub.f32 1.0, %v2661_v62  ;;  %vm2712_vm6 = vmor %vm2710_vm5, %vm2711_vm12  ;;  %v2785_v62 = vrot.slane %v5345_v41, 7 }
0x19d5   :  { %v2678_v53 = vmul.f32 %v4243_v27, %v2677_v22  ;;  %v2707_v8 = vsub.f32 1.0, %v2706_v47 }
0x19d6   :  { %v2663_v50 = vmul.f32 %v4245_v21, %v2662_v0 }
0x19d7   :  { %v2679_v35 = vadd.f32 %v4243_v27, %v2678_v53  ;;  %v2708_v19 = vmul.f32 %v4247_v25, %v2707_v8  ;;  %v2762_v53 = vsub.f32 1.0, %v5378_v18 }
0x19d8   :  { %v2664_v33 = vadd.f32 %v4245_v21, %v2663_v50 }
0x19d9   :  { %v2683_v45 = vsel %vm2682_vm8, %v4243_v27, %v2679_v35  ;;  %v2709_v49 = vadd.f32 %v4247_v25, %v2708_v19 }
0x19da   :  { %v2668_v34 = vsel %vm2667_vm14, %v4245_v21, %v2664_v33  ;;  %v2688_v59 = vsel %vm2685_vm15, %v2687_v46, %v2683_v45  ;;  %v2793_v45 = vmul.f32 %v2786_v9, %v5378_v18 }
0x19db   :  { %v2673_v52 = vsel %vm2670_vm0, %v2672_v12, %v2668_v34  ;;  %v2713_v55 = vsel %vm2712_vm6, %v4247_v25, %v2709_v49  ;;  %v2761_v29 = vsub.f32 1.0, %v2688_v59  ;;  %v2784_v25 = vrot.slane %v5347_v51, 7 }
0x19dc   :  { %v2718_v16 = vsel %vm2715_vm7, %v2717_v26, %v2713_v55  ;;  %v2760_v0 = vsub.f32 1.0, %v2673_v52  ;;  %v2792_v50 = vmul.f32 %v2785_v62, %v2688_v59 }
0x19dd   :  { %v2791_v8 = vmul.f32 %v2784_v25, %v2673_v52 }
0x1a0d   :  { %v2725_v30 = vpop.permute.xlu2 %2724 }
0x1a0e   :  { %v2734_v5 = vmul.f32 %v2725_v30, %v5378_v18 }
0x1a10   :  { %2744 = vrot.lane.b32.xlu0 %v2734_v5, %s4505_s27 }
0x1a25   :  { %v2723_v43 = vpop.permute.xlu1 %2722 }
0x1a26   :  { %v2733_v63 = vmul.f32 %v2723_v43, %v2688_v59  ;;  %v2721_v38 = vpop.permute.xlu0 %2720  ;;  %v2763_v43 = vsub.f32 1.0, %v2718_v16 }
0x1a27   :  { %v2732_v54 = vmul.f32 %v2721_v38, %v2673_v52  ;;  %v2794_v38 = vmul.f32 %v2718_v16, %v2606_v61  ;;  %v5420_v61 = vld [vmem:[%s5742_s8] ss:$0 sm:$0xff] }
0x1a28   :  { %2742 = vrot.lane.b32.xlu2 %v2733_v63, %s4505_s27 }
0x1a29   :  { %2740 = vrot.lane.b32.xlu1 %v2732_v54, %s4505_s27 }
0x1a2e   :  { %v2727_v58 = vpop.permute.xlu0 %2726 }
0x1a2f   :  { %v2735_v56 = vmul.f32 %v2727_v58, %v2718_v16 }
0x1a31   :  { %2746 = vrot.lane.b32.xlu1 %v2735_v56, %s4505_s27 }
0x1a82   :  { %v2743_v1 = vpop.permute.xlu2 %2742  ;;  %v2745_v2 = vpop.permute.xlu0 %2744 }
0x1a83   :  { %v2753_v11 = vadd.f32 %v2743_v1, %v5215_v24  ;;  %v2754_v13 = vadd.f32 %v2745_v2, %v5218_v48 }
0x1a85   :  { %4248 = vtanh.f32 %v2753_v11 }
0x1a86   :  { %4250 = vtanh.f32 %v2754_v13 }
0x1a8b   :  { %v4249_v4 = vpop.eup %4248 }
0x1a8c   :  { %v4251_v31 = vpop.eup %4250  ;;  %2770 = vrot.lane.b32.xlu0 %v4249_v4, %s4506_s3 }
0x1a8d   :  { %2772 = vrot.lane.b32.xlu1 %v4251_v31, %s4506_s3 }
0x1a9b   :  { %v2741_v23 = vpop.permute.xlu1 %2740 }
0x1a9c   :  { %v2752_v30 = vadd.f32 %v2741_v23, %v5212_v40 }
0x1a9e   :  { %4252 = vtanh.f32 %v2752_v30 }
0x1aa3   :  { %v2747_v20 = vpop.permute.xlu1 %2746 }
0x1aa4   :  { %v4253_v5 = vpop.eup %4252  ;;  %v2755_v27 = vadd.f32 %v2747_v20, %v5225_v42 }
0x1aa5   :  { %2768 = vrot.lane.b32.xlu2 %v4253_v5, %s4506_s3 }
0x1aa6   :  { %4254 = vtanh.f32 %v2755_v27 }
0x1aac   :  { %v4255_v21 = vpop.eup %4254 }
0x1aad   :  { %2774 = vrot.lane.b32.xlu2 %v4255_v21, %s4506_s3 }
0x1afe   :  { %v2771_v22 = vpop.permute.xlu0 %2770 }
0x1aff   :  { %v2781_v47 = vmul.f32 %v2771_v22, %v2761_v29  ;;  %v2769_v35 = vpop.permute.xlu2 %2768  ;;  %v2773_v33 = vpop.permute.xlu1 %2772 }
0x1b00   :  { %v2780_v28 = vmul.f32 %v2769_v35, %v2760_v0  ;;  %v2782_v37 = vmul.f32 %v2773_v33, %v2762_v53 }
0x1b01   :  { %v5397_v44 = vadd.f32 %v2792_v50, %v2781_v47 }
0x1b02   :  { %v5400_v46 = vadd.f32 %v2791_v8, %v2780_v28  ;;  %v5402_v34 = vadd.f32 %v2793_v45, %v2782_v37 }
0x1b03   :  { %v2820_v19 = vrot.slane %v5397_v44, 2 }
0x1b04   :  { %v2819_v12 = vrot.slane %v5400_v46, 3  ;;  %v2822_v59 = vrot.slane %v5402_v34, 1 }
0x1b06   :  { %v2821_v54 = vsel %vm368_vm1, %v2820_v19, %v2819_v12 }
0x1b07   :  { %v2775_v63 = vpop.permute.xlu2 %2774  ;;  %v2823_v18 = vsel %vm371_vm2, %v2822_v59, %v2821_v54 }
0x1b08   :  { %v2783_v52 = vmul.f32 %v2775_v63, %v2763_v43 }
0x1b0a   :  { %v5410_v49 = vadd.f32 %v2794_v38, %v2783_v52 }
0x1b0c   :  { %v2824_v17 = vsel %vm374_vm3, %v5410_v49, %v2823_v18 }
0x1b0d   :  { %2825 = vrot.lane.b32.xlu0 %v2824_v17, %s4506_s3 }
0x1b7f   :  { %v2826_v3 = vpop.permute.xlu0 %2825 }
0x1b80   :  { %3919 = vmatmul.msk.f32.vlgmr.msrb.gmra.mxu2 %vm162_vm4, %v2826_v3 }
0x1c03   :  { %v2846_v55 = vpop.f32.mrf.mxu2 }
0x1c04   :  { %v2847_v26 = vadd.f32 %v5420_v61, %v2846_v55 }
0x1c06   :  { %v2852_v16 = vrot.slane %v2847_v26, 6  ;;  %v2851_v58 = vrot.slane %v2847_v26, 5  ;;  %v2850_v56 = vrot.slane %v2847_v26, 4  ;;  %v2853_v1 = vrot.slane %v2847_v26, 7 }
0x1c08   :  { %2942 = vrot.lane.b32.xlu0 %v2852_v16, %s4505_s27  ;;  %2940 = vrot.lane.b32.xlu2 %v2851_v58, %s4505_s27  ;;  %v2859_v2 = vadd.f32 %v2851_v58, %v5215_v24  ;;  %v2860_v31 = vadd.f32 %v2852_v16, %v5218_v48  ;;  %v2858_v23 = vadd.f32 %v2850_v56, %v5212_v40 }
0x1c09   :  { %2938 = vrot.lane.b32.xlu1 %v2850_v56, %s4505_s27  ;;  %v2861_v21 = vadd.f32 %v2853_v1, %v5225_v42 }
0x1c0a   :  { %v3921_v11 = vmul.f32 -1.442695, %v2859_v2  ;;  %v3922_v20 = vmul.f32 -1.442695, %v2860_v31  ;;  %v3920_v5 = vmul.f32 -1.442695, %v2858_v23 }
0x1c0b   :  { %v3923_v62 = vmul.f32 -1.442695, %v2861_v21 }
0x1c0c   :  { %4256 = vpow2.f32 %v3921_v11 }
0x1c11   :  { %2944 = vrot.lane.b32.xlu1 %v2853_v1, %s4505_s27 }
0x1c12   :  { %v4257_v13 = vpop.eup %4256 }
0x1c13   :  { %v2875_v4 = vadd.f32 1.0, %v4257_v13 }
0x1c15   :  { %4258 = vrcp.f32 %v2875_v4  ;;  %v2904_v35 = vand.u32 2147483648, %v2875_v4  ;;  %vm2898_vm8 = vweird.f32 %v2875_v4  ;;  %v2902_v9 = vand.u32 2147483647, %v2875_v4 }
0x1c16   :  { %4260 = vpow2.f32 %v3922_v20 }
0x1c17   :  { %4262 = vpow2.f32 %v3920_v5  ;;  %v2905_v28 = vor.u32 1.1754944e-38, %v2904_v35  ;;  %vm2903_vm14 = vcmp.eq.f32.partialorder %v2902_v9, 8.507059e+37 }
0x1c18   :  { %4264 = vpow2.f32 %v3923_v62 }
0x1c1b   :  { %v4259_v30 = vpop.eup %4258 }
0x1c1c   :  { %v2894_v27 = vmul.f32 %v4259_v30, %v2875_v4  ;;  %v4261_v22 = vpop.eup %4260  ;;  %vm2899_vm12 = vweird.f32 %v4259_v30 }
0x1c1d   :  { %v4263_v25 = vpop.eup %4262  ;;  %v2876_v53 = vadd.f32 1.0, %v4261_v22  ;;  %vm2900_vm13 = vmor %vm2898_vm8, %vm2899_vm12 }
0x1c1e   :  { %v2895_v29 = vsub.f32 1.0, %v2894_v27  ;;  %v2874_v50 = vadd.f32 1.0, %v4263_v25  ;;  %v4265_v8 = vpop.eup %4264 }
0x1c1f   :  { %4266 = vrcp.f32 %v2876_v53  ;;  %v2877_v19 = vadd.f32 1.0, %v4265_v8  ;;  %v2919_v16 = vand.u32 2147483648, %v2876_v53  ;;  %vm2913_vm5 = vweird.f32 %v2876_v53 }
0x1c20   :  { %v2896_v0 = vmul.f32 %v4259_v30, %v2895_v29  ;;  %4268 = vrcp.f32 %v2874_v50  ;;  %v2917_v1 = vand.u32 2147483647, %v2876_v53  ;;  %v2889_v2 = vand.u32 2147483648, %v2874_v50 }
0x1c21   :  { %4270 = vrcp.f32 %v2877_v19  ;;  %vm2883_vm7 = vweird.f32 %v2874_v50  ;;  %v2887_v11 = vand.u32 2147483647, %v2874_v50  ;;  %v2920_v4 = vor.u32 1.1754944e-38, %v2919_v16 }
0x1c22   :  { %v2897_v47 = vadd.f32 %v4259_v30, %v2896_v0  ;;  %vm2918_vm8 = vcmp.eq.f32.partialorder %v2917_v1, 8.507059e+37  ;;  %v2934_v0 = vand.u32 2147483648, %v2877_v19  ;;  %v2932_v25 = vand.u32 2147483647, %v2877_v19 }
0x1c24   :  { %v2901_v33 = vsel %vm2900_vm13, %v4259_v30, %v2897_v47  ;;  %v2890_v30 = vor.u32 1.1754944e-38, %v2889_v2  ;;  %vm2888_vm13 = vcmp.eq.f32.partialorder %v2887_v11, 8.507059e+37 }
0x1c25   :  { %v5431_v45 = vsel %vm2903_vm14, %v2905_v28, %v2901_v33  ;;  %v4267_v43 = vpop.eup %4266 }
0x1c26   :  { %v4269_v59 = vpop.eup %4268  ;;  %v2909_v63 = vmul.f32 %v4267_v43, %v2876_v53  ;;  %vm2914_vm15 = vweird.f32 %v4267_v43 }
0x1c27   :  { %v2879_v38 = vmul.f32 %v4269_v59, %v2874_v50  ;;  %v4271_v18 = vpop.eup %4270  ;;  %vm2884_vm0 = vweird.f32 %v4269_v59  ;;  %vm2915_vm6 = vmor %vm2913_vm5, %vm2914_vm15  ;;  %vm2928_vm15 = vweird.f32 %v2877_v19  ;;  %v2935_v50 = vor.u32 1.1754944e-38, %v2934_v0 }
0x1c28   :  { %v2910_v52 = vsub.f32 1.0, %v2909_v63  ;;  %v2924_v55 = vmul.f32 %v4271_v18, %v2877_v19  ;;  %vm2885_vm12 = vmor %vm2883_vm7, %vm2884_vm0  ;;  %vm2929_vm14 = vweird.f32 %v4271_v18  ;;  %vm2933_vm5 = vcmp.eq.f32.partialorder %v2932_v25, 8.507059e+37 }
0x1c29   :  { %v2880_v54 = vsub.f32 1.0, %v2879_v38  ;;  %vm2930_vm0 = vmor %vm2928_vm15, %vm2929_vm14  ;;  %v3005_v0 = vrot.slane %v5410_v49, 7 }
0x1c2a   :  { %v2911_v17 = vmul.f32 %v4267_v43, %v2910_v52  ;;  %v2925_v56 = vsub.f32 1.0, %v2924_v55 }
0x1c2b   :  { %v2881_v3 = vmul.f32 %v4269_v59, %v2880_v54 }
0x1c2c   :  { %v2912_v26 = vadd.f32 %v4267_v43, %v2911_v17  ;;  %v2926_v23 = vmul.f32 %v4271_v18, %v2925_v56  ;;  %v3003_v17 = vrot.slane %v5397_v44, 7 }
0x1c2d   :  { %v2882_v58 = vadd.f32 %v4269_v59, %v2881_v3 }
0x1c2e   :  { %v2916_v13 = vsel %vm2915_vm6, %v4267_v43, %v2912_v26  ;;  %v2927_v22 = vadd.f32 %v4271_v18, %v2926_v23  ;;  %v3002_v26 = vrot.slane %v5400_v46, 7  ;;  %v3011_v2 = vmul.f32 %v3003_v17, %v5431_v45 }
0x1c2f   :  { %v2886_v31 = vsel %vm2885_vm12, %v4269_v59, %v2882_v58  ;;  %v2921_v5 = vsel %vm2918_vm8, %v2920_v4, %v2916_v13  ;;  %v3004_v4 = vrot.slane %v5402_v34, 7 }
0x1c30   :  { %v2891_v29 = vsel %vm2888_vm13, %v2890_v30, %v2886_v31  ;;  %v2931_v53 = vsel %vm2930_vm0, %v4271_v18, %v2927_v22  ;;  %v2979_v18 = vsub.f32 1.0, %v5431_v45  ;;  %v2980_v1 = vsub.f32 1.0, %v2921_v5 }
0x1c31   :  { %v2936_v47 = vsel %vm2933_vm5, %v2935_v50, %v2931_v53  ;;  %v2978_v55 = vsub.f32 1.0, %v2891_v29  ;;  %v3010_v11 = vmul.f32 %v3002_v26, %v2891_v29 }
0x1c32   :  { %v2981_v22 = vsub.f32 1.0, %v2936_v47 }
0x1c62   :  { %v2941_v37 = vpop.permute.xlu2 %2940 }
0x1c63   :  { %v2951_v12 = vmul.f32 %v2941_v37, %v5431_v45 }
0x1c65   :  { %2960 = vrot.lane.b32.xlu0 %v2951_v12, %s4505_s27 }
0x1c7a   :  { %v2943_v20 = vpop.permute.xlu0 %2942 }
0x1c7b   :  { %v2952_v27 = vmul.f32 %v2943_v20, %v2921_v5  ;;  %v2939_v21 = vpop.permute.xlu1 %2938  ;;  %v3012_v20 = vmul.f32 %v3004_v4, %v2921_v5 }
0x1c7c   :  { %v2950_v62 = vmul.f32 %v2939_v21, %v2891_v29  ;;  %v3013_v29 = vmul.f32 %v3005_v0, %v2936_v47 }
0x1c7d   :  { %2962 = vrot.lane.b32.xlu1 %v2952_v27, %s4505_s27 }
0x1c7e   :  { %2958 = vrot.lane.b32.xlu2 %v2950_v62, %s4505_s27 }
0x1c83   :  { %v2945_v35 = vpop.permute.xlu1 %2944 }
0x1c84   :  { %v2953_v9 = vmul.f32 %v2945_v35, %v2936_v47 }
0x1c86   :  { %2964 = vrot.lane.b32.xlu2 %v2953_v9, %s4505_s27 }
0x1cd7   :  { %v2961_v33 = vpop.permute.xlu0 %2960 }
0x1cd8   :  { %v2971_v8 = vadd.f32 %v2961_v33, %v5215_v24  ;;  %v2959_v28 = vpop.permute.xlu2 %2958 }
0x1cd9   :  { %v2970_v37 = vadd.f32 %v2959_v28, %v5212_v40 }
0x1cda   :  { %4272 = vtanh.f32 %v2971_v8 }
0x1cdb   :  { %4274 = vtanh.f32 %v2970_v37 }
0x1ce0   :  { %v4273_v12 = vpop.eup %4272  ;;  %v2965_v43 = vpop.permute.xlu2 %2964 }
0x1ce1   :  { %v4275_v19 = vpop.eup %4274  ;;  %v2973_v59 = vadd.f32 %v2965_v43, %v5225_v42  ;;  %2988 = vrot.lane.b32.xlu1 %v4273_v12, %s4506_s3 }
0x1ce2   :  { %2986 = vrot.lane.b32.xlu0 %v4275_v19, %s4506_s3 }
0x1ce3   :  { %4276 = vtanh.f32 %v2973_v59 }
0x1ce9   :  { %v4277_v63 = vpop.eup %4276 }
0x1cea   :  { %2992 = vrot.lane.b32.xlu0 %v4277_v63, %s4506_s3 }
0x1cef   :  { %v2963_v38 = vpop.permute.xlu1 %2962 }
0x1cf0   :  { %v2972_v52 = vadd.f32 %v2963_v38, %v5218_v48 }
0x1cf2   :  { %4278 = vtanh.f32 %v2972_v52 }
0x1cf8   :  { %v4279_v54 = vpop.eup %4278 }
0x1cf9   :  { %2990 = vrot.lane.b32.xlu2 %v4279_v54, %s4506_s3 }
0x1d53   :  { %v2989_v3 = vpop.permute.xlu1 %2988  ;;  %v2991_v16 = vpop.permute.xlu2 %2990 }
0x1d54   :  { %v2999_v58 = vmul.f32 %v2989_v3, %v2979_v18  ;;  %v2987_v56 = vpop.permute.xlu0 %2986  ;;  %v3000_v31 = vmul.f32 %v2991_v16, %v2980_v1 }
0x1d55   :  { %v2998_v13 = vmul.f32 %v2987_v56, %v2978_v55 }
0x1d56   :  { %v5451_v23 = vadd.f32 %v3011_v2, %v2999_v58  ;;  %v5455_v27 = vadd.f32 %v3012_v20, %v3000_v31 }
0x1d57   :  { %v5453_v30 = vadd.f32 %v3010_v11, %v2998_v13 }
0x1d58   :  { %v3039_v21 = vrot.slane %v5451_v23, 3  ;;  %v3041_v53 = vrot.slane %v5455_v27, 2 }
0x1d59   :  { %v3038_v62 = vrot.slane %v5453_v30, 4 }
0x1d5b   :  { %v3040_v35 = vsel %vm368_vm1, %v3039_v21, %v3038_v62 }
0x1d5c   :  { %v2993_v45 = vpop.permute.xlu0 %2992  ;;  %v3042_v9 = vsel %vm371_vm2, %v3041_v53, %v3040_v35 }
0x1d5d   :  { %v3001_v25 = vmul.f32 %v2993_v45, %v2981_v22 }
0x1d5f   :  { %v5461_v50 = vadd.f32 %v3013_v29, %v3001_v25 }
0x1d61   :  { %v3043_v5 = vrot.slane %v5461_v50, 1 }
0x1d63   :  { %v3044_v33 = vsel %vm374_vm3, %v3043_v5, %v3042_v9 }
0x1d64   :  { %3045 = vrot.lane.b32.xlu1 %v3044_v33, %s4506_s3 }
0x1dd6   :  { %v3046_v8 = vpop.permute.xlu1 %3045 }
0x1dd7   :  { %3924 = vmatmul.msk.f32.vlgmr.msra.gmra.mxu0 %vm162_vm4, %v3046_v8 }
0x1e54   :  { %v3066_v28 = vpop.f32.mrf.mxu0 }
0x1e55   :  { %v3067_v47 = vadd.f32 %v5420_v61, %v3066_v28 }
0x1e57   :  { %v3072_v37 = vrot.slane %v3067_v47, 5  ;;  %v3071_v12 = vrot.slane %v3067_v47, 4  ;;  %v3070_v43 = vrot.slane %v3067_v47, 3  ;;  %v3073_v19 = vrot.slane %v3067_v47, 6 }
0x1e59   :  { %3162 = vrot.lane.b32.xlu1 %v3072_v37, %s4505_s27  ;;  %3160 = vrot.lane.b32.xlu0 %v3071_v12, %s4505_s27  ;;  %v3078_v59 = vadd.f32 %v3070_v43, %v5212_v40  ;;  %v3081_v38 = vadd.f32 %v3073_v19, %v5225_v42  ;;  %v3080_v3 = vadd.f32 %v3072_v37, %v5218_v48 }
0x1e5a   :  { %3158 = vrot.lane.b32.xlu2 %v3070_v43, %s4505_s27  ;;  %v3079_v55 = vadd.f32 %v3071_v12, %v5215_v24 }
0x1e5b   :  { %v3925_v63 = vmul.f32 -1.442695, %v3078_v59  ;;  %v3928_v52 = vmul.f32 -1.442695, %v3081_v38  ;;  %v3927_v16 = vmul.f32 -1.442695, %v3080_v3 }
0x1e5c   :  { %v3926_v56 = vmul.f32 -1.442695, %v3079_v55 }
0x1e5d   :  { %4280 = vpow2.f32 %v3925_v63 }
0x1e5e   :  { %4282 = vpow2.f32 %v3928_v52 }
0x1e62   :  { %3164 = vrot.lane.b32.xlu2 %v3073_v19, %s4505_s27 }
0x1e63   :  { %v4281_v54 = vpop.eup %4280 }
0x1e64   :  { %v3094_v18 = vadd.f32 1.0, %v4281_v54  ;;  %v4283_v17 = vpop.eup %4282 }
0x1e65   :  { %v3097_v26 = vadd.f32 1.0, %v4283_v17 }
0x1e66   :  { %4284 = vrcp.f32 %v3094_v18  ;;  %v3109_v45 = vand.u32 2147483648, %v3094_v18  ;;  %vm3103_vm7 = vweird.f32 %v3094_v18  ;;  %v3107_v29 = vand.u32 2147483647, %v3094_v18 }
0x1e67   :  { %4286 = vrcp.f32 %v3097_v26  ;;  %v3154_v37 = vand.u32 2147483648, %v3097_v26  ;;  %vm3148_vm14 = vweird.f32 %v3097_v26  ;;  %v3152_v12 = vand.u32 2147483647, %v3097_v26 }
0x1e68   :  { %4288 = vpow2.f32 %v3927_v16  ;;  %v3110_v35 = vor.u32 1.1754944e-38, %v3109_v45  ;;  %vm3108_vm8 = vcmp.eq.f32.partialorder %v3107_v29, 8.507059e+37 }
0x1e69   :  { %4290 = vpow2.f32 %v3926_v56  ;;  %v3155_v63 = vor.u32 1.1754944e-38, %v3154_v37  ;;  %vm3153_vm0 = vcmp.eq.f32.partialorder %v3152_v12, 8.507059e+37 }
0x1e6c   :  { %v4285_v58 = vpop.eup %4284 }
0x1e6d   :  { %v3099_v1 = vmul.f32 %v4285_v58, %v3094_v18  ;;  %v4287_v11 = vpop.eup %4286  ;;  %vm3104_vm6 = vweird.f32 %v4285_v58 }
0x1e6e   :  { %v4289_v13 = vpop.eup %4288  ;;  %v3144_v20 = vmul.f32 %v4287_v11, %v3097_v26  ;;  %vm3105_vm12 = vmor %vm3103_vm7, %vm3104_vm6  ;;  %vm3149_vm13 = vweird.f32 %v4287_v11 }
0x1e6f   :  { %v3100_v2 = vsub.f32 1.0, %v3099_v1  ;;  %v4291_v4 = vpop.eup %4290  ;;  %v3096_v21 = vadd.f32 1.0, %v4289_v13  ;;  %vm3150_vm15 = vmor %vm3148_vm14, %vm3149_vm13 }
0x1e70   :  { %v3095_v62 = vadd.f32 1.0, %v4291_v4  ;;  %v3145_v0 = vsub.f32 1.0, %v3144_v20 }
0x1e71   :  { %v3101_v31 = vmul.f32 %v4285_v58, %v3100_v2  ;;  %4292 = vrcp.f32 %v3096_v21  ;;  %vm3133_vm7 = vweird.f32 %v3096_v21  ;;  %v3137_v1 = vand.u32 2147483647, %v3096_v21 }
0x1e72   :  { %4294 = vrcp.f32 %v3095_v62  ;;  %v3146_v53 = vmul.f32 %v4287_v11, %v3145_v0  ;;  %v3124_v56 = vand.u32 2147483648, %v3095_v62  ;;  %v3122_v2 = vand.u32 2147483647, %v3095_v62 }
0x1e73   :  { %v3102_v22 = vadd.f32 %v4285_v58, %v3101_v31  ;;  %vm3138_vm14 = vcmp.eq.f32.partialorder %v3137_v1, 8.507059e+37 }
0x1e74   :  { %v3147_v47 = vadd.f32 %v4287_v11, %v3146_v53  ;;  %v3125_v31 = vor.u32 1.1754944e-38, %v3124_v56  ;;  %v3224_v56 = vrot.slane %v5455_v27, 7 }
0x1e75   :  { %v3106_v25 = vsel %vm3105_vm12, %v4285_v58, %v3102_v22  ;;  %v3139_v58 = vand.u32 2147483648, %v3096_v21 }
0x1e76   :  { %v5478_v33 = vsel %vm3108_vm8, %v3110_v35, %v3106_v25  ;;  %v3151_v59 = vsel %vm3150_vm15, %v4287_v11, %v3147_v47  ;;  %vm3118_vm8 = vweird.f32 %v3095_v62  ;;  %vm3123_vm15 = vcmp.eq.f32.partialorder %v3122_v2, 8.507059e+37 }
0x1e77   :  { %v4293_v5 = vpop.eup %4292  ;;  %v5482_v38 = vsel %vm3153_vm0, %v3155_v63, %v3151_v59  ;;  %v3140_v4 = vor.u32 1.1754944e-38, %v3139_v58  ;;  %v3223_v59 = vrot.slane %v5451_v23, 7 }
0x1e78   :  { %v4295_v8 = vpop.eup %4294  ;;  %v3129_v43 = vmul.f32 %v4293_v5, %v3096_v21  ;;  %vm3134_vm5 = vweird.f32 %v4293_v5 }
0x1e79   :  { %v3114_v19 = vmul.f32 %v4295_v8, %v3095_v62  ;;  %vm3119_vm6 = vweird.f32 %v4295_v8  ;;  %vm3135_vm12 = vmor %vm3133_vm7, %vm3134_vm5 }
0x1e7a   :  { %v3130_v54 = vsub.f32 1.0, %v3129_v43  ;;  %vm3120_vm13 = vmor %vm3118_vm8, %vm3119_vm6 }
0x1e7b   :  { %v3115_v18 = vsub.f32 1.0, %v3114_v19 }
0x1e7c   :  { %v3131_v3 = vmul.f32 %v4293_v5, %v3130_v54  ;;  %v3222_v54 = vrot.slane %v5453_v30, 7 }
0x1e7d   :  { %v3116_v55 = vmul.f32 %v4295_v8, %v3115_v18 }
0x1e7e   :  { %v3132_v16 = vadd.f32 %v4293_v5, %v3131_v3 }
0x1e7f   :  { %v3117_v26 = vadd.f32 %v4295_v8, %v3116_v55 }
0x1e80   :  { %v3136_v11 = vsel %vm3135_vm12, %v4293_v5, %v3132_v16 }
0x1e81   :  { %v3121_v13 = vsel %vm3120_vm13, %v4295_v8, %v3117_v26  ;;  %v3141_v22 = vsel %vm3138_vm14, %v3140_v4, %v3136_v11  ;;  %v3230_v26 = vmul.f32 %v3222_v54, %v5478_v33 }
0x1e82   :  { %v3126_v45 = vsel %vm3123_vm15, %v3125_v31, %v3121_v13  ;;  %v3200_v55 = vsub.f32 1.0, %v3141_v22  ;;  %v3232_v13 = vmul.f32 %v3224_v56, %v3141_v22 }
0x1e83   :  { %v3199_v19 = vsub.f32 1.0, %v3126_v45  ;;  %v3231_v16 = vmul.f32 %v3223_v59, %v3126_v45 }
0x1eb4   :  { %v3159_v9 = vpop.permute.xlu2 %3158 }
0x1eb5   :  { %v3170_v28 = vmul.f32 %v3159_v9, %v5478_v33 }
0x1eb7   :  { %3178 = vrot.lane.b32.xlu0 %v3170_v28, %s4505_s27 }
0x1ebc   :  { %v3165_v52 = vpop.permute.xlu2 %3164 }
0x1ebd   :  { %v3173_v17 = vmul.f32 %v3165_v52, %v5482_v38  ;;  %v3198_v52 = vsub.f32 1.0, %v5478_v33 }
0x1ebf   :  { %3184 = vrot.lane.b32.xlu0 %v3173_v17, %s4505_s27 }
0x1ecb   :  { %v3163_v20 = vpop.permute.xlu1 %3162  ;;  %v3161_v0 = vpop.permute.xlu0 %3160 }
0x1ecc   :  { %v3172_v29 = vmul.f32 %v3163_v20, %v3141_v22  ;;  %v3171_v25 = vmul.f32 %v3161_v0, %v3126_v45  ;;  %v3201_v0 = vsub.f32 1.0, %v5482_v38  ;;  %v3225_v45 = vrot.slane %v5461_v50, 7 }
0x1ece   :  { %3180 = vrot.lane.b32.xlu1 %v3171_v25, %s4505_s27  ;;  %3182 = vrot.lane.b32.xlu2 %v3172_v29, %s4505_s27  ;;  %v3233_v29 = vmul.f32 %v3225_v45, %v5482_v38 }
0x1f28   :  { %v3183_v21 = vpop.permute.xlu2 %3182 }
0x1f29   :  { %v3192_v62 = vadd.f32 %v3183_v21, %v5218_v48  ;;  %v3179_v53 = vpop.permute.xlu0 %3178 }
0x1f2a   :  { %v3190_v35 = vadd.f32 %v3179_v53, %v5212_v40 }
0x1f2b   :  { %4296 = vtanh.f32 %v3192_v62 }
0x1f2c   :  { %4298 = vtanh.f32 %v3190_v35 }
0x1f31   :  { %v4297_v5 = vpop.eup %4296  ;;  %v3185_v9 = vpop.permute.xlu0 %3184 }
0x1f32   :  { %v4299_v8 = vpop.eup %4298  ;;  %v3193_v28 = vadd.f32 %v3185_v9, %v5225_v42  ;;  %3210 = vrot.lane.b32.xlu0 %v4297_v5, %s4506_s3 }
0x1f33   :  { %3206 = vrot.lane.b32.xlu1 %v4299_v8, %s4506_s3 }
0x1f34   :  { %4300 = vtanh.f32 %v3193_v28 }
0x1f3a   :  { %v4301_v47 = vpop.eup %4300 }
0x1f3b   :  { %3212 = vrot.lane.b32.xlu1 %v4301_v47, %s4506_s3 }
0x1f40   :  { %v3181_v37 = vpop.permute.xlu1 %3180 }
0x1f41   :  { %v3191_v12 = vadd.f32 %v3181_v37, %v5215_v24 }
0x1f43   :  { %4302 = vtanh.f32 %v3191_v12 }
0x1f49   :  { %v4303_v43 = vpop.eup %4302 }
0x1f4a   :  { %3208 = vrot.lane.b32.xlu2 %v4303_v43, %s4506_s3 }
0x1fa4   :  { %v3209_v63 = vpop.permute.xlu2 %3208  ;;  %v3211_v18 = vpop.permute.xlu0 %3210 }
0x1fa5   :  { %v3219_v17 = vmul.f32 %v3209_v63, %v3199_v19  ;;  %v3207_v3 = vpop.permute.xlu1 %3206  ;;  %v3220_v1 = vmul.f32 %v3211_v18, %v3200_v55 }
0x1fa6   :  { %v3218_v58 = vmul.f32 %v3207_v3, %v3198_v52 }
0x1fa7   :  { %v5501_v2 = vadd.f32 %v3231_v16, %v3219_v17  ;;  %v5505_v4 = vadd.f32 %v3232_v13, %v3220_v1 }
0x1fa8   :  { %v5503_v11 = vadd.f32 %v3230_v26, %v3218_v58 }
0x1fa9   :  { %v3259_v31 = vrot.slane %v5501_v2, 4  ;;  %v3261_v21 = vrot.slane %v5505_v4, 3 }
0x1faa   :  { %v3258_v20 = vrot.slane %v5503_v11, 5 }
0x1fac   :  { %v3260_v22 = vsel %vm368_vm1, %v3259_v31, %v3258_v20 }
0x1fad   :  { %v3213_v33 = vpop.permute.xlu1 %3212  ;;  %v3262_v35 = vsel %vm371_vm2, %v3261_v21, %v3260_v22 }
0x1fae   :  { %v3221_v25 = vmul.f32 %v3213_v33, %v3201_v0 }
0x1fb0   :  { %v5513_v62 = vadd.f32 %v3233_v29, %v3221_v25 }
0x1fb2   :  { %v3263_v53 = vrot.slane %v5513_v62, 2 }
0x1fb4   :  { %v3264_v5 = vsel %vm374_vm3, %v3263_v53, %v3262_v35 }
0x1fb5   :  { %3265 = vrot.lane.b32.xlu2 %v3264_v5, %s4506_s3 }
0x200f   :  { %v3266_v9 = vpop.permute.xlu2 %3265 }
0x2010   :  { %3929 = vmatmul.msk.f32.vlgmr.msra.gmra.mxu1 %vm162_vm4, %v3266_v9 }
0x208d   :  { %v3286_v8 = vpop.f32.mrf.mxu1 }
0x208e   :  { %v3287_v38 = vadd.f32 %v5420_v61, %v3286_v8 }
0x2090   :  { %v3292_v28 = vrot.slane %v3287_v38, 4  ;;  %v3291_v47 = vrot.slane %v3287_v38, 3  ;;  %v3290_v37 = vrot.slane %v3287_v38, 2  ;;  %v3293_v12 = vrot.slane %v3287_v38, 5 }
0x2092   :  { %3382 = vrot.lane.b32.xlu2 %v3292_v28, %s4505_s27  ;;  %3380 = vrot.lane.b32.xlu1 %v3291_v47, %s4505_s27  ;;  %v3300_v43 = vadd.f32 %v3292_v28, %v5218_v48  ;;  %v3299_v52 = vadd.f32 %v3291_v47, %v5215_v24  ;;  %v3298_v54 = vadd.f32 %v3290_v37, %v5212_v40 }
0x2093   :  { %3378 = vrot.lane.b32.xlu0 %v3290_v37, %s4505_s27  ;;  %v3301_v16 = vadd.f32 %v3293_v12, %v5225_v42 }
0x2094   :  { %v3932_v19 = vmul.f32 -1.442695, %v3300_v43  ;;  %v3931_v17 = vmul.f32 -1.442695, %v3299_v52  ;;  %v3930_v3 = vmul.f32 -1.442695, %v3298_v54 }
0x2095   :  { %v3933_v58 = vmul.f32 -1.442695, %v3301_v16 }
0x2096   :  { %4304 = vpow2.f32 %v3932_v19 }
0x209b   :  { %3384 = vrot.lane.b32.xlu0 %v3293_v12, %s4505_s27 }
0x209c   :  { %v4305_v59 = vpop.eup %4304 }
0x209d   :  { %v3316_v63 = vadd.f32 1.0, %v4305_v59 }
0x209f   :  { %4306 = vrcp.f32 %v3316_v63  ;;  %v3359_v45 = vand.u32 2147483648, %v3316_v63  ;;  %vm3353_vm5 = vweird.f32 %v3316_v63  ;;  %v3357_v33 = vand.u32 2147483647, %v3316_v63 }
0x20a0   :  { %4308 = vpow2.f32 %v3931_v17 }
0x20a1   :  { %4310 = vpow2.f32 %v3930_v3  ;;  %v3360_v21 = vor.u32 1.1754944e-38, %v3359_v45  ;;  %vm3358_vm7 = vcmp.eq.f32.partialorder %v3357_v33, 8.507059e+37 }
0x20a2   :  { %4312 = vpow2.f32 %v3933_v58 }
0x20a5   :  { %v4307_v18 = vpop.eup %4306 }
0x20a6   :  { %v3349_v55 = vmul.f32 %v4307_v18, %v3316_v63  ;;  %v4309_v56 = vpop.eup %4308  ;;  %vm3354_vm0 = vweird.f32 %v4307_v18 }
0x20a7   :  { %v4311_v13 = vpop.eup %4310  ;;  %v3315_v31 = vadd.f32 1.0, %v4309_v56  ;;  %vm3355_vm6 = vmor %vm3353_vm5, %vm3354_vm0 }
0x20a8   :  { %v3350_v26 = vsub.f32 1.0, %v3349_v55  ;;  %v3314_v20 = vadd.f32 1.0, %v4311_v13  ;;  %v4313_v25 = vpop.eup %4312 }
0x20a9   :  { %4314 = vrcp.f32 %v3315_v31  ;;  %v3317_v35 = vadd.f32 1.0, %v4313_v25  ;;  %v3344_v52 = vand.u32 2147483648, %v3315_v31  ;;  %vm3338_vm13 = vweird.f32 %v3315_v31 }
0x20aa   :  { %v3351_v1 = vmul.f32 %v4307_v18, %v3350_v26  ;;  %4316 = vrcp.f32 %v3314_v20  ;;  %v3342_v17 = vand.u32 2147483647, %v3315_v31  ;;  %v3329_v3 = vand.u32 2147483648, %v3314_v20 }
0x20ab   :  { %4318 = vrcp.f32 %v3317_v35  ;;  %vm3323_vm15 = vweird.f32 %v3314_v20  ;;  %v3327_v55 = vand.u32 2147483647, %v3314_v20  ;;  %v3345_v26 = vor.u32 1.1754944e-38, %v3344_v52 }
0x20ac   :  { %v3352_v0 = vadd.f32 %v4307_v18, %v3351_v1  ;;  %vm3343_vm5 = vcmp.eq.f32.partialorder %v3342_v17, 8.507059e+37  ;;  %v3330_v1 = vor.u32 1.1754944e-38, %v3329_v3  ;;  %v3443_v3 = vrot.slane %v5501_v2, 7 }
0x20ae   :  { %v3356_v29 = vsel %vm3355_vm6, %v4307_v18, %v3352_v0  ;;  %vm3328_vm6 = vcmp.eq.f32.partialorder %v3327_v55, 8.507059e+37 }
0x20af   :  { %v5530_v53 = vsel %vm3358_vm7, %v3360_v21, %v3356_v29  ;;  %v4315_v9 = vpop.eup %4314 }
0x20b0   :  { %v4317_v8 = vpop.eup %4316  ;;  %v3334_v38 = vmul.f32 %v4315_v9, %v3315_v31  ;;  %vm3339_vm12 = vweird.f32 %v4315_v9  ;;  %v3374_v31 = vand.u32 2147483648, %v3317_v35 }
0x20b1   :  { %v3319_v28 = vmul.f32 %v4317_v8, %v3314_v20  ;;  %v4319_v12 = vpop.eup %4318  ;;  %vm3324_vm8 = vweird.f32 %v4317_v8  ;;  %vm3340_vm14 = vmor %vm3338_vm13, %vm3339_vm12  ;;  %vm3368_vm12 = vweird.f32 %v3317_v35  ;;  %v3372_v20 = vand.u32 2147483647, %v3317_v35 }
0x20b2   :  { %v3335_v47 = vsub.f32 1.0, %v3334_v38  ;;  %v3364_v59 = vmul.f32 %v4319_v12, %v3317_v35  ;;  %vm3325_vm0 = vmor %vm3323_vm15, %vm3324_vm8  ;;  %vm3369_vm7 = vweird.f32 %v4319_v12 }
0x20b3   :  { %v3320_v37 = vsub.f32 1.0, %v3319_v28  ;;  %vm3370_vm8 = vmor %vm3368_vm12, %vm3369_vm7  ;;  %vm3373_vm13 = vcmp.eq.f32.partialorder %v3372_v20, 8.507059e+37 }
0x20b4   :  { %v3336_v43 = vmul.f32 %v4315_v9, %v3335_v47  ;;  %v3365_v18 = vsub.f32 1.0, %v3364_v59 }
0x20b5   :  { %v3321_v19 = vmul.f32 %v4317_v8, %v3320_v37 }
0x20b6   :  { %v3337_v63 = vadd.f32 %v4315_v9, %v3336_v43  ;;  %v3366_v56 = vmul.f32 %v4319_v12, %v3365_v18 }
0x20b7   :  { %v3322_v54 = vadd.f32 %v4317_v8, %v3321_v19 }
0x20b8   :  { %v3341_v16 = vsel %vm3340_vm14, %v4315_v9, %v3337_v63  ;;  %v3367_v21 = vadd.f32 %v4319_v12, %v3366_v56 }
0x20b9   :  { %v3326_v58 = vsel %vm3325_vm0, %v4317_v8, %v3322_v54  ;;  %v3346_v0 = vsel %vm3343_vm5, %v3345_v26, %v3341_v16  ;;  %v3442_v26 = vrot.slane %v5503_v11, 7 }
0x20ba   :  { %v3331_v29 = vsel %vm3328_vm6, %v3330_v1, %v3326_v58  ;;  %v3419_v17 = vsub.f32 1.0, %v3346_v0  ;;  %v3420_v1 = vsub.f32 1.0, %v5530_v53 }
0x20bb   :  { %v3418_v16 = vsub.f32 1.0, %v3331_v29 }
0x20ec   :  { %v3383_v22 = vpop.permute.xlu2 %3382 }
0x20ed   :  { %v3392_v5 = vmul.f32 %v3383_v22, %v5530_v53  ;;  %v3371_v22 = vsel %vm3370_vm8, %v4319_v12, %v3367_v21  ;;  %v3444_v21 = vrot.slane %v5505_v4, 7 }
0x20ef   :  { %3402 = vrot.lane.b32.xlu0 %v3392_v5, %s4505_s27  ;;  %v3375_v5 = vor.u32 1.1754944e-38, %v3374_v31 }
0x20f1   :  { %v3376_v9 = vsel %vm3373_vm13, %v3375_v5, %v3371_v22  ;;  %v3452_v5 = vmul.f32 %v3444_v21, %v5530_v53 }
0x2104   :  { %v3381_v13 = vpop.permute.xlu1 %3380 }
0x2105   :  { %v3391_v45 = vmul.f32 %v3381_v13, %v3346_v0  ;;  %v3379_v33 = vpop.permute.xlu0 %3378 }
0x2106   :  { %v3390_v25 = vmul.f32 %v3379_v33, %v3331_v29  ;;  %v3450_v33 = vmul.f32 %v3442_v26, %v3331_v29 }
0x2107   :  { %3400 = vrot.lane.b32.xlu2 %v3391_v45, %s4505_s27  ;;  %v3451_v45 = vmul.f32 %v3443_v3, %v3346_v0  ;;  %v3445_v0 = vrot.slane %v5513_v62, 7 }
0x2108   :  { %3398 = vrot.lane.b32.xlu1 %v3390_v25, %s4505_s27 }
0x210d   :  { %v3385_v8 = vpop.permute.xlu0 %3384 }
0x210e   :  { %v3393_v38 = vmul.f32 %v3385_v8, %v3376_v9 }
0x2110   :  { %3404 = vrot.lane.b32.xlu1 %v3393_v38, %s4505_s27 }
0x2161   :  { %v3401_v28 = vpop.permute.xlu2 %3400  ;;  %v3403_v47 = vpop.permute.xlu0 %3402 }
0x2162   :  { %v3411_v37 = vadd.f32 %v3401_v28, %v5215_v24  ;;  %v3412_v43 = vadd.f32 %v3403_v47, %v5218_v48  ;;  %v3421_v47 = vsub.f32 1.0, %v3376_v9 }
0x2164   :  { %4320 = vtanh.f32 %v3411_v37  ;;  %v3453_v37 = vmul.f32 %v3445_v0, %v3376_v9 }
0x2165   :  { %4322 = vtanh.f32 %v3412_v43 }
0x216a   :  { %v4321_v19 = vpop.eup %4320 }
0x216b   :  { %v4323_v59 = vpop.eup %4322  ;;  %3428 = vrot.lane.b32.xlu0 %v4321_v19, %s4506_s3 }
0x216c   :  { %3430 = vrot.lane.b32.xlu1 %v4323_v59, %s4506_s3 }
0x217a   :  { %v3399_v35 = vpop.permute.xlu1 %3398 }
0x217b   :  { %v3410_v12 = vadd.f32 %v3399_v35, %v5212_v40 }
0x217d   :  { %4324 = vtanh.f32 %v3410_v12 }
0x2182   :  { %v3405_v63 = vpop.permute.xlu1 %3404 }
0x2183   :  { %v4325_v52 = vpop.eup %4324  ;;  %v3413_v54 = vadd.f32 %v3405_v63, %v5225_v42 }
0x2184   :  { %3426 = vrot.lane.b32.xlu2 %v4325_v52, %s4506_s3 }
0x2185   :  { %4326 = vtanh.f32 %v3413_v54 }
0x218b   :  { %v4327_v18 = vpop.eup %4326 }
0x218c   :  { %3432 = vrot.lane.b32.xlu2 %v4327_v18, %s4506_s3 }
0x21dd   :  { %v3429_v55 = vpop.permute.xlu0 %3428 }
0x21de   :  { %v3439_v58 = vmul.f32 %v3429_v55, %v3419_v17  ;;  %v3427_v56 = vpop.permute.xlu2 %3426  ;;  %v3431_v13 = vpop.permute.xlu1 %3430 }
0x21df   :  { %v3438_v25 = vmul.f32 %v3427_v56, %v3418_v16  ;;  %v3440_v31 = vmul.f32 %v3431_v13, %v3420_v1 }
0x21e0   :  { %v5549_v20 = vadd.f32 %v3451_v45, %v3439_v58 }
0x21e1   :  { %v5551_v22 = vadd.f32 %v3450_v33, %v3438_v25  ;;  %v5554_v8 = vadd.f32 %v3452_v5, %v3440_v31 }
0x21e2   :  { %v3479_v38 = vrot.slane %v5549_v20, 5 }
0x21e3   :  { %v3478_v28 = vrot.slane %v5551_v22, 6  ;;  %v3481_v19 = vrot.slane %v5554_v8, 4 }
0x21e5   :  { %v3480_v35 = vsel %vm368_vm1, %v3479_v38, %v3478_v28 }
0x21e6   :  { %v3433_v29 = vpop.permute.xlu2 %3432  ;;  %v3482_v12 = vsel %vm371_vm2, %v3481_v19, %v3480_v35 }
0x21e7   :  { %v3441_v43 = vmul.f32 %v3433_v29, %v3421_v47 }
0x21e9   :  { %v5560_v59 = vadd.f32 %v3453_v37, %v3441_v43 }
0x21eb   :  { %v3483_v53 = vrot.slane %v5560_v59, 3 }
0x21ed   :  { %v3484_v63 = vsel %vm374_vm3, %v3483_v53, %v3482_v12 }
0x21ee   :  { %3485 = vrot.lane.b32.xlu0 %v3484_v63, %s4506_s3 }
0x2260   :  { %v3486_v52 = vpop.permute.xlu0 %3485 }
0x2261   :  { %3934 = vmatmul.msk.f32.vlgmr.msra.gmra.mxu2 %vm162_vm4, %v3486_v52 }
0x22e4   :  { %v3506_v54 = vpop.f32.mrf.mxu2 }
0x22e5   :  { %v3507_v9 = vadd.f32 %v5420_v61, %v3506_v54 }
0x22e7   :  { %v3512_v18 = vrot.slane %v3507_v9, 3  ;;  %v3511_v17 = vrot.slane %v3507_v9, 2  ;;  %v3510_v3 = vrot.slane %v3507_v9, 1  ;;  %v3513_v55 = vrot.slane %v3507_v9, 4 }
0x22e9   :  { %3602 = vrot.lane.b32.xlu0 %v3512_v18, %s4505_s27  ;;  %3600 = vrot.lane.b32.xlu2 %v3511_v17, %s4505_s27  ;;  %v3519_v16 = vadd.f32 %v3511_v17, %v5215_v24  ;;  %v3520_v61 = vadd.f32 %v3512_v18, %v5218_v48  ;;  %v3518_v1 = vadd.f32 %v3510_v3, %v5212_v40 }
0x22ea   :  { %3598 = vrot.lane.b32.xlu1 %v3510_v3, %s4505_s27  ;;  %v3521_v21 = vadd.f32 %v3513_v55, %v5225_v42 }
0x22eb   :  { %v3936_v26 = vmul.f32 -1.442695, %v3519_v16  ;;  %v3937_v45 = vmul.f32 -1.442695, %v3520_v61  ;;  %v3935_v33 = vmul.f32 -1.442695, %v3518_v1 }
0x22ec   :  { %v3938_v5 = vmul.f32 -1.442695, %v3521_v21 }
0x22ed   :  { %4328 = vpow2.f32 %v3936_v26 }
0x22f2   :  { %3604 = vrot.lane.b32.xlu1 %v3513_v55, %s4505_s27 }
0x22f3   :  { %v4329_v58 = vpop.eup %4328 }
0x22f4   :  { %v3535_v56 = vadd.f32 1.0, %v4329_v58 }
0x22f6   :  { %4330 = vrcp.f32 %v3535_v56  ;;  %v3564_v43 = vand.u32 2147483648, %v3535_v56  ;;  %vm3558_vm2 = vweird.f32 %v3535_v56  ;;  %v3562_v19 = vand.u32 2147483647, %v3535_v56 }
0x22f7   :  { %4332 = vpow2.f32 %v3937_v45 }
0x22f8   :  { %4334 = vpow2.f32 %v3935_v33  ;;  %v3565_v12 = vor.u32 1.1754944e-38, %v3564_v43  ;;  %vm3563_vm14 = vcmp.eq.f32.partialorder %v3562_v19, 8.507059e+37 }
0x22f9   :  { %4336 = vpow2.f32 %v3938_v5 }
0x22fc   :  { %v4331_v13 = vpop.eup %4330 }
0x22fd   :  { %v3554_v25 = vmul.f32 %v4331_v13, %v3535_v56  ;;  %v4333_v38 = vpop.eup %4332  ;;  %vm3559_vm1 = vweird.f32 %v4331_v13 }
0x22fe   :  { %v4335_v47 = vpop.eup %4334  ;;  %v3536_v0 = vadd.f32 1.0, %v4333_v38  ;;  %vm3560_vm3 = vmor %vm3558_vm2, %vm3559_vm1 }
0x22ff   :  { %v3555_v31 = vsub.f32 1.0, %v3554_v25  ;;  %v3534_v29 = vadd.f32 1.0, %v4335_v47  ;;  %v4337_v53 = vpop.eup %4336 }
0x2300   :  { %4338 = vrcp.f32 %v3536_v0  ;;  %v3537_v54 = vadd.f32 1.0, %v4337_v53  ;;  %v3579_v45 = vand.u32 2147483648, %v3536_v0  ;;  %vm3573_vm5 = vweird.f32 %v3536_v0 }
0x2301   :  { %v3556_v28 = vmul.f32 %v4331_v13, %v3555_v31  ;;  %4340 = vrcp.f32 %v3534_v29  ;;  %v3577_v21 = vand.u32 2147483647, %v3536_v0  ;;  %v3549_v31 = vand.u32 2147483648, %v3534_v29 }
0x2302   :  { %4342 = vrcp.f32 %v3537_v54  ;;  %vm3543_vm7 = vweird.f32 %v3534_v29  ;;  %v3547_v5 = vand.u32 2147483647, %v3534_v29  ;;  %vm3588_vm2 = vweird.f32 %v3537_v54 }
0x2303   :  { %v3557_v37 = vadd.f32 %v4331_v13, %v3556_v28  ;;  %vm3578_vm8 = vcmp.eq.f32.partialorder %v3577_v21, 8.507059e+37 }
0x2304   :  { %vm3548_vm13 = vcmp.eq.f32.partialorder %v3547_v5, 8.507059e+37 }
0x2305   :  { %v3561_v35 = vsel %vm3560_vm3, %v4331_v13, %v3557_v37  ;;  %v3550_v37 = vor.u32 1.1754944e-38, %v3549_v31 }
0x2306   :  { %v5577_v52 = vsel %vm3563_vm14, %v3565_v12, %v3561_v35  ;;  %v4339_v18 = vpop.eup %4338 }
0x2307   :  { %v4341_v17 = vpop.eup %4340  ;;  %v3569_v3 = vmul.f32 %v4339_v18, %v3536_v0  ;;  %vm3574_vm15 = vweird.f32 %v4339_v18 }
0x2308   :  { %v3539_v55 = vmul.f32 %v4341_v17, %v3534_v29  ;;  %v4343_v58 = vpop.eup %4342  ;;  %vm3544_vm0 = vweird.f32 %v4341_v17  ;;  %vm3575_vm6 = vmor %vm3573_vm5, %vm3574_vm15  ;;  %v3594_v29 = vand.u32 2147483648, %v3537_v54  ;;  %vm5751_vm15 = vcmask 258052  }
0x2309   :  { %v3570_v16 = vsub.f32 1.0, %v3569_v3  ;;  %v3584_v1 = vmul.f32 %v4343_v58, %v3537_v54  ;;  %vm3545_vm12 = vmor %vm3543_vm7, %vm3544_vm0  ;;  %vm3589_vm1 = vweird.f32 %v4343_v58  ;;  %vm5752_vm0 = vcmask 253952  }
0x230a   :  { %v3540_v26 = vsub.f32 1.0, %v3539_v55  ;;  %vm3590_vm3 = vmor %vm3588_vm2, %vm3589_vm1  ;;  %vm5753_vm5 = vcmask 257027  }
0x230b   :  { %v3571_v56 = vmul.f32 %v4339_v18, %v3570_v16  ;;  %v3585_v25 = vsub.f32 1.0, %v3584_v1  ;;  %vm5755_vm7 = vmmov %vm5752_vm0 }
0x230c   :  { %v3541_v61 = vmul.f32 %v4341_v17, %v3540_v26  ;;  %vm5759_vm1 = vmmov %vm5753_vm5 }
0x230d   :  { %v3572_v13 = vadd.f32 %v4339_v18, %v3571_v56  ;;  %v3586_v47 = vmul.f32 %v4343_v58, %v3585_v25 }
0x230e   :  { %v3542_v33 = vadd.f32 %v4341_v17, %v3541_v61 }
0x230f   :  { %v3576_v38 = vsel %vm3575_vm6, %v4339_v18, %v3572_v13  ;;  %v3587_v12 = vadd.f32 %v4343_v58, %v3586_v47  ;;  %v3595_v18 = vor.u32 1.1754944e-38, %v3594_v29  ;;  %vm5754_vm6 = vcmask 260102  }
0x2310   :  { %v3546_v28 = vsel %vm3545_vm12, %v4341_v17, %v3542_v33  ;;  %v3662_v13 = vrot.slane %v5551_v22, 7  ;;  %vm5756_vm12 = vmmov %vm5752_vm0 }
0x2311   :  { %v5588_v53 = vsel %vm3548_vm13, %v3550_v37, %v3546_v28  ;;  %vm5758_vm13 = vmmov %vm5753_vm5 }
0x2312   :  { %v3670_v31 = vmul.f32 %v3662_v13, %v5588_v53  ;;  %vm5760_vm2 = vmmov %vm5754_vm6 }
0x2343   :  { %v3601_v63 = vpop.permute.xlu2 %3600 }
0x2344   :  { %v3611_v9 = vmul.f32 %v3601_v63, %v5577_v52  ;;  %v3592_v63 = vand.u32 2147483647, %v3537_v54 }
0x2346   :  { %3620 = vrot.lane.b32.xlu0 %v3611_v9, %s4505_s27  ;;  %v3591_v9 = vsel %vm3590_vm3, %v4343_v58, %v3587_v12  ;;  %vm3593_vm14 = vcmp.eq.f32.partialorder %v3592_v63, 8.507059e+37  ;;  %vm5761_vm3 = vmmov %vm5760_vm2 }
0x2347   :  { %v5593_v17 = vsel %vm3593_vm14, %v3595_v18, %v3591_v9  ;;  %vm5762_vm14 = vmmov %vm5752_vm0  ;;  %v3705_v9 = vld [vmem:[%s5743_s9 + $0x18] sm:$0xff]  ;;  %v3704_v18 = vld [vmem:[%s5743_s9 + $0x10] sm:$0xff] }
0x2348   :  { %3734 = vmatpush.msrb.mxu0 %v3705_v9 }
0x234a   :  { %3735 = vmatpush.msrb.mxu0 %v3704_v18 }
0x234e   :  { %2586 = vrot.lane.b32.xlu0 %v5347_v51, %s4506_s3  ;;  %v3580_v51 = vor.u32 1.1754944e-38, %v3579_v45 }
0x2350   :  { %v5585_v19 = vsel %vm3578_vm8, %v3580_v51, %v3576_v38  ;;  %vm5757_vm8 = vmmov %vm5751_vm15 }
0x2356   :  { %3242 = vrot.lane.b32.xlu0 %v5503_v11, %s4506_s3 }
0x235b   :  { %v3603_v43 = vpop.permute.xlu0 %3602 }
0x235c   :  { %v3612_v35 = vmul.f32 %v3603_v43, %v5585_v19  ;;  %v3599_v11 = vpop.permute.xlu1 %3598 }
0x235d   :  { %v3610_v0 = vmul.f32 %v3599_v11, %v5588_v53 }
0x235e   :  { %3622 = vrot.lane.b32.xlu1 %v3612_v35, %s4505_s27 }
0x235f   :  { %3618 = vrot.lane.b32.xlu2 %v3610_v0, %s4505_s27 }
0x2364   :  { %v3605_v3 = vpop.permute.xlu1 %3604 }
0x2365   :  { %v3613_v55 = vmul.f32 %v3605_v3, %v5593_v17  ;;  %v3702_v3 = vld [vmem:[%s5743_s9] sm:$0xff] }
0x2366   :  { %2152 = vrot.lane.b32.xlu1 %v5247_v6, %s4506_s3 }
0x2367   :  { %3624 = vrot.lane.b32.xlu2 %v3613_v55, %s4505_s27 }
0x236e   :  { %2803 = vrot.lane.b32.xlu1 %v5400_v46, %s4506_s3 }
0x236f   :  { %2369 = vrot.lane.b32.xlu2 %v5291_v7, %s4506_s3 }
0x2376   :  { %3462 = vrot.lane.b32.xlu1 %v5551_v22, %s4506_s3 }
0x2377   :  { %3022 = vrot.lane.b32.xlu2 %v5453_v30, %s4506_s3 }
0x237f   :  { %2588 = vrot.lane.b32.xlu2 %v5345_v41, %s4506_s3 }
0x2387   :  { %3244 = vrot.lane.b32.xlu2 %v5501_v2, %s4506_s3 }
0x23b8   :  { %v3621_v6 = vpop.permute.xlu0 %3620 }
0x23b9   :  { %v3631_v54 = vadd.f32 %v3621_v6, %v5215_v24  ;;  %v3619_v16 = vpop.permute.xlu2 %3618 }
0x23ba   :  { %v3630_v46 = vadd.f32 %v3619_v16, %v5212_v40 }
0x23bb   :  { %4344 = vtanh.f32 %v3631_v54 }
0x23bc   :  { %4346 = vtanh.f32 %v3630_v46 }
0x23c0   :  { %v2587_v7 = vpop.permute.xlu0 %2586 }
0x23c1   :  { %v4345_v26 = vpop.eup %4344  ;;  %2598 = vst.msk [vmem:[#allocation2] sm:$0x4] %vm801_vm9, %v2587_v7  ;;  %v3625_v58 = vpop.permute.xlu2 %3624 }
0x23c2   :  { %v4347_v30 = vpop.eup %4346  ;;  %3648 = vrot.lane.b32.xlu1 %v4345_v26, %s4506_s3  ;;  %v3633_v40 = vadd.f32 %v3625_v58, %v5225_v42 }
0x23c3   :  { %3646 = vrot.lane.b32.xlu0 %v4347_v30, %s4506_s3 }
0x23c8   :  { %v3243_v41 = vpop.permute.xlu0 %3242 }
0x23c9   :  { %3254 = vst.msk [vmem:[#allocation2] sm:$0x20] %vm1460_vm10, %v3243_v41  ;;  %v2370_v2 = vpop.permute.xlu2 %2369 }
0x23ca   :  { %2381 = vst.msk [vmem:[#allocation2] sm:$0x2] %vm583_vm11, %v2370_v2  ;;  %2371 = vrot.lane.b32.xlu1 %v5300_v60, %s4506_s3 }
0x23cb   :  { %2154 = vrot.lane.b32.xlu0 %v5240_v39, %s4506_s3 }
0x23d0   :  { %v3623_v24 = vpop.permute.xlu1 %3622 }
0x23d1   :  { %v3632_v56 = vadd.f32 %v3623_v24, %v5218_v48  ;;  %v3023_v61 = vpop.permute.xlu2 %3022 }
0x23d2   :  { %3034 = vst.msk [vmem:[#allocation2] sm:$0x10] %vm5751_vm15, %v3023_v61  ;;  %3024 = vrot.lane.b32.xlu1 %v5451_v23, %s4506_s3  ;;  %v3663_v23 = vrot.slane %v5549_v20, 7  ;;  %vm5763_vm15 = vmmov %vm5757_vm8 }
0x23d3   :  { %4348 = vtanh.f32 %v3632_v56  ;;  %2805 = vrot.lane.b32.xlu0 %v5397_v44, %s4506_s3  ;;  %v3967_v56 = vld [vmem:[%s5744_s10] ss:$0 sm:$0xff]  ;;  %s4507_s10 = smov [#allocation11]  }
0x23d4   :  { %4350 = vtanh.f32 %v3633_v40  ;;  %v3671_v33 = vmul.f32 %v3663_v23, %v5577_v52  ;;  %s3836_s21 = sshll.u32 %s4507_s10, 4  ;;  %s3837_s21 = int_to_ptr.vmem [resolvable:$true] %s3836_s21 }
0x23d8   :  { %v2153_v60 = vpop.permute.xlu1 %2152 }
0x23d9   :  { %v4349_v1 = vpop.eup %4348  ;;  %2164 = vst.msk [vmem:[#allocation2] sm:$0x1] %vm5752_vm0, %v2153_v60  ;;  %v2589_v39 = vpop.permute.xlu2 %2588  ;;  %vm5765_vm0 = vmmov %vm5757_vm8 }
0x23da   :  { %v4351_v42 = vpop.eup %4350  ;;  %2599 = vst.msk [vmem:[#allocation2 + $0x8] sm:$0x4] %vm801_vm9, %v2589_v39  ;;  %2590 = vrot.lane.b32.xlu1 %v5358_v36, %s4506_s3  ;;  %3650 = vrot.lane.b32.xlu2 %v4349_v1, %s4506_s3 }
0x23db   :  { %3652 = vrot.lane.b32.xlu0 %v4351_v42, %s4506_s3 }
0x23e0   :  { %v2804_v48 = vpop.permute.xlu1 %2803 }
0x23e1   :  { %2815 = vst.msk [vmem:[#allocation2] sm:$0x8] %vm5753_vm5, %v2804_v48  ;;  %v3245_v44 = vpop.permute.xlu2 %3244 }
0x23e2   :  { %3255 = vst.msk [vmem:[#allocation2 + $0x8] sm:$0x20] %vm1460_vm10, %v3245_v44  ;;  %3246 = vrot.lane.b32.xlu1 %v5505_v4, %s4506_s3  ;;  %2156 = vrot.lane.b32.xlu2 %v5242_v57, %s4506_s3  ;;  %v3639_v57 = vsub.f32 1.0, %v5577_v52 }
0x23e3   :  { %3464 = vrot.lane.b32.xlu0 %v5549_v20, %s4506_s3 }
0x23e8   :  { %v3463_v36 = vpop.permute.xlu1 %3462 }
0x23e9   :  { %3474 = vst.msk [vmem:[#allocation2] sm:$0x40] %vm5754_vm6, %v3463_v36 }
0x23ea   :  { %2158 = vrot.lane.b32.xlu1 %v5249_v14, %s4506_s3  ;;  %2807 = vrot.lane.b32.xlu2 %v5402_v34, %s4506_s3  ;;  %v3640_v14 = vsub.f32 1.0, %v5585_v19  ;;  %v3664_v34 = vrot.slane %v5554_v8, 7 }
0x23eb   :  { %2373 = vrot.lane.b32.xlu0 %v5294_v32, %s4506_s3  ;;  %v3638_v32 = vsub.f32 1.0, %v5588_v53 }
0x23f2   :  { %3466 = vrot.lane.b32.xlu2 %v5554_v8, %s4506_s3 }
0x23f3   :  { %3026 = vrot.lane.b32.xlu0 %v5455_v27, %s4506_s3 }
0x23fb   :  { %2592 = vrot.lane.b32.xlu0 %v5353_v15, %s4506_s3  ;;  %v3672_v15 = vmul.f32 %v3664_v34, %v5585_v19 }
0x2434   :  { %v3649_v4 = vpop.permute.xlu1 %3648  ;;  %v3651_v45 = vpop.permute.xlu2 %3650 }
0x2435   :  { %v3659_v27 = vmul.f32 %v3649_v4, %v3639_v57  ;;  %v3647_v25 = vpop.permute.xlu0 %3646  ;;  %v3660_v21 = vmul.f32 %v3651_v45, %v3640_v14 }
0x2436   :  { %v3658_v20 = vmul.f32 %v3647_v25, %v3638_v32 }
0x2437   :  { %v3675_v5 = vadd.f32 %v3671_v33, %v3659_v27  ;;  %v3676_v38 = vadd.f32 %v3672_v15, %v3660_v21 }
0x2438   :  { %v3674_v51 = vadd.f32 %v3670_v31, %v3658_v20 }
0x2439   :  { %3684 = vrot.lane.b32.xlu1 %v3675_v5, %s4506_s3  ;;  %3686 = vrot.lane.b32.xlu0 %v3676_v38, %s4506_s3 }
0x243a   :  { %3682 = vrot.lane.b32.xlu2 %v3674_v51, %s4506_s3 }
0x243c   :  { %v2372_v22 = vpop.permute.xlu1 %2371  ;;  %v2157_v8 = vpop.permute.xlu2 %2156 }
0x243d   :  { %2382 = vst.msk [vmem:[#allocation2 + $0x8] sm:$0x2] %vm583_vm11, %v2372_v22  ;;  %v2155_v52 = vpop.permute.xlu0 %2154 }
0x243e   :  { %2165 = vst.msk [vmem:[#allocation2 + $0x8] sm:$0x1] %vm5755_vm7, %v2155_v52 }
0x243f   :  { %2166 = vst.msk [vmem:[#allocation2 + $0x10] sm:$0x1] %vm5756_vm12, %v2157_v8  ;;  %vm5769_vm12 = vmmov %vm5759_vm1 }
0x2441   :  { %2809 = vrot.lane.b32.xlu1 %v5410_v49, %s4506_s3  ;;  %3248 = vrot.lane.b32.xlu0 %v5513_v62, %s4506_s3  ;;  %v3641_v62 = vsub.f32 1.0, %v5593_v17 }
0x2442   :  { %2375 = vrot.lane.b32.xlu2 %v5303_v10, %s4506_s3  ;;  %v3665_v10 = vrot.slane %v5560_v59, 7 }
0x2444   :  { %v3025_v28 = vpop.permute.xlu1 %3024  ;;  %v2808_v47 = vpop.permute.xlu2 %2807  ;;  %v3673_v35 = vmul.f32 %v3665_v10, %v5593_v17  ;;  %v3703_v17 = vld [vmem:[%s5743_s9 + $0x8] sm:$0xff] }
0x2445   :  { %3035 = vst.msk [vmem:[#allocation2 + $0x8] sm:$0x10] %vm5757_vm8, %v3025_v28  ;;  %v2806_v37 = vpop.permute.xlu0 %2805  ;;  %3736 = vmatpush.msrb.mxu0 %v3703_v17 }
0x2446   :  { %2816 = vst.msk [vmem:[#allocation2 + $0x8] sm:$0x8] %vm5758_vm13, %v2806_v37  ;;  %vm3827_vm13 = vcmask 64512  }
0x2447   :  { %2817 = vst.msk [vmem:[#allocation2 + $0x10] sm:$0x8] %vm5759_vm1, %v2808_v47  ;;  %3737 = vmatpush.msrb.mxu0 %v3702_v3 }
0x2449   :  { %3468 = vrot.lane.b32.xlu1 %v5560_v59, %s4506_s3 }
0x244a   :  { %3028 = vrot.lane.b32.xlu2 %v5461_v50, %s4506_s3 }
0x244c   :  { %v2591_v49 = vpop.permute.xlu1 %2590  ;;  %v3467_v43 = vpop.permute.xlu2 %3466 }
0x244d   :  { %2600 = vst.msk [vmem:[#allocation2 + $0x10] sm:$0x4] %vm801_vm9, %v2591_v49  ;;  %v3653_v19 = vpop.permute.xlu0 %3652 }
0x244e   :  { %v3661_v11 = vmul.f32 %v3653_v19, %v3641_v62  ;;  %3476 = vst.msk [vmem:[#allocation2 + $0x10] sm:$0x40] %vm5760_vm2, %v3467_v43 }
0x2450   :  { %v3677_v53 = vadd.f32 %v3673_v35, %v3661_v11 }
0x2452   :  { %3688 = vrot.lane.b32.xlu2 %v3677_v53, %s4506_s3 }
0x2454   :  { %v3247_v0 = vpop.permute.xlu1 %3246 }
0x2455   :  { %3256 = vst.msk [vmem:[#allocation2 + $0x10] sm:$0x20] %vm1460_vm10, %v3247_v0  ;;  %v3465_v50 = vpop.permute.xlu0 %3464 }
0x2456   :  { %3475 = vst.msk [vmem:[#allocation2 + $0x8] sm:$0x40] %vm5761_vm3, %v3465_v50 }
0x245c   :  { %v2159_v12 = vpop.permute.xlu1 %2158 }
0x245d   :  { %2167 = vst.msk [vmem:[#allocation2 + $0x18] sm:$0x1] %vm5762_vm14, %v2159_v12  ;;  %v2374_v59 = vpop.permute.xlu0 %2373 }
0x245e   :  { %2383 = vst.msk [vmem:[#allocation2 + $0x10] sm:$0x2] %vm583_vm11, %v2374_v59 }
0x2465   :  { %v3027_v29 = vpop.permute.xlu0 %3026 }
0x2466   :  { %3036 = vst.msk [vmem:[#allocation2 + $0x10] sm:$0x10] %vm5763_vm15, %v3027_v29 }
0x246d   :  { %v2593_v63 = vpop.permute.xlu0 %2592 }
0x246e   :  { %2601 = vst.msk [vmem:[#allocation2 + $0x18] sm:$0x4] %vm801_vm9, %v2593_v63  ;;  %vm5764_vm9 = vcmask 261127  }
0x246f   :  { %vm5766_vm5 = vmmov %vm5764_vm9 }
0x2470   :  { %vm5767_vm6 = vmmov %vm5766_vm5 }
0x2471   :  { %vm5768_vm7 = vmmov %vm5766_vm5 }
0x2494   :  { %v3683_v55 = vpop.permute.xlu2 %3682 }
0x2495   :  { %3694 = vst.msk [vmem:[#allocation2] sm:$0x80] %vm5764_vm9, %v3683_v55 }
0x249c   :  { %v2376_v6 = vpop.permute.xlu2 %2375  ;;  %v3698_v54 = vld [vmem:[#allocation2] sm:$0xff] }
0x249d   :  { %2384 = vst.msk [vmem:[#allocation2 + $0x18] sm:$0x2] %vm583_vm11, %v2376_v6  ;;  %3939 = vmatmul.msk.f32.vlgmr.msrb.gmra.mxu0 %vm162_vm4, %v3698_v54  ;;  %vm5770_vm11 = vmmov %vm5760_vm2 }
0x24a4   :  { %v3029_v16 = vpop.permute.xlu2 %3028 }
0x24a5   :  { %3037 = vst.msk [vmem:[#allocation2 + $0x18] sm:$0x10] %vm5765_vm0, %v3029_v16 }
0x24ab   :  { %v3685_v46 = vpop.permute.xlu1 %3684  ;;  %v3687_v7 = vpop.permute.xlu0 %3686 }
0x24ac   :  { %3695 = vst.msk [vmem:[#allocation2 + $0x8] sm:$0x80] %vm5766_vm5, %v3685_v46  ;;  %v3689_v26 = vpop.permute.xlu2 %3688 }
0x24ad   :  { %3696 = vst.msk [vmem:[#allocation2 + $0x10] sm:$0x80] %vm5767_vm6, %v3687_v7 }
0x24ae   :  { %3697 = vst.msk [vmem:[#allocation2 + $0x18] sm:$0x80] %vm5768_vm7, %v3689_v26 }
0x24b3   :  { %v2810_v58 = vpop.permute.xlu1 %2809  ;;  %v3249_v30 = vpop.permute.xlu0 %3248  ;;  %v3699_v41 = vld [vmem:[#allocation2 + $0x8] sm:$0xff] }
0x24b4   :  { %2818 = vst.msk [vmem:[#allocation2 + $0x18] sm:$0x8] %vm5769_vm12, %v2810_v58  ;;  %3940 = vmatmul.msk.f32.gmra.mxu0 %vm162_vm4, %v3699_v41  ;;  %v3700_v40 = vld [vmem:[#allocation2 + $0x10] sm:$0xff] }
0x24b5   :  { %3257 = vst.msk [vmem:[#allocation2 + $0x18] sm:$0x20] %vm1460_vm10, %v3249_v30 }
0x24bb   :  { %v3469_v2 = vpop.permute.xlu1 %3468 }
0x24bc   :  { %3477 = vst.msk [vmem:[#allocation2 + $0x18] sm:$0x40] %vm5770_vm11, %v3469_v2  ;;  %3941 = vmatmul.msk.f32.gmra.mxu0 %vm162_vm4, %v3700_v40 }
0x24c3   :  { %v3701_v24 = vld [vmem:[#allocation2 + $0x18] sm:$0xff] }
0x24c4   :  { %3942 = vmatmul.msk.f32.gmra.mxu0 %vm162_vm4, %v3701_v24 }
0x251a   :  { %v3739_v61 = vpop.f32.mrf.mxu0 }
0x251b   :  { %v3740_v60 = vadd.f32 %v3967_v56, %v3739_v61 }
0x251d   :  { %v3943_v1 = vmul.f32 -1.442695, %v3740_v60 }
0x251f   :  { %4352 = vpow2.f32 %v3943_v1 }
0x2525   :  { %v4353_v39 = vpop.eup %4352 }
0x2526   :  { %v3763_v42 = vadd.f32 1.0, %v4353_v39 }
0x2528   :  { %4354 = vrcp.f32 %v3763_v42  ;;  %v3778_v23 = vand.u32 2147483648, %v3763_v42  ;;  %v3776_v4 = vand.u32 2147483647, %v3763_v42  ;;  %vm3772_vm4 = vweird.f32 %v3763_v42 }
0x252a   :  { %v3779_v45 = vor.u32 1.1754944e-38, %v3778_v23  ;;  %vm3777_vm1 = vcmp.eq.f32.partialorder %v3776_v4, 8.507059e+37 }
0x252e   :  { %v4355_v48 = vpop.eup %4354 }
0x252f   :  { %v3768_v44 = vmul.f32 %v4355_v48, %v3763_v42  ;;  %vm3773_vm10 = vweird.f32 %v4355_v48 }
0x2530   :  { %vm3774_vm8 = vmor %vm3772_vm4, %vm3773_vm10 }
0x2531   :  { %v3769_v36 = vsub.f32 1.0, %v3768_v44  ;;  %v3742_v57 = vpop.f32.mrf.mxu0 }
0x2532   :  { %v3743_v14 = vadd.f32 %v3967_v56, %v3742_v57 }
0x2533   :  { %v3770_v34 = vmul.f32 %v4355_v48, %v3769_v36 }
0x2534   :  { %v3944_v32 = vmul.f32 -1.442695, %v3743_v14 }
0x2535   :  { %v3771_v13 = vadd.f32 %v4355_v48, %v3770_v34 }
0x2536   :  { %4356 = vpow2.f32 %v3944_v32 }
0x2537   :  { %v3775_v33 = vsel %vm3774_vm8, %v4355_v48, %v3771_v13 }
0x2538   :  { %v3780_v27 = vsel %vm3777_vm1, %v3779_v45, %v3775_v33 }
0x2539   :  { %v3745_v25 = vpop.f32.mrf.mxu0  ;;  %3828 = vst.msk [vmem:[#allocation11] sm:$0xff] %vm3827_vm13, %v3780_v27 }
0x253a   :  { %v3746_v15 = vadd.f32 %v3967_v56, %v3745_v25 }
0x253c   :  { %v4357_v21 = vpop.eup %4356  ;;  %v3945_v31 = vmul.f32 -1.442695, %v3746_v15 }
0x253d   :  { %v3764_v20 = vadd.f32 1.0, %v4357_v21 }
0x253e   :  { %4358 = vpow2.f32 %v3945_v31 }
0x253f   :  { %4360 = vrcp.f32 %v3764_v20  ;;  %v3793_v49 = vand.u32 2147483648, %v3764_v20  ;;  %v3791_v62 = vand.u32 2147483647, %v3764_v20  ;;  %vm3787_vm3 = vweird.f32 %v3764_v20 }
0x2541   :  { %v3748_v5 = vpop.f32.mrf.mxu0  ;;  %v3794_v11 = vor.u32 1.1754944e-38, %v3793_v49  ;;  %vm3792_vm15 = vcmp.eq.f32.partialorder %v3791_v62, 8.507059e+37 }
0x2542   :  { %v3749_v38 = vadd.f32 %v3967_v56, %v3748_v5 }
0x2544   :  { %v4359_v51 = vpop.eup %4358  ;;  %v3946_v22 = vmul.f32 -1.442695, %v3749_v38 }
0x2545   :  { %v4361_v8 = vpop.eup %4360  ;;  %v3765_v52 = vadd.f32 1.0, %v4359_v51 }
0x2546   :  { %v3783_v28 = vmul.f32 %v4361_v8, %v3764_v20  ;;  %4362 = vpow2.f32 %v3946_v22  ;;  %vm3788_vm2 = vweird.f32 %v4361_v8 }
0x2547   :  { %4364 = vrcp.f32 %v3765_v52  ;;  %vm3789_vm14 = vmor %vm3787_vm3, %vm3788_vm2  ;;  %v3808_v59 = vand.u32 2147483648, %v3765_v52  ;;  %v3806_v63 = vand.u32 2147483647, %v3765_v52  ;;  %vm3802_vm0 = vweird.f32 %v3765_v52 }
0x2548   :  { %v3784_v47 = vsub.f32 1.0, %v3783_v28 }
0x2549   :  { %v3809_v17 = vor.u32 1.1754944e-38, %v3808_v59  ;;  %vm3807_vm6 = vcmp.eq.f32.partialorder %v3806_v63, 8.507059e+37 }
0x254a   :  { %v3785_v37 = vmul.f32 %v4361_v8, %v3784_v47 }
0x254c   :  { %v4363_v10 = vpop.eup %4362  ;;  %v3786_v43 = vadd.f32 %v4361_v8, %v3785_v37 }
0x254d   :  { %v4365_v19 = vpop.eup %4364  ;;  %v3766_v35 = vadd.f32 1.0, %v4363_v10 }
0x254e   :  { %v3798_v53 = vmul.f32 %v4365_v19, %v3765_v52  ;;  %v3790_v0 = vsel %vm3789_vm14, %v4361_v8, %v3786_v43  ;;  %vm3803_vm9 = vweird.f32 %v4365_v19 }
0x254f   :  { %4366 = vrcp.f32 %v3766_v35  ;;  %v3795_v12 = vsel %vm3792_vm15, %v3794_v11, %v3790_v0  ;;  %vm3804_vm5 = vmor %vm3802_vm0, %vm3803_vm9  ;;  %v3823_v16 = vand.u32 2147483648, %v3766_v35  ;;  %v3821_v7 = vand.u32 2147483647, %v3766_v35 }
0x2550   :  { %v3799_v50 = vsub.f32 1.0, %v3798_v53  ;;  %3829 = vst.msk [vmem:[#allocation11 + $0x8] sm:$0xff] %vm3827_vm13, %v3795_v12  ;;  %vm3817_vm12 = vweird.f32 %v3766_v35 }
0x2551   :  { %v3824_v58 = vor.u32 1.1754944e-38, %v3823_v16  ;;  %vm3822_vm10 = vcmp.eq.f32.partialorder %v3821_v7, 8.507059e+37 }
0x2552   :  { %v3800_v29 = vmul.f32 %v4365_v19, %v3799_v50 }
0x2554   :  { %v3801_v9 = vadd.f32 %v4365_v19, %v3800_v29 }
0x2555   :  { %v4367_v18 = vpop.eup %4366 }
0x2556   :  { %v3813_v3 = vmul.f32 %v4367_v18, %v3766_v35  ;;  %v3805_v55 = vsel %vm3804_vm5, %v4365_v19, %v3801_v9  ;;  %vm3818_vm7 = vweird.f32 %v4367_v18 }
0x2557   :  { %v3810_v6 = vsel %vm3807_vm6, %v3809_v17, %v3805_v55  ;;  %vm3819_vm11 = vmor %vm3817_vm12, %vm3818_vm7 }
0x2558   :  { %v3814_v54 = vsub.f32 1.0, %v3813_v3  ;;  %3830 = vst.msk [vmem:[#allocation11 + $0x10] sm:$0xff] %vm3827_vm13, %v3810_v6 }
0x255a   :  { %v3815_v46 = vmul.f32 %v4367_v18, %v3814_v54 }
0x255c   :  { %v3816_v26 = vadd.f32 %v4367_v18, %v3815_v46 }
0x255e   :  { %v3820_v30 = vsel %vm3819_vm11, %v4367_v18, %v3816_v26 }
0x255f   :  { %v3825_v41 = vsel %vm3822_vm10, %v3824_v58, %v3820_v30 }
0x2560   :  { %3831 = vst.msk [vmem:[#allocation11 + $0x18] sm:$0xff] %vm3827_vm13, %v3825_v41 }
0x2561   :  { %3844 = dma.vmem_to_hbm [thread:$0]  %s3837_s21, 512, %s3839_s0, [#allocation5], %s4499_s25, %s4499_s25, %s4500_s26  }
0x2562   :  { %4496 = dma.done.wait [#allocation5], 512  }
0x2563   :  { %4497 = vsyncadd [#allocation5], 4294966784 }
0x2564   :  { %3849 = vsyncpa [#allocation4], 1 }
0x2565   :  { %3850 = vsyncpa [#allocation7], 1 }
0x2566   :  { %3851 = vsyncpa [#allocation10], 1 }
0x2567   :  { %3852 = vsyncpa [#allocation5], 1 }

</bundles_post_ra>
